<compile_context>
chip_gen: v5e
topology: v5e:2x2
jax: 0.10.0
libtpu: 0.0.40
codegen_flags: <defaults>
</compile_context>

<pallas_src>
import functools

import jax
import jax.numpy as jnp
from jax import lax
from jax.experimental import pallas as pl
from jax.experimental.pallas import tpu as pltpu

UNITS = 100          # logical hidden width (matches the PyTorch module)
UNITS_PAD = 128      # lane/sublane friendly padded hidden width
IN_FEATS = 3         # x, y, t
IN_PAD = 8           # padded feature count for the layer-1 weight slab
OUT_FEATS = 1
LANE = 128


def _round_up(a, m):
    return ((a + m - 1) // m) * m


def _mlp_kernel(x_ref, y_ref, t_ref,
                w1_ref, b1_ref,
                w2_ref, b2_ref,
                w3_ref, b3_ref,
                w4_ref, b4_ref,
                w5_ref, b5_ref,
                w6_ref, b6_ref,
                out_ref, *, mxu_dtype, precision):
    # Batch lives on the lane axis: activations are [UNITS_PAD, tile].
    x = x_ref[...]                                   # [1, tile]
    y = y_ref[...]
    t = t_ref[...]

    # ---- Layer 1 on the VPU (only 3 real input features; a K=3/8 matmul would
    # still burn a full tile/8-push MXU pipeline). ----------------------------
    w1 = w1_ref[...]                                 # [128, 8]; cols 0..2 real
    h = jnp.tanh(w1[:, 0:1] * x + w1[:, 1:2] * y + w1[:, 2:3] * t
                 + b1_ref[...])                      # [128, tile], f32

    # ---- Layers 2..5 on the MXU (K = N = 128), f32 accumulation. ------------
    for w_ref, b_ref in ((w2_ref, b2_ref), (w3_ref, b3_ref),
                         (w4_ref, b4_ref), (w5_ref, b5_ref)):
        z = jnp.dot(w_ref[...].astype(mxu_dtype), h.astype(mxu_dtype),
                    preferred_element_type=jnp.float32,
                    precision=precision)             # [128, tile]
        h = jnp.tanh(z + b_ref[...])                 # bias/tanh stay f32

    # ---- Layer 6 on the VPU + XLU (single output unit -> sublane reduce);
    # the [1, tile] result is a lane-dense store. ------------------------------
    out_ref[...] = (jnp.sum(h * w6_ref[...], axis=0, keepdims=True)
                    + b6_ref[...])                   # [1, tile]


def pad_params(params):
    """One-time pad + transpose of the raw [fan_in, fan_out] params into the
    kernel's lane-friendly layout.  Call once; pass the result to the forward."""
    (w1, b1, w2, b2, w3, b3, w4, b4, w5, b5, w6, b6) = params

    def p(a, rows, cols):
        return jnp.pad(a, ((0, rows - a.shape[0]), (0, cols - a.shape[1])))

    out = [p(w1.T, UNITS_PAD, IN_PAD),               # [128, 8]
           p(b1.T, UNITS_PAD, 1)]                    # [128, 1]
    for w, b in ((w2, b2), (w3, b3), (w4, b4), (w5, b5)):
        out.append(p(w.T, UNITS_PAD, UNITS_PAD))     # [128, 128]
        out.append(p(b.T, UNITS_PAD, 1))             # [128, 1]
    out.append(p(w6, UNITS_PAD, 1))                  # [128, 1]
    out.append(b6)                                   # [1, 1]
    return tuple(out)


@functools.partial(jax.jit, static_argnames=("tm", "use_bf16"))
def neural_network_forward(x, y, t, padded_params, *, tm=1024, use_bf16=True):
    """x, y, t: [N, 1] float32.  padded_params: output of pad_params().
    Returns [N, 1] float32."""
    flat_params = tuple(padded_params)
    n = x.shape[0]
    xr = x.reshape(1, n)
    yr = y.reshape(1, n)
    tr = t.reshape(1, n)

    # Batch maps to the lane axis -> the row tile must be a multiple of 128.
    # For moderate N shrink the tile so the "parallel" grid has >= 2 steps and
    # both v7x TensorCores get work; large N just uses tm.
    if _round_up(n, LANE) >= 2 * LANE:
        tm_eff = max(LANE, min(tm, _round_up(pl.cdiv(n, 2), LANE)))
    else:
        tm_eff = LANE
    n_pad = _round_up(n, tm_eff)
    if n_pad != n:
        pad = ((0, 0), (0, n_pad - n))
        xr, yr, tr = (jnp.pad(a, pad) for a in (xr, yr, tr))

    mxu_dtype = jnp.bfloat16 if use_bf16 else jnp.float32
    precision = None if use_bf16 else lax.Precision.HIGHEST
    kernel = functools.partial(_mlp_kernel, mxu_dtype=mxu_dtype,
                               precision=precision)

    batch_spec = pl.BlockSpec((1, tm_eff), lambda i: (0, i))
    # Whole-array blocks with a constant block index -> VMEM-resident weights.
    full_spec = lambda a: pl.BlockSpec(a.shape, lambda i: (0, 0))
    in_specs = ([batch_spec, batch_spec, batch_spec]
                + [full_spec(p) for p in flat_params])

    out = pl.pallas_call(
        kernel,
        out_shape=jax.ShapeDtypeStruct((1, n_pad), jnp.float32),
        grid_spec=pltpu.PrefetchScalarGridSpec(
            num_scalar_prefetch=0,
            grid=(n_pad // tm_eff,),
            in_specs=in_specs,
            out_specs=pl.BlockSpec((1, tm_eff), lambda i: (0, i)),
        ),
        compiler_params=pltpu.CompilerParams(
            dimension_semantics=("parallel",)),
    )(xr, yr, tr, *flat_params)

    return out[:, :n].reshape(n, OUT_FEATS)


def init_params(key, units=UNITS):
    """Deterministic init mimicking torch.nn.Linear default (U[-1/sqrt(fan_in), +])."""
    dims = [(IN_FEATS, units), (units, units), (units, units),
            (units, units), (units, units), (units, OUT_FEATS)]
    params = []
    for (fan_in, fan_out) in dims:
        key, kw, kb = jax.random.split(key, 3)
        bound = 1.0 / jnp.sqrt(float(fan_in))
        # stored as [fan_in, fan_out] so the reference computes h @ W + b
        w = jax.random.uniform(kw, (fan_in, fan_out), jnp.float32, -bound, bound)
        b = jax.random.uniform(kb, (1, fan_out), jnp.float32, -bound, bound)
        params.extend([w, b])
    return tuple(params)


def reference_forward(x, y, t, params, *, precision=None):
    (w1, b1, w2, b2, w3, b3, w4, b4, w5, b5, w6, b6) = params
    h = jnp.concatenate([x, y, t], axis=-1)
    for w, b in ((w1, b1), (w2, b2), (w3, b3), (w4, b4), (w5, b5)):
        h = jnp.tanh(jnp.dot(h, w, precision=precision) + b)
    return jnp.dot(h, w6, precision=precision) + b6


if __name__ == "__main__":
    key = jax.random.PRNGKey(0)
    kp, kx, ky, kt = jax.random.split(key, 4)

    # Small, deliberately non-tile-aligned batch of (x, y, t) sample points to
    # exercise the padding path and the multi-step grid.
    N = 300
    params = init_params(kp, UNITS)
    padded = pad_params(params)            # hoisted one-time padding/transpose
    x = jax.random.normal(kx, (N, 1), jnp.float32)
    y = jax.random.normal(ky, (N, 1), jnp.float32)
    t = jax.random.normal(kt, (N, 1), jnp.float32)

    ref = reference_forward(x, y, t, params, precision=lax.Precision.HIGHEST)

    # Exact-f32 path (explicit HIGHEST precision on the MXU), small tile.
    out_f32 = jax.block_until_ready(
        neural_network_forward(x, y, t, padded, tm=128, use_bf16=False))
    assert out_f32.shape == (N, 1)
    assert jnp.allclose(out_f32, ref, atol=1e-4, rtol=1e-4), "f32 path mismatch"

    # Default fast path: bf16 MXU operands, f32 accumulation / tanh / bias.
    out_bf16 = jax.block_until_ready(neural_network_forward(x, y, t, padded))
    assert out_bf16.shape == (N, 1)
    assert jnp.allclose(out_bf16, ref, atol=3e-2, rtol=3e-2), "bf16 path mismatch"

    print("KERNEL_OK")
</pallas_src>

<mosaic_0001>
module attributes {stable_mosaic.version = 11 : i64} {
  func.func @_mlp_kernel(%arg0: i32, %arg1: memref<1x128xf32, #tpu.memory_space<vmem>>, %arg2: memref<1x128xf32, #tpu.memory_space<vmem>>, %arg3: memref<1x128xf32, #tpu.memory_space<vmem>>, %arg4: memref<128x8xf32, #tpu.memory_space<vmem>>, %arg5: memref<128x1xf32, #tpu.memory_space<vmem>>, %arg6: memref<128x128xf32, #tpu.memory_space<vmem>>, %arg7: memref<128x1xf32, #tpu.memory_space<vmem>>, %arg8: memref<128x128xf32, #tpu.memory_space<vmem>>, %arg9: memref<128x1xf32, #tpu.memory_space<vmem>>, %arg10: memref<128x128xf32, #tpu.memory_space<vmem>>, %arg11: memref<128x1xf32, #tpu.memory_space<vmem>>, %arg12: memref<128x128xf32, #tpu.memory_space<vmem>>, %arg13: memref<128x1xf32, #tpu.memory_space<vmem>>, %arg14: memref<128x1xf32, #tpu.memory_space<vmem>>, %arg15: memref<1x1xf32, #tpu.memory_space<vmem>>, %arg16: memref<1x128xf32, #tpu.memory_space<vmem>>) attributes {dimension_semantics = [#tpu.dimension_semantics<parallel>], iteration_bounds = array<i64: 3>, scalar_prefetch = 0 : i64, scratch_operands = 0 : i64, tpu.core_type = #tpu.core_type<tc>, window_params = [{transform_indices = @transform_0, window_bounds = array<i64: 1, 128>}, {transform_indices = @transform_1, window_bounds = array<i64: 1, 128>}, {transform_indices = @transform_2, window_bounds = array<i64: 1, 128>}, {pipeline_mode = #tpu.pipeline_mode<synchronous>, transform_indices = @transform_3, window_bounds = array<i64: 128, 8>}, {pipeline_mode = #tpu.pipeline_mode<synchronous>, transform_indices = @transform_4, window_bounds = array<i64: 128, 1>}, {pipeline_mode = #tpu.pipeline_mode<synchronous>, transform_indices = @transform_5, window_bounds = array<i64: 128, 128>}, {pipeline_mode = #tpu.pipeline_mode<synchronous>, transform_indices = @transform_6, window_bounds = array<i64: 128, 1>}, {pipeline_mode = #tpu.pipeline_mode<synchronous>, transform_indices = @transform_7, window_bounds = array<i64: 128, 128>}, {pipeline_mode = #tpu.pipeline_mode<synchronous>, transform_indices = @transform_8, window_bounds = array<i64: 128, 1>}, {pipeline_mode = #tpu.pipeline_mode<synchronous>, transform_indices = @transform_9, window_bounds = array<i64: 128, 128>}, {pipeline_mode = #tpu.pipeline_mode<synchronous>, transform_indices = @transform_10, window_bounds = array<i64: 128, 1>}, {pipeline_mode = #tpu.pipeline_mode<synchronous>, transform_indices = @transform_11, window_bounds = array<i64: 128, 128>}, {pipeline_mode = #tpu.pipeline_mode<synchronous>, transform_indices = @transform_12, window_bounds = array<i64: 128, 1>}, {pipeline_mode = #tpu.pipeline_mode<synchronous>, transform_indices = @transform_13, window_bounds = array<i64: 128, 1>}, {pipeline_mode = #tpu.pipeline_mode<synchronous>, transform_indices = @transform_14, window_bounds = array<i64: 1, 1>}, {transform_indices = @transform_15, window_bounds = array<i64: 1, 128>}]} {
    %c0 = arith.constant 0 : index
    %c0_0 = arith.constant 0 : index
    %0 = vector.load %arg1[%c0, %c0_0] : memref<1x128xf32, #tpu.memory_space<vmem>>, vector<1x128xf32>
    %c0_1 = arith.constant 0 : index
    %c0_2 = arith.constant 0 : index
    %1 = vector.load %arg2[%c0_1, %c0_2] : memref<1x128xf32, #tpu.memory_space<vmem>>, vector<1x128xf32>
    %c0_3 = arith.constant 0 : index
    %c0_4 = arith.constant 0 : index
    %2 = vector.load %arg3[%c0_3, %c0_4] : memref<1x128xf32, #tpu.memory_space<vmem>>, vector<1x128xf32>
    %c0_5 = arith.constant 0 : index
    %c0_6 = arith.constant 0 : index
    %3 = vector.load %arg4[%c0_5, %c0_6] : memref<128x8xf32, #tpu.memory_space<vmem>>, vector<128x8xf32>
    %4 = vector.extract_strided_slice %3 {offsets = [0, 0], sizes = [128, 1], strides = [1, 1]} : vector<128x8xf32> to vector<128x1xf32>
    %5 = vector.broadcast %4 : vector<128x1xf32> to vector<128x128xf32>
    %6 = vector.broadcast %0 : vector<1x128xf32> to vector<128x128xf32>
    %7 = arith.mulf %5, %6 : vector<128x128xf32>
    %8 = vector.extract_strided_slice %3 {offsets = [0, 1], sizes = [128, 1], strides = [1, 1]} : vector<128x8xf32> to vector<128x1xf32>
    %9 = vector.broadcast %8 : vector<128x1xf32> to vector<128x128xf32>
    %10 = vector.broadcast %1 : vector<1x128xf32> to vector<128x128xf32>
    %11 = arith.mulf %9, %10 : vector<128x128xf32>
    %12 = arith.addf %7, %11 : vector<128x128xf32>
    %13 = vector.extract_strided_slice %3 {offsets = [0, 2], sizes = [128, 1], strides = [1, 1]} : vector<128x8xf32> to vector<128x1xf32>
    %14 = vector.broadcast %13 : vector<128x1xf32> to vector<128x128xf32>
    %15 = vector.broadcast %2 : vector<1x128xf32> to vector<128x128xf32>
    %16 = arith.mulf %14, %15 : vector<128x128xf32>
    %17 = arith.addf %12, %16 : vector<128x128xf32>
    %c0_7 = arith.constant 0 : index
    %c0_8 = arith.constant 0 : index
    %18 = vector.load %arg5[%c0_7, %c0_8] : memref<128x1xf32, #tpu.memory_space<vmem>>, vector<128x1xf32>
    %19 = vector.broadcast %18 : vector<128x1xf32> to vector<128x128xf32>
    %20 = arith.addf %17, %19 : vector<128x128xf32>
    %21 = math.tanh %20 : vector<128x128xf32>
    %c0_9 = arith.constant 0 : index
    %c0_10 = arith.constant 0 : index
    %22 = vector.load %arg6[%c0_9, %c0_10] : memref<128x128xf32, #tpu.memory_space<vmem>>, vector<128x128xf32>
    %cst = arith.constant dense<0.000000e+00> : vector<128x128xf32>
    %23 = tpu.matmul %22, %21, %cst {dimension_numbers = #tpu.dot_dimension_numbers<[1], [0], [0], [1], [0, 0, 1, 1], [], []>, precision = #tpu.contract_precision<fp32>} : vector<128x128xf32>, vector<128x128xf32>, vector<128x128xf32> -> vector<128x128xf32>
    %c0_11 = arith.constant 0 : index
    %c0_12 = arith.constant 0 : index
    %24 = vector.load %arg7[%c0_11, %c0_12] : memref<128x1xf32, #tpu.memory_space<vmem>>, vector<128x1xf32>
    %25 = vector.broadcast %24 : vector<128x1xf32> to vector<128x128xf32>
    %26 = arith.addf %23, %25 : vector<128x128xf32>
    %27 = math.tanh %26 : vector<128x128xf32>
    %c0_13 = arith.constant 0 : index
    %c0_14 = arith.constant 0 : index
    %28 = vector.load %arg8[%c0_13, %c0_14] : memref<128x128xf32, #tpu.memory_space<vmem>>, vector<128x128xf32>
    %cst_15 = arith.constant dense<0.000000e+00> : vector<128x128xf32>
    %29 = tpu.matmul %28, %27, %cst_15 {dimension_numbers = #tpu.dot_dimension_numbers<[1], [0], [0], [1], [0, 0, 1, 1], [], []>, precision = #tpu.contract_precision<fp32>} : vector<128x128xf32>, vector<128x128xf32>, vector<128x128xf32> -> vector<128x128xf32>
    %c0_16 = arith.constant 0 : index
    %c0_17 = arith.constant 0 : index
    %30 = vector.load %arg9[%c0_16, %c0_17] : memref<128x1xf32, #tpu.memory_space<vmem>>, vector<128x1xf32>
    %31 = vector.broadcast %30 : vector<128x1xf32> to vector<128x128xf32>
    %32 = arith.addf %29, %31 : vector<128x128xf32>
    %33 = math.tanh %32 : vector<128x128xf32>
    %c0_18 = arith.constant 0 : index
    %c0_19 = arith.constant 0 : index
    %34 = vector.load %arg10[%c0_18, %c0_19] : memref<128x128xf32, #tpu.memory_space<vmem>>, vector<128x128xf32>
    %cst_20 = arith.constant dense<0.000000e+00> : vector<128x128xf32>
    %35 = tpu.matmul %34, %33, %cst_20 {dimension_numbers = #tpu.dot_dimension_numbers<[1], [0], [0], [1], [0, 0, 1, 1], [], []>, precision = #tpu.contract_precision<fp32>} : vector<128x128xf32>, vector<128x128xf32>, vector<128x128xf32> -> vector<128x128xf32>
    %c0_21 = arith.constant 0 : index
    %c0_22 = arith.constant 0 : index
    %36 = vector.load %arg11[%c0_21, %c0_22] : memref<128x1xf32, #tpu.memory_space<vmem>>, vector<128x1xf32>
    %37 = vector.broadcast %36 : vector<128x1xf32> to vector<128x128xf32>
    %38 = arith.addf %35, %37 : vector<128x128xf32>
    %39 = math.tanh %38 : vector<128x128xf32>
    %c0_23 = arith.constant 0 : index
    %c0_24 = arith.constant 0 : index
    %40 = vector.load %arg12[%c0_23, %c0_24] : memref<128x128xf32, #tpu.memory_space<vmem>>, vector<128x128xf32>
    %cst_25 = arith.constant dense<0.000000e+00> : vector<128x128xf32>
    %41 = tpu.matmul %40, %39, %cst_25 {dimension_numbers = #tpu.dot_dimension_numbers<[1], [0], [0], [1], [0, 0, 1, 1], [], []>, precision = #tpu.contract_precision<fp32>} : vector<128x128xf32>, vector<128x128xf32>, vector<128x128xf32> -> vector<128x128xf32>
    %c0_26 = arith.constant 0 : index
    %c0_27 = arith.constant 0 : index
    %42 = vector.load %arg13[%c0_26, %c0_27] : memref<128x1xf32, #tpu.memory_space<vmem>>, vector<128x1xf32>
    %43 = vector.broadcast %42 : vector<128x1xf32> to vector<128x128xf32>
    %44 = arith.addf %41, %43 : vector<128x128xf32>
    %45 = math.tanh %44 : vector<128x128xf32>
    %c0_28 = arith.constant 0 : index
    %c0_29 = arith.constant 0 : index
    %46 = vector.load %arg14[%c0_28, %c0_29] : memref<128x1xf32, #tpu.memory_space<vmem>>, vector<128x1xf32>
    %47 = vector.broadcast %46 : vector<128x1xf32> to vector<128x128xf32>
    %48 = arith.mulf %45, %47 : vector<128x128xf32>
    %cst_30 = arith.constant dense<0.000000e+00> : vector<128xf32>
    %49 = vector.multi_reduction <add>, %48, %cst_30 [0] : vector<128x128xf32> to vector<128xf32>
    %50 = vector.shape_cast %49 : vector<128xf32> to vector<1x128xf32>
    %c0_31 = arith.constant 0 : index
    %c0_32 = arith.constant 0 : index
    %51 = vector.load %arg15[%c0_31, %c0_32] : memref<1x1xf32, #tpu.memory_space<vmem>>, vector<1x1xf32>
    %52 = vector.broadcast %51 : vector<1x1xf32> to vector<1x128xf32>
    %53 = arith.addf %50, %52 : vector<1x128xf32>
    %c0_33 = arith.constant 0 : index
    %c0_34 = arith.constant 0 : index
    %54 = vector.load %arg16[%c0_33, %c0_34] : memref<1x128xf32, #tpu.memory_space<vmem>>, vector<1x128xf32>
    tpu.vector_store %arg16[%c0_33, %c0_34], %53 {strides = array<i32>} : memref<1x128xf32, #tpu.memory_space<vmem>>, vector<1x128xf32>,
    return
  }
  func.func @transform_0(%arg0: i32) -> (i32, i32) {
    %c0_i32 = arith.constant 0 : i32
    %c0_i32_0 = arith.constant 0 : i32
    return %c0_i32, %arg0 : i32, i32
  }
  func.func @transform_1(%arg0: i32) -> (i32, i32) {
    %c0_i32 = arith.constant 0 : i32
    %c0_i32_0 = arith.constant 0 : i32
    return %c0_i32, %arg0 : i32, i32
  }
  func.func @transform_2(%arg0: i32) -> (i32, i32) {
    %c0_i32 = arith.constant 0 : i32
    %c0_i32_0 = arith.constant 0 : i32
    return %c0_i32, %arg0 : i32, i32
  }
  func.func @transform_3(%arg0: i32) -> (i32, i32) {
    %c0_i32 = arith.constant 0 : i32
    %c0_i32_0 = arith.constant 0 : i32
    %c0_i32_1 = arith.constant 0 : i32
    return %c0_i32, %c0_i32_0 : i32, i32
  }
  func.func @transform_4(%arg0: i32) -> (i32, i32) {
    %c0_i32 = arith.constant 0 : i32
    %c0_i32_0 = arith.constant 0 : i32
    %c0_i32_1 = arith.constant 0 : i32
    return %c0_i32, %c0_i32_0 : i32, i32
  }
  func.func @transform_5(%arg0: i32) -> (i32, i32) {
    %c0_i32 = arith.constant 0 : i32
    %c0_i32_0 = arith.constant 0 : i32
    %c0_i32_1 = arith.constant 0 : i32
    return %c0_i32, %c0_i32_0 : i32, i32
  }
  func.func @transform_6(%arg0: i32) -> (i32, i32) {
    %c0_i32 = arith.constant 0 : i32
    %c0_i32_0 = arith.constant 0 : i32
    %c0_i32_1 = arith.constant 0 : i32
    return %c0_i32, %c0_i32_0 : i32, i32
  }
  func.func @transform_7(%arg0: i32) -> (i32, i32) {
    %c0_i32 = arith.constant 0 : i32
    %c0_i32_0 = arith.constant 0 : i32
    %c0_i32_1 = arith.constant 0 : i32
    return %c0_i32, %c0_i32_0 : i32, i32
  }
  func.func @transform_8(%arg0: i32) -> (i32, i32) {
    %c0_i32 = arith.constant 0 : i32
    %c0_i32_0 = arith.constant 0 : i32
    %c0_i32_1 = arith.constant 0 : i32
    return %c0_i32, %c0_i32_0 : i32, i32
  }
  func.func @transform_9(%arg0: i32) -> (i32, i32) {
    %c0_i32 = arith.constant 0 : i32
    %c0_i32_0 = arith.constant 0 : i32
    %c0_i32_1 = arith.constant 0 : i32
    return %c0_i32, %c0_i32_0 : i32, i32
  }
  func.func @transform_10(%arg0: i32) -> (i32, i32) {
    %c0_i32 = arith.constant 0 : i32
    %c0_i32_0 = arith.constant 0 : i32
    %c0_i32_1 = arith.constant 0 : i32
    return %c0_i32, %c0_i32_0 : i32, i32
  }
  func.func @transform_11(%arg0: i32) -> (i32, i32) {
    %c0_i32 = arith.constant 0 : i32
    %c0_i32_0 = arith.constant 0 : i32
    %c0_i32_1 = arith.constant 0 : i32
    return %c0_i32, %c0_i32_0 : i32, i32
  }
  func.func @transform_12(%arg0: i32) -> (i32, i32) {
    %c0_i32 = arith.constant 0 : i32
    %c0_i32_0 = arith.constant 0 : i32
    %c0_i32_1 = arith.constant 0 : i32
    return %c0_i32, %c0_i32_0 : i32, i32
  }
  func.func @transform_13(%arg0: i32) -> (i32, i32) {
    %c0_i32 = arith.constant 0 : i32
    %c0_i32_0 = arith.constant 0 : i32
    %c0_i32_1 = arith.constant 0 : i32
    return %c0_i32, %c0_i32_0 : i32, i32
  }
  func.func @transform_14(%arg0: i32) -> (i32, i32) {
    %c0_i32 = arith.constant 0 : i32
    %c0_i32_0 = arith.constant 0 : i32
    %c0_i32_1 = arith.constant 0 : i32
    return %c0_i32, %c0_i32_0 : i32, i32
  }
  func.func @transform_15(%arg0: i32) -> (i32, i32) {
    %c0_i32 = arith.constant 0 : i32
    %c0_i32_0 = arith.constant 0 : i32
    return %c0_i32, %arg0 : i32, i32
  }
}

</mosaic_0001>

<bundles_post_ra>
// kernel: neural_network_forward.1
= control target key start
LH: loop header
LB: loop body
LE: loop exit
PB: predicated region body
PF: predicated region fallthrough
CT: control target
= control target key end

     0   :  { %s5218_s20 = smov 0   ;;  %s8047_s0 = inlined_call_operand.vmem [shape: f32[1,384], index: 0, kind: input, shape index: {}]   ;;  %s8048_s1 = inlined_call_operand.vmem [shape: f32[1,384], index: 1, kind: input, shape index: {}]   ;;  %s8049_s2 = inlined_call_operand.vmem [shape: f32[1,384], index: 2, kind: input, shape index: {}]   ;;  %s8050_s3 = inlined_call_operand.vmem [shape: f32[128,8], index: 3, kind: input, shape index: {}]   ;;  %s8051_s4 = inlined_call_operand.vmem [shape: f32[128,1], index: 4, kind: input, shape index: {}]   ;;  %s8052_s5 = inlined_call_operand.vmem [shape: f32[128,128], index: 5, kind: input, shape index: {}]   ;;  %s8053_s6 = inlined_call_operand.vmem [shape: f32[128,1], index: 6, kind: input, shape index: {}]   ;;  %s8054_s7 = inlined_call_operand.vmem [shape: f32[128,128], index: 7, kind: input, shape index: {}]   ;;  %s8055_s8 = inlined_call_operand.vmem [shape: f32[128,1], index: 8, kind: input, shape index: {}]   ;;  %s8056_s9 = inlined_call_operand.vmem [shape: f32[128,128], index: 9, kind: input, shape index: {}]   ;;  %s8057_s10 = inlined_call_operand.vmem [shape: f32[128,1], index: 10, kind: input, shape index: {}]   ;;  %s8058_s11 = inlined_call_operand.vmem [shape: f32[128,128], index: 11, kind: input, shape index: {}]   ;;  %s8059_s12 = inlined_call_operand.vmem [shape: f32[128,1], index: 12, kind: input, shape index: {}]   ;;  %s8060_s13 = inlined_call_operand.vmem [shape: f32[128,1], index: 13, kind: input, shape index: {}]   ;;  %s8061_s14 = inlined_call_operand.<no memory space> [shape: f32[1,1], index: 14, kind: input, shape index: {}]   ;;  %s8062_s15 = inlined_call_operand.vmem [shape: f32[1,384], index: 15, kind: output, shape index: {}]  }
   0x1   :  { %v20_v0 = vstv %s8061_s14 }
   0x2   :  { %21 = vst [vmem:[#allocation2] sm:$0x1] %v20_v0 }
   0x3 LB: > { %s4899_s21 = sadd.s32 4294967295, %s5130_s20   ;;  %p4903_p0 = scmp.ge.s32.totalorder %s5130_s20, 1  ;;  %s5130_s20 = sphi %s5218_s20, %s27_s20  }
   0x4   : > { %p453_p1 = scmp.lt.s32.totalorder %s5130_s20, 4 }
   0x6   : > { %p454_p2 = pnand %p4903_p0, %p453_p1 }
   0x8   : > { %457 = sbr.rel (%p454_p2) target bundleno = 2048 (0x800), region = 80 }
   0xd   : > { %v533_v1 = vld [vmem:[%s8050_s3 + $0x78] sm:$0xff]  ;;  %v532_v2 = vld [vmem:[%s8050_s3 + $0x70] sm:$0xff]  ;;  %v5132_v3 = vmov 2   ;;  %v5133_v4 = vmov 1   ;;  %p503_p3 = scmp.lt.s32.totalorder %s4899_s21, 2  ;;  %v5134_v5 = vmov 0  }
   0xe   : > { %4920 = vset.pattern.permute.xlu2 %v5132_v3  ;;  %4917 = vset.pattern.permute.xlu0 %v5133_v4  ;;  %v5252_v6 = vld [vmem:[%s8050_s3 + $0x58] sm:$0xff]  ;;  %v531_v7 = vld [vmem:[%s8050_s3 + $0x68] sm:$0xff]  ;;  %v530_v8 = vld [vmem:[%s8050_s3 + $0x60] sm:$0xff] }
   0xf   : > { %4918 = vset.pattern.permute.xlu1 %v5134_v5  ;;  %793 = vperm.xlu2 %4920, %v533_v1   ;;  %s8310_s21 = smov (!%p503_p3, %s4899_s21), 2  ;;  %v843_v9 = vld [vmem:[%s8051_s4 + $0x60] sm:$0xff]  ;;  %v846_v10 = vld [vmem:[%s8051_s4 + $0x78] sm:$0xff]  ;;  %v845_v12 = vld [vmem:[%s8051_s4 + $0x70] sm:$0xff] }
  0x10   : > { %694 = vperm.xlu0 %4917, %v533_v1   ;;  %606 = vperm.xlu1 %4918, %v532_v2   ;;  %s511_s27 = scalar_lea.vmem %s8049_s2, %s8310_s21  ;;  %s505_s30 = scalar_lea.vmem %s8047_s0, %s8310_s21  ;;  %v525_v11 = vld [vmem:[%s8050_s3 + $0x38] sm:$0xff]  ;;  %v841_v13 = vld [vmem:[%s8051_s4 + $0x50] sm:$0xff]  ;;  %v839_v15 = vld [vmem:[%s8051_s4 + $0x40] sm:$0xff] }
  0x11   : > { %s508_s18 = scalar_lea.vmem %s8048_s1, %s8310_s21  ;;  %v528_v14 = vld [vmem:[%s8050_s3 + $0x50] sm:$0xff]  ;;  %v844_v16 = vld [vmem:[%s8051_s4 + $0x68] sm:$0xff]  ;;  %v5302_v18 = vld [vmem:[%s8050_s3 + $0x18] sm:$0xff]  ;;  %s514_s23 = scalar_lea.vmem %s8062_s15, %s8310_s21 }
  0x12   : > { %v527_v17 = vld [vmem:[%s8050_s3 + $0x48] sm:$0xff]  ;;  %v837_v19 = vld [vmem:[%s8051_s4 + $0x30] sm:$0xff]  ;;  %v526_v20 = vld [vmem:[%s8050_s3 + $0x40] sm:$0xff] }
  0x13   : > { %v835_v21 = vld [vmem:[%s8051_s4 + $0x20] sm:$0xff]  ;;  %v842_v22 = vld [vmem:[%s8051_s4 + $0x58] sm:$0xff]  ;;  %v524_v25 = vld [vmem:[%s8050_s3 + $0x30] sm:$0xff] }
  0x14   : > { %v840_v27 = vld [vmem:[%s8051_s4 + $0x48] sm:$0xff]  ;;  %v5351_v32 = vld [vmem:[%s508_s18] ss:$0 sm:$0xff]  ;;  %v838_v51 = vld [vmem:[%s8051_s4 + $0x38] sm:$0xff] }
  0x15   : > { %v523_v28 = vld [vmem:[%s8050_s3 + $0x28] sm:$0xff]  ;;  %v5360_v35 = vld [vmem:[%s505_s30] ss:$0 sm:$0xff] }
  0x16   : > { %v522_v40 = vld [vmem:[%s8050_s3 + $0x20] sm:$0xff] }
  0x17   : > { %4921 = vset.pattern.permute.xlu2 %v5134_v5  ;;  %v5378_v43 = vld [vmem:[%s511_s27] ss:$0 sm:$0xff] }
  0x18   : > { %4919 = vset.pattern.permute.xlu1 %v5133_v4  ;;  %678 = vperm.xlu0 %4917, %v5252_v6   ;;  %v5398_v62 = vld [vmem:[%s8050_s3] sm:$0xff] }
  0x19   : > { %690 = vperm.xlu1 %4919, %v532_v2   ;;  %601 = vperm.xlu2 %4921, %v531_v7  }
  0x20   : > { %4925 = vset.pattern.permute.xlu0 %v5134_v5 }
  0x21   : > { %686 = vperm.xlu1 %4919, %v531_v7   ;;  %4922 = vset.pattern.permute.xlu2 %v5132_v3 }
  0x22   : > { %611 = vperm.xlu0 %4925, %v533_v1   ;;  %789 = vperm.xlu2 %4922, %v532_v2  }
  0x29   : > { %682 = vperm.xlu1 %4919, %v530_v8  }
  0x2a   : > { %596 = vperm.xlu0 %4925, %v530_v8   ;;  %785 = vperm.xlu2 %4922, %v531_v7  }
  0x31   : > { %4923 = vset.pattern.permute.xlu1 %v5134_v5 }
  0x32   : > { %909 = vperm.xlu0 %4925, %v843_v9   ;;  %4924 = vset.pattern.permute.xlu2 %v5134_v5  ;;  %v520_v9 = vld [vmem:[%s8050_s3 + $0x10] sm:$0xff] }
  0x33   : > { %924 = vperm.xlu1 %4923, %v846_v10   ;;  %591 = vperm.xlu2 %4924, %v5252_v6  }
  0x3a   : > { %571 = vperm.xlu0 %4925, %v525_v11  }
  0x3b   : > { %4926 = vset.pattern.permute.xlu1 %v5132_v3  ;;  %919 = vperm.xlu2 %4924, %v845_v12  }
  0x3c   : > { %781 = vperm.xlu1 %4926, %v530_v8  }
  0x42   : > { %899 = vperm.xlu0 %4925, %v841_v13  }
  0x43   : > { %4928 = vset.pattern.permute.xlu2 %v5133_v4 }
  0x44   : > { %4927 = vset.pattern.permute.xlu1 %v5134_v5  ;;  %674 = vperm.xlu2 %4928, %v528_v14  }
  0x45   : > { %586 = vperm.xlu1 %4927, %v528_v14  }
  0x4a   : > { %889 = vperm.xlu0 %4925, %v839_v15  }
  0x4c   : > { %4929 = vset.pattern.permute.xlu2 %v5134_v5 }
  0x4d   : > { %914 = vperm.xlu1 %4927, %v844_v16   ;;  %581 = vperm.xlu2 %4929, %v527_v17  }
  0x52   : > { %551 = vperm.xlu0 %4925, %v5302_v18  }
  0x55   : > { %4930 = vset.pattern.permute.xlu1 %v5133_v4  ;;  %4931 = vset.pattern.permute.xlu2 %v5132_v3 }
  0x56   : > { %670 = vperm.xlu1 %4930, %v527_v17   ;;  %773 = vperm.xlu2 %4931, %v528_v14  }
  0x5a   : > { %879 = vperm.xlu0 %4925, %v837_v19  }
  0x5e   : > { %4932 = vset.pattern.permute.xlu1 %v5134_v5  ;;  %4933 = vset.pattern.permute.xlu2 %v5133_v4 }
  0x5f   : > { %576 = vperm.xlu1 %4932, %v526_v20   ;;  %666 = vperm.xlu2 %4933, %v526_v20  }
  0x62   : > { %869 = vperm.xlu0 %4925, %v835_v21  }
  0x67   : > { %4934 = vset.pattern.permute.xlu1 %v5132_v3  ;;  %4935 = vset.pattern.permute.xlu2 %v5134_v5 }
  0x68   : > { %769 = vperm.xlu1 %4934, %v527_v17   ;;  %904 = vperm.xlu2 %4935, %v842_v22   ;;  %v836_v22 = vld [vmem:[%s8051_s4 + $0x28] sm:$0xff] }
  0x69   : > { %v5323_v23 = vpop.permute.xlu2 %793 }
  0x6a   : > { %4954 = vset.pattern.permute.xlu0 %v5132_v3  ;;  %v814_v58 = vmul.f32 %v5378_v43, %v5323_v23 }
  0x6b   : > { %777 = vperm.xlu0 %4954, %v5252_v6  }
  0x70   : > { %4936 = vset.pattern.permute.xlu1 %v5133_v4  ;;  %4937 = vset.pattern.permute.xlu2 %v5132_v3 }
  0x71   : > { %662 = vperm.xlu1 %4936, %v525_v11   ;;  %765 = vperm.xlu2 %4937, %v526_v20  }
  0x73   : > { %761 = vperm.xlu0 %4954, %v525_v11   ;;  %v5329_v24 = vpop.permute.xlu2 %601 }
  0x79   : > { %4938 = vset.pattern.permute.xlu1 %v5134_v5  ;;  %4939 = vset.pattern.permute.xlu2 %v5133_v4 }
  0x7a   : > { %566 = vperm.xlu1 %4938, %v524_v25   ;;  %658 = vperm.xlu2 %4939, %v524_v25  }
  0x7b   : > { %745 = vperm.xlu0 %4954, %v5302_v18  }
  0x7c   : > { %v790_v26 = vpop.permute.xlu2 %789 }
  0x7d   : > { %v813_v46 = vmul.f32 %v5378_v43, %v790_v26 }
  0x82   : > { %894 = vperm.xlu1 %4938, %v840_v27   ;;  %v607_v29 = vpop.permute.xlu1 %606  ;;  %4940 = vset.pattern.permute.xlu2 %v5134_v5  ;;  %v695_v30 = vpop.permute.xlu0 %694 }
  0x83   : > { %561 = vperm.xlu2 %4940, %v523_v28   ;;  %v631_v44 = vmul.f32 %v5360_v35, %v607_v29  ;;  %v715_v52 = vmul.f32 %v5351_v32, %v695_v30  ;;  %733 = vperm.xlu0 %4954, %v5398_v62  }
  0x84   : > { %v5344_v31 = vpop.permute.xlu2 %785 }
  0x8a   : > { %4941 = vset.pattern.permute.xlu1 %v5133_v4  ;;  %v679_v33 = vpop.permute.xlu0 %678 }
  0x8b   : > { %654 = vperm.xlu1 %4941, %v523_v28   ;;  %v691_v34 = vpop.permute.xlu1 %690  ;;  %4942 = vset.pattern.permute.xlu2 %v5132_v3  ;;  %v711_v36 = vmul.f32 %v5351_v32, %v679_v33  ;;  %v630_v33 = vmul.f32 %v5360_v35, %v5329_v24 }
  0x8c   : > { %757 = vperm.xlu2 %4942, %v524_v25   ;;  %v714_v41 = vmul.f32 %v5351_v32, %v691_v34  ;;  %4960 = vset.pattern.permute.xlu0 %v5134_v5 }
  0x8d   : > { %v592_v37 = vpop.permute.xlu2 %591 }
  0x8e   : > { %v628_v38 = vmul.f32 %v5360_v35, %v592_v37  ;;  %v730_v47 = vadd.f32 %v714_v41, %v631_v44  ;;  %v812_v37 = vmul.f32 %v5378_v43, %v5344_v31 }
  0x90   : > { %v5364_v39 = vadd.f32 %v711_v36, %v628_v38  ;;  %v829_v49 = vadd.f32 %v813_v46, %v730_v47 }
  0x93   : > { %4943 = vset.pattern.permute.xlu1 %v5134_v5  ;;  %v5371_v42 = vpop.permute.xlu1 %686 }
  0x94   : > { %v612_v45 = vpop.permute.xlu0 %611  ;;  %556 = vperm.xlu1 %4943, %v522_v40   ;;  %4944 = vset.pattern.permute.xlu2 %v5133_v4  ;;  %v713_v26 = vmul.f32 %v5351_v32, %v5371_v42 }
  0x95   : > { %650 = vperm.xlu2 %4944, %v522_v40   ;;  %v920_v48 = vpop.permute.xlu2 %919  ;;  %v632_v53 = vmul.f32 %v5360_v35, %v612_v45 }
  0x96   : > { %v941_v54 = vadd.f32 %v920_v48, %v829_v49  ;;  %v729_v38 = vadd.f32 %v713_v26, %v630_v33 }
  0x97   : > { %v731_v57 = vadd.f32 %v715_v52, %v632_v53 }
  0x98   : > { %4964 = vtanh.f32 %v941_v54  ;;  %v828_v41 = vadd.f32 %v812_v37, %v729_v38 }
  0x99   : > { %v830_v59 = vadd.f32 %v814_v58, %v731_v57 }
  0x9b   : > { %v683_v50 = vpop.permute.xlu1 %682 }
  0x9c   : > { %v597_v55 = vpop.permute.xlu0 %596  ;;  %4945 = vset.pattern.permute.xlu1 %v5132_v3  ;;  %v712_v6 = vmul.f32 %v5351_v32, %v683_v50 }
  0x9d   : > { %753 = vperm.xlu1 %4945, %v523_v28   ;;  %4946 = vset.pattern.permute.xlu2 %v5134_v5  ;;  %v629_v7 = vmul.f32 %v5360_v35, %v597_v55  ;;  %v519_v28 = vld [vmem:[%s8050_s3 + $0x8] sm:$0xff] }
  0x9e   : > { %884 = vperm.xlu2 %4946, %v838_v51   ;;  %v5390_v56 = vpop.permute.xlu2 %674  ;;  %v4965_v63 = vpop.eup %4964 }
  0x9f   : > { %v5405_v2 = vand.u32 4294901760, %v4965_v63  ;;  %v728_v15 = vadd.f32 %v712_v6, %v629_v7  ;;  %v710_v54 = vmul.f32 %v5351_v32, %v5390_v56 }
  0xa1   : > { %v5415_v10 = vsub.f32 %v4965_v63, %v5405_v2  ;;  %v834_v63 = vld [vmem:[%s8051_s4 + $0x18] sm:$0xff] }
  0xa4   : > { %v910_v60 = vpop.permute.xlu0 %909 }
  0xa5   : > { %v925_v61 = vpop.permute.xlu1 %924  ;;  %4947 = vset.pattern.permute.xlu1 %v5133_v4 }
  0xa6   : > { %v942_v0 = vadd.f32 %v925_v61, %v830_v59  ;;  %646 = vperm.xlu1 %4947, %v5302_v18   ;;  %4948 = vset.pattern.permute.xlu2 %v5132_v3  ;;  %v1240_v18 = vand.u32 4294901760, %v5415_v10 }
  0xa7   : > { %749 = vperm.xlu2 %4948, %v522_v40   ;;  %v5402_v1 = vpop.permute.xlu2 %581 }
  0xa8   : > { %4966 = vtanh.f32 %v942_v0  ;;  %v1241_v25 = vsub.f32 %v5415_v10, %v1240_v18 }
  0xaa   : > { %v1242_v34 = vand.u32 4294901760, %v1241_v25 }
  0xac   : > { %v5409_v8 = vpop.permute.xlu0 %571 }
  0xae   : > { %v4967_v11 = vpop.eup %4966  ;;  %v782_v12 = vpop.permute.xlu1 %781  ;;  %4949 = vset.pattern.permute.xlu1 %v5134_v5 }
  0xaf   : > { %v811_v13 = vmul.f32 %v5378_v43, %v782_v12  ;;  %546 = vperm.xlu1 %4949, %v520_v9   ;;  %4950 = vset.pattern.permute.xlu2 %v5133_v4  ;;  %v5420_v14 = vand.u32 4294901760, %v4967_v11 }
  0xb0   : > { %642 = vperm.xlu2 %4950, %v520_v9   ;;  %v5422_v16 = vpop.permute.xlu2 %773 }
  0xb1   : > { %1072 = vmatpush.msra.mxu0 %v5420_v14  ;;  %1523 = vmatpush.msra.mxu3 %v5420_v14  ;;  %v5428_v17 = vsub.f32 %v4967_v11, %v5420_v14  ;;  %v827_v19 = vadd.f32 %v811_v13, %v728_v15  ;;  %v832_v13 = vld [vmem:[%s8051_s4 + $0x8] sm:$0xff] }
  0xb3   : > { %1074 = vmatpush.msra.mxu0 %v5405_v2  ;;  %1395 = vmatpush.msra.mxu2 %v5428_v17  ;;  %v1234_v20 = vand.u32 4294901760, %v5428_v17  ;;  %v939_v27 = vadd.f32 %v910_v60, %v827_v19  ;;  %v809_v60 = vmul.f32 %v5378_v43, %v5422_v16 }
  0xb4   : > { %1525 = vmatpush.msra.mxu3 %v5405_v2  ;;  %v5435_v21 = vpop.permute.xlu0 %899 }
  0xb5   : > { %1398 = vmatpush.msra.mxu2 %v5415_v10  ;;  %v1235_v23 = vsub.f32 %v5428_v17, %v1234_v20  ;;  %4968 = vtanh.f32 %v939_v27  ;;  %v990_v27 = vld [vmem:[%s8053_s6 + $0x78] sm:$0xff]  ;;  %v3778_v10 = vld [vmem:[%s8059_s12 + $0x8] sm:$0xff] }
  0xb7   : > { %v587_v29 = vpop.permute.xlu1 %586  ;;  %874 = vperm.xlu1 %4949, %v836_v22   ;;  %v1236_v30 = vand.u32 4294901760, %v1235_v23 }
  0xb8   : > { %4951 = vset.pattern.permute.xlu2 %v5134_v5  ;;  %v627_v55 = vmul.f32 %v5360_v35, %v587_v29 }
  0xb9   : > { %1237 = vmatpush.msra.mxu1 %v1236_v30  ;;  %541 = vperm.xlu2 %4951, %v519_v28   ;;  %v5455_v36 = vpop.permute.xlu2 %666 }
  0xba   : > { %v726_v59 = vadd.f32 %v710_v54, %v627_v55 }
  0xbb   : > { %1243 = vmatpush.msra.mxu1 %v1242_v34  ;;  %v4969_v24 = vpop.eup %4968 }
  0xbc   : > { %v5459_v40 = vpop.permute.xlu0 %889  ;;  %v5463_v46 = vand.u32 4294901760, %v4969_v24  ;;  %v825_v6 = vadd.f32 %v809_v60, %v726_v59 }
  0xbe   : > { %v5468_v47 = vsub.f32 %v4969_v24, %v5463_v46  ;;  %v937_v11 = vadd.f32 %v5435_v21, %v825_v6  ;;  %v708_v21 = vmul.f32 %v5351_v32, %v5455_v36  ;;  %v988_v36 = vld [vmem:[%s8053_s6 + $0x68] sm:$0xff] }
  0xbf   : > { %v915_v42 = vpop.permute.xlu1 %914  ;;  %4952 = vset.pattern.permute.xlu1 %v5133_v4 }
  0xc0   : > { %v940_v44 = vadd.f32 %v915_v42, %v828_v41  ;;  %638 = vperm.xlu1 %4952, %v519_v28   ;;  %v1252_v53 = vand.u32 4294901760, %v5468_v47  ;;  %v987_v41 = vld [vmem:[%s8053_s6 + $0x60] sm:$0xff] }
  0xc1   : > { %4953 = vset.pattern.permute.xlu2 %v5132_v3 }
  0xc2   : > { %4970 = vtanh.f32 %v940_v44  ;;  %741 = vperm.xlu2 %4953, %v520_v9   ;;  %v905_v45 = vpop.permute.xlu2 %904  ;;  %v1253_v58 = vsub.f32 %v5468_v47, %v1252_v53 }
  0xc3   : > { %4972 = vtanh.f32 %v937_v11 }
  0xc4   : > { %v5465_v31 = vpop.permute.xlu0 %551  ;;  %v1254_v0 = vand.u32 4294901760, %v1253_v58  ;;  %v626_v58 = vmul.f32 %v5360_v35, %v5402_v1  ;;  %v986_v1 = vld [vmem:[%s8053_s6 + $0x58] sm:$0xff] }
  0xc8   : > { %v4971_v48 = vpop.eup %4970  ;;  %v5470_v49 = vpop.permute.xlu1 %670  ;;  %4955 = vset.pattern.permute.xlu1 %v5134_v5 }
  0xc9   : > { %536 = vperm.xlu1 %4955, %v5398_v62   ;;  %v5474_v50 = vand.u32 4294901760, %v4971_v48  ;;  %v4973_v25 = vpop.eup %4972 }
  0xca   : > { %4956 = vset.pattern.permute.xlu2 %v5133_v4  ;;  %v5531_v33 = vand.u32 4294901760, %v4973_v25 }
  0xcb   : > { %1076 = vmatpush.msra.mxu0 %v5474_v50  ;;  %1527 = vmatpush.msra.mxu3 %v5474_v50  ;;  %v5480_v51 = vsub.f32 %v4971_v48, %v5474_v50  ;;  %v766_v52 = vpop.permute.xlu2 %765 }
  0xcc   : > { %634 = vperm.xlu2 %4956, %v5398_v62   ;;  %v5487_v57 = vpop.permute.xlu0 %879  ;;  %v5537_v37 = vsub.f32 %v4973_v25, %v5531_v33 }
  0xcd   : > { %1078 = vmatpush.msra.mxu0 %v5463_v46  ;;  %1401 = vmatpush.msra.mxu2 %v5480_v51  ;;  %v1246_v4 = vand.u32 4294901760, %v5480_v51 }
  0xce   : > { %1529 = vmatpush.msra.mxu3 %v5463_v46 }
  0xcf   : > { %1404 = vmatpush.msra.mxu2 %v5468_v47  ;;  %v1247_v56 = vsub.f32 %v5480_v51, %v1246_v4  ;;  %v3779_v47 = vld [vmem:[%s8059_s12 + $0x10] sm:$0xff]  ;;  %v963_v51 = vld [vmem:[%s8052_s5 + $0x20] sm:$0xff] }
  0xd1   : > { %v577_v61 = vpop.permute.xlu1 %576  ;;  %4957 = vset.pattern.permute.xlu1 %v5132_v3  ;;  %v1248_v62 = vand.u32 4294901760, %v1247_v56  ;;  %v833_v3 = vld [vmem:[%s8051_s4 + $0x10] sm:$0xff]  ;;  %v624_v56 = vmul.f32 %v5360_v35, %v5409_v8 }
  0xd2   : > { %737 = vperm.xlu1 %4957, %v519_v28   ;;  %v625_v22 = vmul.f32 %v5360_v35, %v577_v61  ;;  %v807_v28 = vmul.f32 %v5378_v43, %v766_v52 }
  0xd3   : > { %1249 = vmatpush.msra.mxu1 %v1248_v62 }
  0xd4   : > { %4958 = vset.pattern.permute.xlu2 %v5134_v5  ;;  %v5507_v7 = vpop.permute.xlu0 %869  ;;  %v659_v9 = vpop.permute.xlu2 %658  ;;  %v724_v29 = vadd.f32 %v708_v21, %v625_v22 }
  0xd5   : > { %864 = vperm.xlu2 %4958, %v834_v63   ;;  %1255 = vmatpush.msra.mxu1 %v1254_v0  ;;  %v706_v24 = vmul.f32 %v5351_v32, %v659_v9 }
  0xd6   : > { %v823_v34 = vadd.f32 %v807_v28, %v724_v29  ;;  %v982_v29 = vld [vmem:[%s8053_s6 + $0x38] sm:$0xff] }
  0xd8   : > { %v935_v42 = vadd.f32 %v5459_v40, %v823_v34  ;;  %v1264_v40 = vand.u32 4294901760, %v5537_v37 }
  0xda   : > { %v770_v12 = vpop.permute.xlu1 %769  ;;  %4959 = vset.pattern.permute.xlu1 %v5134_v5  ;;  %v831_v5 = vld [vmem:[%s8051_s4] sm:$0xff]  ;;  %v1265_v9 = vsub.f32 %v5537_v37, %v1264_v40 }
  0xdb   : > { %859 = vperm.xlu1 %4959, %v833_v3   ;;  %v985_v3 = vld [vmem:[%s8053_s6 + $0x50] sm:$0xff] }
  0xdd   : > { %v778_v15 = vpop.permute.xlu0 %777  ;;  %854 = vperm.xlu2 %4958, %v832_v13   ;;  %v5517_v16 = vpop.permute.xlu2 %561 }
  0xde   : > { %v810_v19 = vmul.f32 %v5378_v43, %v778_v15 }
  0xe0   : > { %v826_v23 = vadd.f32 %v810_v19, %v5364_v39 }
  0xe2   : > { %v938_v26 = vadd.f32 %v905_v45, %v826_v23  ;;  %v709_v45 = vmul.f32 %v5351_v32, %v5470_v49  ;;  %v808_v49 = vmul.f32 %v5378_v43, %v770_v12 }
  0xe3   : > { %v663_v30 = vpop.permute.xlu1 %662  ;;  %849 = vperm.xlu1 %4959, %v831_v5   ;;  %v1266_v5 = vand.u32 4294901760, %v1265_v9 }
  0xe4   : > { %4974 = vtanh.f32 %v938_v26  ;;  %v707_v59 = vmul.f32 %v5351_v32, %v663_v30  ;;  %v725_v8 = vadd.f32 %v709_v45, %v626_v58 }
  0xe5   : > { %1068 = vperm.xlu2 %4958, %v990_v27   ;;  %4976 = vtanh.f32 %v935_v42  ;;  %v762_v63 = vpop.permute.xlu0 %761  ;;  %v983_v27 = vld [vmem:[%s8053_s6 + $0x40] sm:$0xff] }
  0xe6   : > { %v758_v39 = vpop.permute.xlu2 %757  ;;  %v824_v11 = vadd.f32 %v808_v49, %v725_v8  ;;  %v723_v12 = vadd.f32 %v707_v59, %v624_v56  ;;  %v806_v13 = vmul.f32 %v5378_v43, %v762_v63  ;;  %v979_v56 = vld [vmem:[%s8053_s6 + $0x20] sm:$0xff] }
  0xe7   : > { %v805_v52 = vmul.f32 %v5378_v43, %v758_v39 }
  0xe8   : > { %v822_v25 = vadd.f32 %v806_v13, %v723_v12  ;;  %v976_v13 = vld [vmem:[%s8053_s6 + $0x8] sm:$0xff] }
  0xea   : > { %v4975_v38 = vpop.eup %4974 }
  0xeb   : > { %1058 = vperm.xlu1 %4959, %v988_v36   ;;  %v5544_v44 = vand.u32 4294901760, %v4975_v38  ;;  %v4977_v22 = vpop.eup %4976 }
  0xec   : > { %v567_v48 = vpop.permute.xlu1 %566  ;;  %v5586_v28 = vand.u32 4294901760, %v4977_v22 }
  0xed   : > { %v623_v54 = vmul.f32 %v5360_v35, %v567_v48  ;;  %1053 = vperm.xlu2 %4958, %v987_v41   ;;  %1080 = vmatpush.msra.mxu0 %v5544_v44  ;;  %v5552_v55 = vsub.f32 %v4975_v38, %v5544_v44 }
  0xee   : > { %1531 = vmatpush.msra.mxu3 %v5544_v44  ;;  %v5592_v39 = vsub.f32 %v4977_v22, %v5586_v28 }
  0xef   : > { %v722_v60 = vadd.f32 %v706_v24, %v623_v54  ;;  %1082 = vmatpush.msra.mxu0 %v5531_v33  ;;  %1407 = vmatpush.msra.mxu2 %v5552_v55  ;;  %v5564_v61 = vpop.permute.xlu2 %650  ;;  %v1258_v62 = vand.u32 4294901760, %v5552_v55  ;;  %v980_v24 = vld [vmem:[%s8053_s6 + $0x28] sm:$0xff] }
  0xf0   : > { %1533 = vmatpush.msra.mxu3 %v5531_v33  ;;  %v1276_v48 = vand.u32 4294901760, %v5592_v39 }
  0xf1   : > { %v821_v0 = vadd.f32 %v805_v52, %v722_v60  ;;  %1410 = vmatpush.msra.mxu2 %v5537_v37  ;;  %v1259_v6 = vsub.f32 %v5552_v55, %v1258_v62 }
  0xf2   : > { %v1277_v8 = vsub.f32 %v5592_v39, %v1276_v48 }
  0xf3   : > { %v933_v15 = vadd.f32 %v5487_v57, %v821_v0  ;;  %1048 = vperm.xlu1 %4959, %v986_v1   ;;  %v1260_v19 = vand.u32 4294901760, %v1259_v6 }
  0xf4   : > { %v895_v21 = vpop.permute.xlu1 %894  ;;  %v1278_v9 = vand.u32 4294901760, %v1277_v8 }
  0xf5   : > { %4978 = vtanh.f32 %v933_v15  ;;  %v936_v23 = vadd.f32 %v895_v21, %v824_v11  ;;  %1043 = vperm.xlu2 %4958, %v985_v3   ;;  %1261 = vmatpush.msra.mxu1 %v1260_v19  ;;  %v977_v11 = vld [vmem:[%s8053_s6 + $0x10] sm:$0xff] }
  0xf7   : > { %4980 = vtanh.f32 %v936_v23  ;;  %1267 = vmatpush.msra.mxu1 %v1266_v5  ;;  %v1924_v23 = vld [vmem:[%s8055_s8 + $0x78] sm:$0xff]  ;;  %v1923_v5 = vld [vmem:[%s8055_s8 + $0x70] sm:$0xff] }
  0xf8   : > { %v885_v26 = vpop.permute.xlu2 %884 }
  0xf9   : > { %v934_v57 = vadd.f32 %v885_v26, %v822_v25  ;;  %v704_v26 = vmul.f32 %v5351_v32, %v5564_v61 }
  0xfb   : > { %v4979_v30 = vpop.eup %4978  ;;  %4982 = vtanh.f32 %v934_v57  ;;  %1033 = vperm.xlu1 %4959, %v983_v27  }
  0xfc   : > { %v5594_v34 = vand.u32 4294901760, %v4979_v30 }
  0xfd   : > { %v4981_v36 = vpop.eup %4980  ;;  %v5596_v38 = vpop.permute.xlu1 %654  ;;  %1028 = vperm.xlu2 %4958, %v982_v29  }
  0xfe   : > { %v5598_v41 = vand.u32 4294901760, %v4981_v36  ;;  %v5609_v45 = vsub.f32 %v4979_v30, %v5594_v34  ;;  %v705_v8 = vmul.f32 %v5351_v32, %v5596_v38  ;;  %v620_v38 = vmul.f32 %v5360_v35, %v5465_v31 }
 0x100   : > { %1084 = vmatpush.msra.mxu0 %v5598_v41  ;;  %1535 = vmatpush.msra.mxu3 %v5598_v41  ;;  %v5603_v42 = vsub.f32 %v4981_v36, %v5598_v41  ;;  %v1288_v63 = vand.u32 4294901760, %v5609_v45  ;;  %v1921_v36 = vld [vmem:[%s8055_s8 + $0x60] sm:$0xff] }
 0x101   : > { %v4983_v52 = vpop.eup %4982  ;;  %v750_v54 = vpop.permute.xlu2 %749 }
 0x102   : > { %1086 = vmatpush.msra.mxu0 %v5586_v28  ;;  %1413 = vmatpush.msra.mxu2 %v5603_v42  ;;  %v5617_v58 = vand.u32 4294901760, %v4983_v52  ;;  %v1270_v49 = vand.u32 4294901760, %v5603_v42  ;;  %v1289_v12 = vsub.f32 %v5609_v45, %v1288_v63  ;;  %v803_v29 = vmul.f32 %v5378_v43, %v750_v54  ;;  %v1918_v54 = vld [vmem:[%s8055_s8 + $0x48] sm:$0xff] }
 0x103   : > { %1537 = vmatpush.msra.mxu3 %v5586_v28  ;;  %1018 = vperm.xlu1 %4959, %v980_v24   ;;  %v1920_v24 = vld [vmem:[%s8055_s8 + $0x58] sm:$0xff] }
 0x104   : > { %1416 = vmatpush.msra.mxu2 %v5592_v39  ;;  %1088 = vmatpush.msra.mxu0 %v5617_v58  ;;  %v5624_v59 = vsub.f32 %v4983_v52, %v5617_v58  ;;  %v1271_v60 = vsub.f32 %v5603_v42, %v1270_v49  ;;  %v1290_v21 = vand.u32 4294901760, %v1289_v12  ;;  %v746_v12 = vpop.permute.xlu0 %745 }
 0x105   : > { %1013 = vperm.xlu2 %4958, %v979_v56   ;;  %1539 = vmatpush.msra.mxu3 %v5617_v58 }
 0x106   : > { %v557_v1 = vpop.permute.xlu1 %556  ;;  %1090 = vmatpush.msra.mxu0 %v5594_v34  ;;  %1419 = vmatpush.msra.mxu2 %v5624_v59  ;;  %v1272_v0 = vand.u32 4294901760, %v1271_v60  ;;  %v1282_v6 = vand.u32 4294901760, %v5624_v59 }
 0x107   : > { %1541 = vmatpush.msra.mxu3 %v5594_v34  ;;  %v621_v27 = vmul.f32 %v5360_v35, %v557_v1  ;;  %v1917_v1 = vld [vmem:[%s8055_s8 + $0x40] sm:$0xff] }
 0x108   : > { %1273 = vmatpush.msra.mxu1 %v1272_v0  ;;  %1422 = vmatpush.msra.mxu2 %v5609_v45  ;;  %v1283_v3 = vsub.f32 %v5624_v59, %v1282_v6  ;;  %v622_v0 = vmul.f32 %v5360_v35, %v5517_v16 }
 0x109   : > { %v720_v57 = vadd.f32 %v704_v26, %v621_v27  ;;  %v1914_v26 = vld [vmem:[%s8055_s8 + $0x28] sm:$0xff] }
 0x10a   : > { %1279 = vmatpush.msra.mxu1 %v1278_v9  ;;  %v1284_v15 = vand.u32 4294901760, %v1283_v3  ;;  %v5651_v19 = vpop.permute.xlu2 %642  ;;  %v721_v9 = vadd.f32 %v705_v8, %v622_v0 }
 0x10b   : > { %1003 = vperm.xlu1 %4959, %v977_v11   ;;  %v819_v52 = vadd.f32 %v803_v29, %v720_v57 }
 0x10c   : > { %1285 = vmatpush.msra.mxu1 %v1284_v15  ;;  %v1915_v15 = vld [vmem:[%s8055_s8 + $0x30] sm:$0xff] }
 0x10d   : > { %998 = vperm.xlu2 %4958, %v976_v13   ;;  %v931_v61 = vadd.f32 %v5507_v7, %v819_v52 }
 0x10e   : > { %1291 = vmatpush.msra.mxu1 %v1290_v21 }
 0x10f   : > { %v754_v22 = vpop.permute.xlu1 %753  ;;  %4984 = vtanh.f32 %v931_v61 }
 0x110   : > { %v804_v7 = vmul.f32 %v5378_v43, %v754_v22  ;;  %v802_v22 = vmul.f32 %v5378_v43, %v746_v12 }
 0x112   : > { %v820_v13 = vadd.f32 %v804_v7, %v721_v9 }
 0x113   : > { %2002 = vperm.xlu1 %4959, %v1924_v23   ;;  %v5659_v25 = vpop.permute.xlu2 %541 }
 0x115   : > { %1997 = vperm.xlu2 %4958, %v1923_v5   ;;  %v4985_v16 = vpop.eup %4984 }
 0x116   : > { %v5699_v27 = vand.u32 4294901760, %v4985_v16 }
 0x118   : > { %v647_v30 = vpop.permute.xlu1 %646 }
 0x119   : > { %v703_v11 = vmul.f32 %v5351_v32, %v647_v30  ;;  %v1912_v30 = vld [vmem:[%s8055_s8 + $0x18] sm:$0xff] }
 0x11b   : > { %1987 = vperm.xlu1 %4959, %v1921_v36   ;;  %v719_v23 = vadd.f32 %v703_v11, %v620_v38  ;;  %v989_v36 = vld [vmem:[%s8053_s6 + $0x70] sm:$0xff]  ;;  %v1909_v11 = vld [vmem:[%s8055_s8] sm:$0xff] }
 0x11c   : > { %v5671_v56 = vpop.permute.xlu2 %741  ;;  %1063 = vperm.xlu0 %4960, %v989_v36   ;;  %v2855_v36 = vld [vmem:[%s8057_s10 + $0x60] sm:$0xff] }
 0x11d   : > { %1982 = vperm.xlu2 %4958, %v1920_v24   ;;  %v818_v31 = vadd.f32 %v802_v22, %v719_v23  ;;  %v5708_v24 = vsub.f32 %v4985_v16, %v5699_v27 }
 0x11f   : > { %v1300_v0 = vand.u32 4294901760, %v5708_v24 }
 0x121   : > { %v5677_v60 = vpop.permute.xlu1 %546 }
 0x123   : > { %1972 = vperm.xlu1 %4959, %v1918_v54   ;;  %v1911_v54 = vld [vmem:[%s8055_s8 + $0x10] sm:$0xff] }
 0x125   : > { %1967 = vperm.xlu2 %4958, %v1917_v1  }
 0x126   : > { %v5688_v3 = vpop.permute.xlu2 %634 }
 0x129   : > { %v875_v21 = vpop.permute.xlu1 %874 }
 0x12a   : > { %v932_v5 = vadd.f32 %v875_v21, %v820_v13  ;;  %v1301_v13 = vsub.f32 %v5708_v24, %v1300_v0  ;;  %v2858_v21 = vld [vmem:[%s8057_s10 + $0x78] sm:$0xff] }
 0x12b   : > { %1957 = vperm.xlu1 %4959, %v1915_v15   ;;  %v984_v15 = vld [vmem:[%s8053_s6 + $0x48] sm:$0xff] }
 0x12c   : > { %4986 = vtanh.f32 %v932_v5  ;;  %1038 = vperm.xlu0 %4960, %v984_v15   ;;  %v1302_v5 = vand.u32 4294901760, %v1301_v13 }
 0x12d   : > { %1952 = vperm.xlu2 %4958, %v1914_v26  }
 0x12f   : > { %v865_v57 = vpop.permute.xlu2 %864 }
 0x130   : > { %v930_v29 = vadd.f32 %v865_v57, %v818_v31  ;;  %v2856_v57 = vld [vmem:[%s8057_s10 + $0x68] sm:$0xff] }
 0x132   : > { %v4987_v52 = vpop.eup %4986  ;;  %4988 = vtanh.f32 %v930_v29  ;;  %v639_v61 = vpop.permute.xlu1 %638 }
 0x133   : > { %1942 = vperm.xlu1 %4959, %v1912_v30   ;;  %v5713_v8 = vand.u32 4294901760, %v4987_v52  ;;  %v701_v29 = vmul.f32 %v5351_v32, %v639_v61  ;;  %v619_v61 = vmul.f32 %v5360_v35, %v5677_v60  ;;  %v2852_v60 = vld [vmem:[%s8057_s10 + $0x48] sm:$0xff] }
 0x135   : > { %1937 = vperm.xlu2 %4958, %v1911_v54   ;;  %1092 = vmatpush.msra.mxu0 %v5713_v8  ;;  %v5717_v1 = vsub.f32 %v4987_v52, %v5713_v8  ;;  %v618_v52 = vmul.f32 %v5360_v35, %v5659_v25  ;;  %v981_v54 = vld [vmem:[%s8053_s6 + $0x30] sm:$0xff]  ;;  %v801_v25 = vmul.f32 %v5378_v43, %v5671_v56  ;;  %v978_v56 = vld [vmem:[%s8053_s6 + $0x18] sm:$0xff] }
 0x136   : > { %1543 = vmatpush.msra.mxu3 %v5713_v8  ;;  %1023 = vperm.xlu0 %4960, %v981_v54  }
 0x137   : > { %1094 = vmatpush.msra.mxu0 %v5699_v27  ;;  %1425 = vmatpush.msra.mxu2 %v5717_v1  ;;  %v1294_v7 = vand.u32 4294901760, %v5717_v1 }
 0x138   : > { %v4989_v9 = vpop.eup %4988  ;;  %1545 = vmatpush.msra.mxu3 %v5699_v27 }
 0x139   : > { %1428 = vmatpush.msra.mxu2 %v5708_v24  ;;  %v5729_v12 = vand.u32 4294901760, %v4989_v9  ;;  %v1295_v38 = vsub.f32 %v5717_v1, %v1294_v7  ;;  %v3790_v1 = vld [vmem:[%s8059_s12 + $0x68] sm:$0xff] }
 0x13b   : > { %1927 = vperm.xlu1 %4959, %v1909_v11   ;;  %v537_v16 = vpop.permute.xlu1 %536  ;;  %1096 = vmatpush.msra.mxu0 %v5729_v12  ;;  %v1296_v23 = vand.u32 4294901760, %v1295_v38  ;;  %v5745_v22 = vsub.f32 %v4989_v9, %v5729_v12  ;;  %v702_v9 = vmul.f32 %v5351_v32, %v5651_v19  ;;  %v717_v38 = vadd.f32 %v701_v29, %v618_v52 }
 0x13c   : > { %1547 = vmatpush.msra.mxu3 %v5729_v12  ;;  %v617_v29 = vmul.f32 %v5360_v35, %v537_v16  ;;  %v960_v16 = vld [vmem:[%s8052_s5 + $0x8] sm:$0xff] }
 0x13d   : > { %2936 = vperm.xlu2 %4958, %v2858_v21   ;;  %1297 = vmatpush.msra.mxu1 %v1296_v23  ;;  %v1306_v26 = vand.u32 4294901760, %v5745_v22  ;;  %v718_v21 = vadd.f32 %v702_v9, %v619_v61  ;;  %v855_v23 = vpop.permute.xlu2 %854  ;;  %v734_v9 = vpop.permute.xlu0 %733 }
 0x13e   : > { %1431 = vmatpush.msra.mxu2 %v5745_v22  ;;  %1008 = vperm.xlu0 %4960, %v978_v56   ;;  %v2847_v56 = vld [vmem:[%s8057_s10 + $0x20] sm:$0xff] }
 0x13f   : > { %1303 = vmatpush.msra.mxu1 %v1302_v5  ;;  %v1307_v31 = vsub.f32 %v5745_v22, %v1306_v26  ;;  %v2853_v5 = vld [vmem:[%s8057_s10 + $0x50] sm:$0xff]  ;;  %v967_v22 = vld [vmem:[%s8052_s5 + $0x40] sm:$0xff] }
 0x141   : > { %v1308_v30 = vand.u32 4294901760, %v1307_v31  ;;  %v959_v31 = vld [vmem:[%s8052_s5] sm:$0xff] }
 0x142   : > { %v5787_v54 = vand.u32 4294901760, %v959_v31 }
 0x143   : > { %2926 = vperm.xlu1 %4959, %v2856_v57   ;;  %1309 = vmatpush.msra.mxu1 %v1308_v30  ;;  %v700_v57 = vmul.f32 %v5351_v32, %v5688_v3  ;;  %v817_v30 = vadd.f32 %v801_v25, %v718_v21  ;;  %v2849_v32 = vld [vmem:[%s8057_s10 + $0x30] sm:$0xff] }
 0x144   : > { %v738_v11 = vpop.permute.xlu1 %737  ;;  %v1104_v3 = vsub.f32 %v959_v31, %v5787_v54 }
 0x145   : > { %v800_v13 = vmul.f32 %v5378_v43, %v738_v11  ;;  %2921 = vperm.xlu2 %4958, %v2855_v36   ;;  %v716_v61 = vadd.f32 %v700_v57, %v617_v29  ;;  %v2850_v11 = vld [vmem:[%s8057_s10 + $0x38] sm:$0xff] }
 0x146   : > { %v2846_v29 = vld [vmem:[%s8057_s10 + $0x18] sm:$0xff] }
 0x147   : > { %v816_v15 = vadd.f32 %v800_v13, %v717_v38  ;;  %v799_v13 = vmul.f32 %v5378_v43, %v734_v9 }
 0x149   : > { %v928_v19 = vadd.f32 %v855_v23, %v816_v15  ;;  %v975_v15 = vld [vmem:[%s8053_s6] sm:$0xff]  ;;  %v815_v25 = vadd.f32 %v799_v13, %v716_v61  ;;  %v961_v61 = vld [vmem:[%s8052_s5 + $0x10] sm:$0xff] }
 0x14a   : > { %993 = vperm.xlu0 %4960, %v975_v15   ;;  %v5842_v15 = vand.u32 4294901760, %v961_v61 }
 0x14b   : > { %4990 = vtanh.f32 %v928_v19  ;;  %2911 = vperm.xlu1 %4959, %v2853_v5   ;;  %v1105_v19 = vand.u32 4294901760, %v1104_v3 }
 0x14d   : > { %2906 = vperm.xlu2 %4958, %v2852_v60   ;;  %v860_v36 = vpop.permute.xlu1 %859  ;;  %v5808_v60 = vand.u32 4294901760, %v960_v16 }
 0x14e   : > { %v929_v52 = vadd.f32 %v860_v36, %v817_v30  ;;  %v1106_v30 = vsub.f32 %v1104_v3, %v1105_v19 }
 0x150   : > { %4992 = vtanh.f32 %v929_v52  ;;  %v5825_v52 = vsub.f32 %v960_v16, %v5808_v60  ;;  %v1107_v13 = vand.u32 4294901760, %v1106_v30 }
 0x151   : > { %v4991_v38 = vpop.eup %4990 }
 0x152   : > { %v5796_v35 = vand.u32 4294901760, %v4991_v38  ;;  %v1113_v16 = vand.u32 4294901760, %v5825_v52 }
 0x153   : > { %2896 = vperm.xlu1 %4959, %v2850_v11  }
 0x154   : > { %v5806_v5 = vsub.f32 %v4991_v38, %v5796_v35  ;;  %v1114_v30 = vsub.f32 %v5825_v52, %v1113_v16 }
 0x155   : > { %2891 = vperm.xlu2 %4958, %v2849_v32   ;;  %v850_v43 = vpop.permute.xlu1 %849 }
 0x156   : > { %v4993_v21 = vpop.eup %4992  ;;  %v927_v23 = vadd.f32 %v850_v43, %v815_v25  ;;  %v1318_v36 = vand.u32 4294901760, %v5806_v5  ;;  %v1115_v17 = vand.u32 4294901760, %v1114_v30  ;;  %v969_v30 = vld [vmem:[%s8052_s5 + $0x50] sm:$0xff] }
 0x157   : > { %v5810_v31 = vand.u32 4294901760, %v4993_v21 }
 0x158   : > { %4994 = vtanh.f32 %v927_v23  ;;  %v1319_v32 = vsub.f32 %v5806_v5, %v1318_v36 }
 0x159   : > { %1098 = vmatpush.msra.mxu0 %v5810_v31  ;;  %1549 = vmatpush.msra.mxu3 %v5810_v31  ;;  %v5818_v57 = vsub.f32 %v4993_v21, %v5810_v31  ;;  %v2844_v21 = vld [vmem:[%s8057_s10 + $0x8] sm:$0xff] }
 0x15b   : > { %2881 = vperm.xlu1 %4959, %v2847_v56   ;;  %1100 = vmatpush.msra.mxu0 %v5796_v35  ;;  %v1312_v9 = vand.u32 4294901760, %v5818_v57  ;;  %v1320_v56 = vand.u32 4294901760, %v1319_v32 }
 0x15c   : > { %1434 = vmatpush.msra.mxu2 %v5818_v57  ;;  %1551 = vmatpush.msra.mxu3 %v5796_v35 }
 0x15d   : > { %2876 = vperm.xlu2 %4958, %v2846_v29   ;;  %v1313_v11 = vsub.f32 %v5818_v57, %v1312_v9  ;;  %v2843_v29 = vld [vmem:[%s8057_s10] sm:$0xff] }
 0x15e   : > { %v4995_v38 = vpop.eup %4994  ;;  %1437 = vmatpush.msra.mxu2 %v5806_v5  ;;  %v5981_v5 = vand.u32 4294901760, %v967_v22 }
 0x15f   : > { %v5844_v25 = vand.u32 4294901760, %v4995_v38  ;;  %v1314_v43 = vand.u32 4294901760, %v1313_v11  ;;  %v1120_v11 = vsub.f32 %v961_v61, %v5842_v15 }
 0x160   : > { %v1168_v57 = vsub.f32 %v967_v22, %v5981_v5  ;;  %v1910_v22 = vld [vmem:[%s8055_s8 + $0x8] sm:$0xff] }
 0x161   : > { %1102 = vmatpush.msra.mxu0 %v5844_v25  ;;  %1315 = vmatpush.msra.mxu1 %v1314_v43  ;;  %v5851_v23 = vsub.f32 %v4995_v38, %v5844_v25  ;;  %v962_v38 = vld [vmem:[%s8052_s5 + $0x18] sm:$0xff] }
 0x162   : > { %1553 = vmatpush.msra.mxu3 %v5844_v25  ;;  %1108 = vmatmul.f32.vlgmr.msra.gmra.mxu0 %v1107_v13  ;;  %v5871_v13 = vand.u32 4294901760, %v962_v38 }
 0x163   : > { %1654 = vmatpush.msrb.mxu0 %v1234_v20  ;;  %2866 = vperm.xlu1 %4959, %v2844_v21   ;;  %v1324_v43 = vand.u32 4294901760, %v5851_v23  ;;  %v1121_v20 = vand.u32 4294901760, %v1120_v11  ;;  %v4698_v21 = vld [vmem:[%s8060_s13 + $0x18] sm:$0xff] }
 0x164   : > { %1321 = vmatpush.msra.mxu1 %v1320_v56  ;;  %1440 = vmatpush.msra.mxu2 %v5851_v23 }
 0x165   : > { %1658 = vmatpush.msrb.mxu0 %v1240_v18  ;;  %2861 = vperm.xlu2 %4958, %v2843_v29   ;;  %v1325_v61 = vsub.f32 %v5851_v23, %v1324_v43  ;;  %v1122_v18 = vsub.f32 %v1120_v11, %v1121_v20  ;;  %v4699_v29 = vld [vmem:[%s8060_s13 + $0x20] sm:$0xff] }
 0x166   : > { %1443 = vmatmul.f32.vlgmr.msra.gmra.mxu2 %v1104_v3  ;;  %1557 = vmatmul.f32.vlgmr.msra.gmra.mxu3 %v1105_v19  ;;  %v1128_v3 = vsub.f32 %v962_v38, %v5871_v13  ;;  %v4695_v19 = vld [vmem:[%s8060_s13] sm:$0xff]  ;;  %v6007_v38 = vand.u32 4294901760, %v969_v30 }
 0x167   : > { %1662 = vmatpush.msrb.mxu0 %v1246_v4  ;;  %v1326_v32 = vand.u32 4294901760, %v1325_v61  ;;  %v1922_v61 = vld [vmem:[%s8055_s8 + $0x68] sm:$0xff] }
 0x168   : > { %v1129_v4 = vand.u32 4294901760, %v1128_v3  ;;  %1992 = vperm.xlu0 %4960, %v1922_v61   ;;  %v2848_v61 = vld [vmem:[%s8057_s10 + $0x28] sm:$0xff] }
 0x169   : > { %1666 = vmatpush.msrb.mxu0 %v1252_v53  ;;  %1327 = vmatpush.msra.mxu1 %v1326_v32  ;;  %v1123_v53 = vand.u32 4294901760, %v1122_v18  ;;  %v1184_v32 = vsub.f32 %v969_v30, %v6007_v38  ;;  %v970_v18 = vld [vmem:[%s8052_s5 + $0x58] sm:$0xff] }
 0x16a   : > { %1116 = vmatmul.f32.gmra.mxu0 %v1115_v17  ;;  %1329 = vmatmul.f32.vlgmr.msra.gmra.mxu1 %v5787_v54  ;;  %v1130_v37 = vsub.f32 %v1128_v3, %v1129_v4  ;;  %v4701_v17 = vld [vmem:[%s8060_s13 + $0x30] sm:$0xff] }
 0x16b   : > { %1670 = vmatpush.msrb.mxu0 %v1258_v62  ;;  %1781 = vmatpush.msrb.mxu1 %v5420_v14  ;;  %v5895_v14 = vand.u32 4294901760, %v963_v51 }
 0x16c   : > { %3800 = vperm.xlu1 %4959, %v3778_v10   ;;  %v4702_v10 = vld [vmem:[%s8060_s13 + $0x38] sm:$0xff] }
 0x16d   : > { %1674 = vmatpush.msrb.mxu0 %v1264_v40  ;;  %1783 = vmatpush.msrb.mxu1 %v5405_v2  ;;  %v3781_v2 = vld [vmem:[%s8059_s12 + $0x20] sm:$0xff]  ;;  %v1136_v55 = vsub.f32 %v963_v51, %v5895_v14  ;;  %v1131_v40 = vand.u32 4294901760, %v1130_v37  ;;  %v6023_v51 = vand.u32 4294901760, %v970_v18 }
 0x16e   : > { %3805 = vperm.xlu2 %4958, %v3779_v47   ;;  %1448 = vmatmul.f32.gmra.mxu2 %v5825_v52  ;;  %v968_v52 = vld [vmem:[%s8052_s5 + $0x48] sm:$0xff]  ;;  %v1185_v47 = vand.u32 4294901760, %v1184_v32 }
 0x16f   : > { %1678 = vmatpush.msrb.mxu0 %v1270_v49  ;;  %1785 = vmatpush.msrb.mxu1 %v5474_v50  ;;  %v3782_v50 = vld [vmem:[%s8059_s12 + $0x28] sm:$0xff]  ;;  %v1137_v62 = vand.u32 4294901760, %v1136_v55  ;;  %v1192_v37 = vsub.f32 %v970_v18, %v6023_v51 }
 0x170   : > { %1563 = vmatmul.f32.gmra.mxu3 %v1113_v16  ;;  %v1169_v16 = vand.u32 4294901760, %v1168_v57 }
 0x171   : > { %1682 = vmatpush.msrb.mxu0 %v1276_v48  ;;  %1787 = vmatpush.msrb.mxu1 %v5463_v46  ;;  %v964_v46 = vld [vmem:[%s8052_s5 + $0x28] sm:$0xff] }
 0x172   : > { %1124 = vmatmul.f32.gmra.mxu0 %v1123_v53  ;;  %1333 = vmatmul.f32.gmra.mxu1 %v5808_v60  ;;  %v5920_v39 = vand.u32 4294901760, %v964_v46  ;;  %v1170_v23 = vsub.f32 %v1168_v57, %v1169_v16  ;;  %v1919_v53 = vld [vmem:[%s8055_s8 + $0x50] sm:$0xff] }
 0x173   : > { %1686 = vmatpush.msrb.mxu0 %v1282_v6  ;;  %1789 = vmatpush.msrb.mxu1 %v5544_v44  ;;  %v1138_v44 = vsub.f32 %v1136_v55, %v1137_v62  ;;  %v966_v6 = vld [vmem:[%s8052_s5 + $0x38] sm:$0xff] }
 0x174   : > { %3815 = vperm.xlu1 %4959, %v3781_v2   ;;  %v1144_v42 = vsub.f32 %v964_v46, %v5920_v39  ;;  %1977 = vperm.xlu0 %4960, %v1919_v53   ;;  %v1186_v2 = vsub.f32 %v1184_v32, %v1185_v47 }
 0x175   : > { %1690 = vmatpush.msrb.mxu0 %v1288_v63  ;;  %1791 = vmatpush.msrb.mxu1 %v5531_v33  ;;  %v3784_v33 = vld [vmem:[%s8059_s12 + $0x38] sm:$0xff]  ;;  %v1139_v45 = vand.u32 4294901760, %v1138_v44  ;;  %v4707_v44 = vld [vmem:[%s8060_s13 + $0x60] sm:$0xff] }
 0x176   : > { %3820 = vperm.xlu2 %4958, %v3782_v50   ;;  %1453 = vmatmul.f32.gmra.mxu2 %v1120_v11  ;;  %v1145_v48 = vand.u32 4294901760, %v1144_v42  ;;  %v3788_v63 = vld [vmem:[%s8059_s12 + $0x58] sm:$0xff]  ;;  %v1171_v11 = vand.u32 4294901760, %v1170_v23  ;;  %v971_v50 = vld [vmem:[%s8052_s5 + $0x60] sm:$0xff]  ;;  %v1187_v46 = vand.u32 4294901760, %v1186_v2 }
 0x177   : > { %1694 = vmatpush.msrb.mxu0 %v1294_v7  ;;  %1793 = vmatpush.msrb.mxu1 %v5598_v41  ;;  %v3785_v41 = vld [vmem:[%s8059_s12 + $0x40] sm:$0xff] }
 0x178   : > { %1569 = vmatmul.f32.gmra.mxu3 %v1121_v20 }
 0x179   : > { %1698 = vmatpush.msrb.mxu0 %v1300_v0  ;;  %1795 = vmatpush.msrb.mxu1 %v5586_v28  ;;  %v965_v28 = vld [vmem:[%s8052_s5 + $0x30] sm:$0xff] }
 0x17a   : > { %1132 = vmatmul.f32.gmra.mxu0 %v1131_v40  ;;  %1337 = vmatmul.f32.gmra.mxu1 %v5842_v15  ;;  %v5945_v49 = vand.u32 4294901760, %v965_v28  ;;  %v1193_v40 = vand.u32 4294901760, %v1192_v37 }
 0x17b   : > { %1702 = vmatpush.msrb.mxu0 %v1306_v26  ;;  %1797 = vmatpush.msrb.mxu1 %v5617_v58  ;;  %v1146_v58 = vsub.f32 %v1144_v42, %v1145_v48 }
 0x17c   : > { %3830 = vperm.xlu1 %4959, %v3784_v33   ;;  %v1152_v59 = vsub.f32 %v965_v28, %v5945_v49  ;;  %v1916_v33 = vld [vmem:[%s8055_s8 + $0x38] sm:$0xff]  ;;  %v4708_v28 = vld [vmem:[%s8060_s13 + $0x68] sm:$0xff] }
 0x17d   : > { %1706 = vmatpush.msrb.mxu0 %v1312_v9  ;;  %1799 = vmatpush.msrb.mxu1 %v5594_v34  ;;  %v3787_v34 = vld [vmem:[%s8059_s12 + $0x50] sm:$0xff] }
 0x17e   : > { %3835 = vperm.xlu2 %4958, %v3785_v41   ;;  %1458 = vmatmul.f32.gmra.mxu2 %v1128_v3  ;;  %v1153_v24 = vand.u32 4294901760, %v1152_v59 }
 0x17f   : > { %1710 = vmatpush.msrb.mxu0 %v1318_v36  ;;  %1801 = vmatpush.msrb.mxu1 %v5713_v8  ;;  %v5966_v8 = vand.u32 4294901760, %v966_v6  ;;  %v4696_v36 = vld [vmem:[%s8060_s13 + $0x8] sm:$0xff] }
 0x180   : > { %1575 = vmatmul.f32.gmra.mxu3 %v1129_v4  ;;  %v1154_v0 = vsub.f32 %v1152_v59, %v1153_v24  ;;  %v4704_v4 = vld [vmem:[%s8060_s13 + $0x48] sm:$0xff]  ;;  %1962 = vperm.xlu0 %4960, %v1916_v33  }
 0x181   : > { %1714 = vmatpush.msrb.mxu0 %v1324_v43  ;;  %1803 = vmatpush.msrb.mxu1 %v5699_v27  ;;  %v1147_v27 = vand.u32 4294901760, %v1146_v58  ;;  %v1160_v7 = vsub.f32 %v966_v6, %v5966_v8 }
 0x182   : > { %1140 = vmatmul.f32.gmra.mxu0 %v1139_v45  ;;  %1341 = vmatmul.f32.gmra.mxu1 %v5871_v13  ;;  %v1155_v26 = vand.u32 4294901760, %v1154_v0  ;;  %v972_v45 = vld [vmem:[%s8052_s5 + $0x68] sm:$0xff] }
 0x183   : > { %1805 = vmatpush.msrb.mxu1 %v5729_v12  ;;  %v3791_v12 = vld [vmem:[%s8059_s12 + $0x70] sm:$0xff]  ;;  %v6055_v58 = vand.u32 4294901760, %v972_v45 }
 0x184   : > { %3845 = vperm.xlu1 %4959, %v3787_v34  }
 0x185   : > { %1807 = vmatpush.msrb.mxu1 %v5810_v31 }
 0x186   : > { %3850 = vperm.xlu2 %4958, %v3788_v63   ;;  %1463 = vmatmul.f32.gmra.mxu2 %v1136_v55  ;;  %v4705_v55 = vld [vmem:[%s8060_s13 + $0x50] sm:$0xff]  ;;  %v4710_v63 = vld [vmem:[%s8060_s13 + $0x78] sm:$0xff] }
 0x187   : > { %1809 = vmatpush.msrb.mxu1 %v5796_v35  ;;  %v1161_v35 = vand.u32 4294901760, %v1160_v7 }
 0x188   : > { %1581 = vmatmul.f32.gmra.mxu3 %v1137_v62  ;;  %v6039_v62 = vand.u32 4294901760, %v971_v50 }
 0x189   : > { %1811 = vmatpush.msrb.mxu1 %v5844_v25  ;;  %v1162_v31 = vsub.f32 %v1160_v7, %v1161_v35  ;;  %v5994_v25 = vand.u32 4294901760, %v968_v52 }
 0x18a   : > { %1148 = vmatmul.f32.gmra.mxu0 %v1147_v27  ;;  %1345 = vmatmul.f32.gmra.mxu1 %v5895_v14  ;;  %v1200_v41 = vsub.f32 %v971_v50, %v6039_v62  ;;  %v1208_v27 = vsub.f32 %v972_v45, %v6055_v58 }
 0x18b   : > { %v1163_v9 = vand.u32 4294901760, %v1162_v31  ;;  %v1176_v56 = vsub.f32 %v968_v52, %v5994_v25  ;;  %v2857_v52 = vld [vmem:[%s8057_s10 + $0x70] sm:$0xff] }
 0x18c   : > { %3860 = vperm.xlu1 %4959, %v3790_v1   ;;  %v1201_v34 = vand.u32 4294901760, %v1200_v41  ;;  %v973_v1 = vld [vmem:[%s8052_s5 + $0x70] sm:$0xff] }
 0x18d   : > { %v1177_v43 = vand.u32 4294901760, %v1176_v56 }
 0x18e   : > { %3865 = vperm.xlu2 %4958, %v3791_v12   ;;  %1468 = vmatmul.f32.gmra.mxu2 %v1144_v42  ;;  %v1194_v42 = vsub.f32 %v1192_v37, %v1193_v40  ;;  %v1202_v6 = vsub.f32 %v1200_v41, %v1201_v34  ;;  %v6068_v12 = vand.u32 4294901760, %v973_v1 }
 0x18f   : > { %v1178_v20 = vsub.f32 %v1176_v56, %v1177_v43 }
 0x190   : > { %1587 = vmatmul.f32.gmra.mxu3 %v1145_v48  ;;  %v1195_v48 = vand.u32 4294901760, %v1194_v42  ;;  %v1203_v0 = vand.u32 4294901760, %v1202_v6 }
 0x191   : > { %v1179_v3 = vand.u32 4294901760, %v1178_v20 }
 0x192   : > { %1156 = vmatmul.f32.gmra.mxu0 %v1155_v26  ;;  %1349 = vmatmul.f32.gmra.mxu1 %v5920_v39 }
 0x194   : > { %4713 = vperm.xlu1 %4959, %v4695_v19   ;;  %v974_v19 = vld [vmem:[%s8052_s5 + $0x78] sm:$0xff] }
 0x196   : > { %4718 = vperm.xlu2 %4958, %v4696_v36   ;;  %1473 = vmatmul.f32.gmra.mxu2 %v1152_v59  ;;  %v1913_v59 = vld [vmem:[%s8055_s8 + $0x20] sm:$0xff]  ;;  %v6078_v36 = vand.u32 4294901760, %v974_v19 }
 0x197   : > { %1947 = vperm.xlu0 %4960, %v1913_v59  }
 0x198   : > { %1593 = vmatmul.f32.gmra.mxu3 %v1153_v24  ;;  %v4828_v24 = vld [vmem:[#allocation2] sm:$0x1] }
 0x19a   : > { %1164 = vmatmul.f32.gmra.mxu0 %v1163_v9  ;;  %1353 = vmatmul.f32.gmra.mxu1 %v5945_v49 }
 0x19c   : > { %4728 = vperm.xlu1 %4959, %v4698_v21  }
 0x19e   : > { %4733 = vperm.xlu2 %4958, %v4699_v29   ;;  %1478 = vmatmul.f32.gmra.mxu2 %v1160_v7  ;;  %v1209_v7 = vand.u32 4294901760, %v1208_v27 }
 0x19f   : > { %1932 = vperm.xlu0 %4960, %v1910_v22  }
 0x1a0   : > { %1599 = vmatmul.f32.gmra.mxu3 %v1161_v35  ;;  %v1210_v26 = vsub.f32 %v1208_v27, %v1209_v7  ;;  %v1216_v35 = vsub.f32 %v973_v1, %v6068_v12 }
 0x1a2   : > { %1172 = vmatmul.f32.gmra.mxu0 %v1171_v11  ;;  %1357 = vmatmul.f32.gmra.mxu1 %v5966_v8  ;;  %v1211_v31 = vand.u32 4294901760, %v1210_v26  ;;  %v2851_v11 = vld [vmem:[%s8057_s10 + $0x40] sm:$0xff] }
 0x1a4   : > { %4743 = vperm.xlu1 %4959, %v4701_v17  }
 0x1a6   : > { %4748 = vperm.xlu2 %4958, %v4702_v10   ;;  %1483 = vmatmul.f32.gmra.mxu2 %v1168_v57  ;;  %v1217_v57 = vand.u32 4294901760, %v1216_v35 }
 0x1a7   : > { %2931 = vperm.xlu0 %4960, %v2857_v52  }
 0x1a8   : > { %1605 = vmatmul.f32.gmra.mxu3 %v1169_v16  ;;  %v1218_v9 = vsub.f32 %v1216_v35, %v1217_v57  ;;  %v1224_v16 = vsub.f32 %v974_v19, %v6078_v36 }
 0x1aa   : > { %1180 = vmatmul.f32.gmra.mxu0 %v1179_v3  ;;  %1361 = vmatmul.f32.gmra.mxu1 %v5981_v5  ;;  %v1219_v21 = vand.u32 4294901760, %v1218_v9  ;;  %v1225_v23 = vand.u32 4294901760, %v1224_v16  ;;  %v3777_v3 = vld [vmem:[%s8059_s12] sm:$0xff] }
 0x1ac   : > { %4758 = vperm.xlu1 %4959, %v4704_v4   ;;  %v1226_v29 = vsub.f32 %v1224_v16, %v1225_v23 }
 0x1ae   : > { %4763 = vperm.xlu2 %4958, %v4705_v55   ;;  %1488 = vmatmul.f32.gmra.mxu2 %v1176_v56  ;;  %v2854_v56 = vld [vmem:[%s8057_s10 + $0x58] sm:$0xff]  ;;  %v1227_v30 = vand.u32 4294901760, %v1226_v29 }
 0x1af   : > { %2916 = vperm.xlu0 %4960, %v2854_v56  }
 0x1b0   : > { %1611 = vmatmul.f32.gmra.mxu3 %v1177_v43 }
 0x1b2   : > { %1188 = vmatmul.f32.gmra.mxu0 %v1187_v46  ;;  %1365 = vmatmul.f32.gmra.mxu1 %v5994_v25 }
 0x1b4   : > { %4773 = vperm.xlu1 %4959, %v4707_v44  }
 0x1b6   : > { %4778 = vperm.xlu2 %4958, %v4708_v28   ;;  %1493 = vmatmul.f32.gmra.mxu2 %v1184_v32  ;;  %v2845_v32 = vld [vmem:[%s8057_s10 + $0x10] sm:$0xff] }
 0x1b7   : > { %2901 = vperm.xlu0 %4960, %v2851_v11  }
 0x1b8   : > { %1617 = vmatmul.f32.gmra.mxu3 %v1185_v47 }
 0x1ba   : > { %1196 = vmatmul.f32.gmra.mxu0 %v1195_v48  ;;  %1369 = vmatmul.f32.gmra.mxu1 %v6007_v38 }
 0x1bc   : > { %4788 = vperm.xlu1 %4959, %v4710_v63  }
 0x1be   : > { %4831 = vperm.xlu2 %4958, %v4828_v24   ;;  %1498 = vmatmul.f32.gmra.mxu2 %v1192_v37 }
 0x1bf   : > { %2886 = vperm.xlu0 %4960, %v2848_v61  }
 0x1c0   : > { %1623 = vmatmul.f32.gmra.mxu3 %v1193_v40 }
 0x1c2   : > { %1204 = vmatmul.f32.gmra.mxu0 %v1203_v0  ;;  %1373 = vmatmul.f32.gmra.mxu1 %v6023_v51 }
 0x1c6   : > { %1503 = vmatmul.f32.gmra.mxu2 %v1200_v41 }
 0x1c7   : > { %2871 = vperm.xlu0 %4960, %v2845_v32  }
 0x1c8   : > { %1629 = vmatmul.f32.gmra.mxu3 %v1201_v34 }
 0x1ca   : > { %1212 = vmatmul.f32.gmra.mxu0 %v1211_v31  ;;  %1377 = vmatmul.f32.gmra.mxu1 %v6039_v62 }
 0x1ce   : > { %1508 = vmatmul.f32.gmra.mxu2 %v1208_v27 }
 0x1cf   : > { %3795 = vperm.xlu0 %4960, %v3777_v3  }
 0x1d0   : > { %1635 = vmatmul.f32.gmra.mxu3 %v1209_v7 }
 0x1d2   : > { %1220 = vmatmul.f32.gmra.mxu0 %v1219_v21  ;;  %1381 = vmatmul.f32.gmra.mxu1 %v6055_v58 }
 0x1d6   : > { %1513 = vmatmul.f32.gmra.mxu2 %v1216_v35 }
 0x1d8   : > { %1641 = vmatmul.f32.gmra.mxu3 %v1217_v57 }
 0x1da   : > { %1228 = vmatmul.f32.gmra.mxu0 %v1227_v30  ;;  %1385 = vmatmul.f32.gmra.mxu1 %v6068_v12 }
 0x1de   : > { %1518 = vmatmul.f32.gmra.mxu2 %v1224_v16 }
 0x1df   : > { %v6093_v43 = vpop.f32.mrf.mxu0 }
 0x1e0   : > { %1647 = vmatmul.f32.gmra.mxu3 %v1225_v23 }
 0x1e2   : > { %1389 = vmatmul.f32.gmra.mxu1 %v6078_v36  ;;  %1716 = vmatmul.f32.vlgmr.msrb.gmra.mxu0 %v5787_v54 }
 0x1e7   : > { %v6100_v17 = vpop.f32.mrf.mxu0  ;;  %v6102_v20 = vpop.f32.mrf.mxu1 }
 0x1e8   : > { %8069 = vst [vmem:[#allocation3_spill] sm:$0xff] %v6100_v17 }
 0x1e9   : > { %8070 = vst [vmem:[#allocation4_spill] sm:$0xff] %v6102_v20  ;;  %v6199_v63 = vpop.f32.mrf.mxu2  ;;  %v6208_v24 = vpop.f32.mrf.mxu3 }
 0x1ea   : > { %1720 = vmatmul.f32.gmra.mxu0 %v5808_v60  ;;  %1813 = vmatmul.f32.vlgmr.msrb.gmra.mxu1 %v5787_v54  ;;  %v3780_v54 = vld [vmem:[%s8059_s12 + $0x18] sm:$0xff]  ;;  %8074 = vst [vmem:[#allocation8_spill] sm:$0xff] %v6199_v63 }
 0x1eb   : > { %3810 = vperm.xlu0 %4960, %v3780_v54   ;;  %8075 = vst [vmem:[#allocation9_spill] sm:$0xff] %v6208_v24 }
 0x1ef   : > { %v6109_v10 = vpop.f32.mrf.mxu0  ;;  %v6111_v18 = vpop.f32.mrf.mxu1 }
 0x1f0   : > { %8071 = vst [vmem:[#allocation5_spill] sm:$0xff] %v6111_v18 }
 0x1f1   : > { %v6216_v0 = vpop.f32.mrf.mxu2 }
 0x1f2   : > { %1724 = vmatmul.f32.gmra.mxu0 %v5842_v15  ;;  %1817 = vmatmul.f32.gmra.mxu1 %v5808_v60  ;;  %v3783_v60 = vld [vmem:[%s8059_s12 + $0x30] sm:$0xff]  ;;  %8076 = vst [vmem:[#allocation10_spill] sm:$0xff] %v6216_v0 }
 0x1f3   : > { %3825 = vperm.xlu0 %4960, %v3783_v60   ;;  %v6220_v7 = vpop.f32.mrf.mxu3 }
 0x1f4   : > { %8077 = vst [vmem:[#allocation11_spill] sm:$0xff] %v6220_v7 }
 0x1f7   : > { %v6118_v47 = vpop.f32.mrf.mxu0  ;;  %v6120_v53 = vpop.f32.mrf.mxu1 }
 0x1f8   : > { %8072 = vst [vmem:[#allocation6_spill] sm:$0xff] %v6120_v53 }
 0x1f9   : > { %v6226_v35 = vpop.f32.mrf.mxu2 }
 0x1fa   : > { %1728 = vmatmul.f32.gmra.mxu0 %v5871_v13  ;;  %1821 = vmatmul.f32.gmra.mxu1 %v5842_v15  ;;  %v3786_v15 = vld [vmem:[%s8059_s12 + $0x48] sm:$0xff]  ;;  %8078 = vst [vmem:[#allocation12_spill] sm:$0xff] %v6226_v35 }
 0x1fb   : > { %3840 = vperm.xlu0 %4960, %v3786_v15  }
 0x1ff   : > { %v6127_v4 = vpop.f32.mrf.mxu0  ;;  %v6129_v2 = vpop.f32.mrf.mxu1 }
 0x200   : > { %8073 = vst [vmem:[#allocation7_spill] sm:$0xff] %v6129_v2 }
 0x202   : > { %1732 = vmatmul.f32.gmra.mxu0 %v5895_v14  ;;  %1825 = vmatmul.f32.gmra.mxu1 %v5871_v13  ;;  %v3789_v13 = vld [vmem:[%s8059_s12 + $0x60] sm:$0xff] }
 0x203   : > { %3855 = vperm.xlu0 %4960, %v3789_v13  }
 0x207   : > { %v6136_v37 = vpop.f32.mrf.mxu0  ;;  %v6138_v55 = vpop.f32.mrf.mxu1 }
 0x20a   : > { %1736 = vmatmul.f32.gmra.mxu0 %v5920_v39  ;;  %1829 = vmatmul.f32.gmra.mxu1 %v5895_v14  ;;  %v3792_v14 = vld [vmem:[%s8059_s12 + $0x78] sm:$0xff] }
 0x20b   : > { %3870 = vperm.xlu0 %4960, %v3792_v14  }
 0x20f   : > { %v6145_v50 = vpop.f32.mrf.mxu0  ;;  %v6147_v46 = vpop.f32.mrf.mxu1 }
 0x212   : > { %1740 = vmatmul.f32.gmra.mxu0 %v5945_v49  ;;  %1833 = vmatmul.f32.gmra.mxu1 %v5920_v39  ;;  %v4697_v39 = vld [vmem:[%s8060_s13 + $0x10] sm:$0xff] }
 0x213   : > { %4723 = vperm.xlu0 %4960, %v4697_v39  }
 0x217   : > { %v6154_v40 = vpop.f32.mrf.mxu0  ;;  %v6156_v33 = vpop.f32.mrf.mxu1 }
 0x21a   : > { %1744 = vmatmul.f32.gmra.mxu0 %v5966_v8  ;;  %1837 = vmatmul.f32.gmra.mxu1 %v5945_v49  ;;  %v4700_v49 = vld [vmem:[%s8060_s13 + $0x28] sm:$0xff] }
 0x21b   : > { %4738 = vperm.xlu0 %4960, %v4700_v49  }
 0x21f   : > { %v6163_v44 = vpop.f32.mrf.mxu0  ;;  %v6165_v42 = vpop.f32.mrf.mxu1 }
 0x222   : > { %1748 = vmatmul.f32.gmra.mxu0 %v5981_v5  ;;  %1841 = vmatmul.f32.gmra.mxu1 %v5966_v8  ;;  %v4703_v8 = vld [vmem:[%s8060_s13 + $0x40] sm:$0xff] }
 0x223   : > { %4753 = vperm.xlu0 %4960, %v4703_v8  }
 0x227   : > { %v6172_v41 = vpop.f32.mrf.mxu0  ;;  %v6174_v28 = vpop.f32.mrf.mxu1 }
 0x22a   : > { %1752 = vmatmul.f32.gmra.mxu0 %v5994_v25  ;;  %1845 = vmatmul.f32.gmra.mxu1 %v5981_v5  ;;  %v4706_v5 = vld [vmem:[%s8060_s13 + $0x58] sm:$0xff] }
 0x22b   : > { %4768 = vperm.xlu0 %4960, %v4706_v5  }
 0x22f   : > { %v6181_v45 = vpop.f32.mrf.mxu0  ;;  %v6183_v48 = vpop.f32.mrf.mxu1 }
 0x232   : > { %1756 = vmatmul.f32.gmra.mxu0 %v6007_v38  ;;  %1849 = vmatmul.f32.gmra.mxu1 %v5994_v25  ;;  %v4709_v25 = vld [vmem:[%s8060_s13 + $0x70] sm:$0xff] }
 0x233   : > { %4783 = vperm.xlu0 %4960, %v4709_v25  }
 0x237   : > { %v6190_v34 = vpop.f32.mrf.mxu0  ;;  %v6192_v59 = vpop.f32.mrf.mxu1 }
 0x23a   : > { %1760 = vmatmul.f32.gmra.mxu0 %v6023_v51  ;;  %1853 = vmatmul.f32.gmra.mxu1 %v6007_v38 }
 0x23f   : > { %v6201_v6 = vpop.f32.mrf.mxu0  ;;  %v6203_v27 = vpop.f32.mrf.mxu1 }
 0x242   : > { %1764 = vmatmul.f32.gmra.mxu0 %v6039_v62  ;;  %1857 = vmatmul.f32.gmra.mxu1 %v6023_v51  ;;  %v6230_v51 = vpop.f32.mrf.mxu3 }
 0x243   : > { %8079 = vst [vmem:[#allocation13_spill] sm:$0xff] %v6230_v51 }
 0x247   : > { %v6212_v1 = vpop.f32.mrf.mxu0  ;;  %v6214_v38 = vpop.f32.mrf.mxu1 }
 0x24a   : > { %1768 = vmatmul.f32.gmra.mxu0 %v6055_v58  ;;  %1861 = vmatmul.f32.gmra.mxu1 %v6039_v62  ;;  %v6238_v62 = vpop.f32.mrf.mxu2  ;;  %v6244_v9 = vpop.f32.mrf.mxu3 }
 0x24b   : > { %8080 = vst [vmem:[#allocation14_spill] sm:$0xff] %v6238_v62 }
 0x24c   : > { %8082 = vst [vmem:[#allocation16_spill] sm:$0xff] %v6244_v9  ;;  %v1059_v9 = vpop.permute.xlu1 %1058 }
 0x24d   : > { %v1214_v17 = vadd.f32 %v6212_v1, %v1059_v9 }
 0x24f   : > { %v6222_v22 = vpop.f32.mrf.mxu0  ;;  %v6224_v26 = vpop.f32.mrf.mxu1 }
 0x252   : > { %1772 = vmatmul.f32.gmra.mxu0 %v6068_v12  ;;  %1865 = vmatmul.f32.gmra.mxu1 %v6055_v58  ;;  %v6247_v58 = vpop.f32.mrf.mxu2  ;;  %v6253_v23 = vpop.f32.mrf.mxu3 }
 0x253   : > { %8083 = vst [vmem:[#allocation17_spill] sm:$0xff] %v6247_v58 }
 0x254   : > { %8086 = vst [vmem:[#allocation20_spill] sm:$0xff] %v6253_v23 }
 0x257   : > { %v6232_v19 = vpop.f32.mrf.mxu0  ;;  %v6234_v31 = vpop.f32.mrf.mxu1 }
 0x25a   : > { %1776 = vmatmul.f32.gmra.mxu0 %v6078_v36  ;;  %1869 = vmatmul.f32.gmra.mxu1 %v6068_v12  ;;  %v6259_v29 = vpop.f32.mrf.mxu2  ;;  %v6261_v30 = vpop.f32.mrf.mxu3 }
 0x25b   : > { %8089 = vst [vmem:[#allocation23_spill] sm:$0xff] %v6259_v29 }
 0x25c   : > { %8090 = vst [vmem:[#allocation24_spill] sm:$0xff] %v6261_v30 }
 0x25f   : > { %v6240_v57 = vpop.f32.mrf.mxu1  ;;  %v6242_v52 = vpop.f32.mrf.mxu0 }
 0x260   : > { %8081 = vst [vmem:[#allocation15_spill] sm:$0xff] %v6242_v52 }
 0x262   : > { %1873 = vmatmul.f32.gmra.mxu1 %v6078_v36  ;;  %v6267_v36 = vpop.f32.mrf.mxu2  ;;  %v6269_v32 = vpop.f32.mrf.mxu3 }
 0x263   : > { %8093 = vst [vmem:[#allocation27_spill] sm:$0xff] %v6267_v36 }
 0x264   : > { %8094 = vst [vmem:[#allocation28_spill] sm:$0xff] %v6269_v32 }
 0x267   : > { %v6249_v16 = vpop.f32.mrf.mxu0  ;;  %v6251_v21 = vpop.f32.mrf.mxu1 }
 0x268   : > { %8084 = vst [vmem:[#allocation18_spill] sm:$0xff] %v6249_v16 }
 0x269   : > { %8085 = vst [vmem:[#allocation19_spill] sm:$0xff] %v6251_v21 }
 0x26a   : > { %v6275_v60 = vpop.f32.mrf.mxu2  ;;  %v6281_v14 = vpop.f32.mrf.mxu3 }
 0x26b   : > { %8097 = vst [vmem:[#allocation31_spill] sm:$0xff] %v6275_v60 }
 0x26c   : > { %8100 = vst [vmem:[#allocation34_spill] sm:$0xff] %v6281_v14 }
 0x26f   : > { %v6255_v56 = vpop.f32.mrf.mxu0  ;;  %v6257_v12 = vpop.f32.mrf.mxu1 }
 0x270   : > { %8087 = vst [vmem:[#allocation21_spill] sm:$0xff] %v6255_v56 }
 0x271   : > { %8088 = vst [vmem:[#allocation22_spill] sm:$0xff] %v6257_v12 }
 0x272   : > { %v6283_v39 = vpop.f32.mrf.mxu2  ;;  %v6289_v5 = vpop.f32.mrf.mxu3 }
 0x273   : > { %8103 = vst [vmem:[#allocation37_spill] sm:$0xff] %v6289_v5 }
 0x277   : > { %v6263_v11 = vpop.f32.mrf.mxu0  ;;  %v6265_v61 = vpop.f32.mrf.mxu1 }
 0x278   : > { %8091 = vst [vmem:[#allocation25_spill] sm:$0xff] %v6263_v11  ;;  %v1069_v11 = vpop.permute.xlu2 %1068 }
 0x279   : > { %8092 = vst [vmem:[#allocation26_spill] sm:$0xff] %v6265_v61 }
 0x27a   : > { %v6295_v12 = vpop.f32.mrf.mxu2  ;;  %v6297_v52 = vpop.f32.mrf.mxu3 }
 0x27b   : > { %8106 = vst [vmem:[#allocation40_spill] sm:$0xff] %v6297_v52 }
 0x27f   : > { %v6271_v3 = vpop.f32.mrf.mxu0  ;;  %v6273_v54 = vpop.f32.mrf.mxu1 }
 0x280   : > { %8095 = vst [vmem:[#allocation29_spill] sm:$0xff] %v6271_v3 }
 0x281   : > { %8096 = vst [vmem:[#allocation30_spill] sm:$0xff] %v6273_v54 }
 0x282   : > { %v1494_v24 = vpop.f32.mrf.mxu2  ;;  %v6303_v54 = vpop.f32.mrf.mxu3 }
 0x287   : > { %v6277_v15 = vpop.f32.mrf.mxu0  ;;  %v6279_v13 = vpop.f32.mrf.mxu1 }
 0x288   : > { %8098 = vst [vmem:[#allocation32_spill] sm:$0xff] %v6277_v15 }
 0x289   : > { %8099 = vst [vmem:[#allocation33_spill] sm:$0xff] %v6279_v13  ;;  %v1064_v13 = vpop.permute.xlu0 %1063 }
 0x28a   : > { %v1499_v51 = vpop.f32.mrf.mxu2  ;;  %v1624_v3 = vpop.f32.mrf.mxu3  ;;  %v1222_v14 = vadd.f32 %v6222_v22, %v1064_v13 }
 0x28c   : > { %v1387_v5 = vadd.f32 %v6234_v31, %v1222_v14 }
 0x28f   : > { %v6285_v49 = vpop.f32.mrf.mxu0  ;;  %v6287_v8 = vpop.f32.mrf.mxu1 }
 0x290   : > { %8101 = vst [vmem:[#allocation35_spill] sm:$0xff] %v6285_v49  ;;  %v1049_v49 = vpop.permute.xlu1 %1048 }
 0x291   : > { %8102 = vst [vmem:[#allocation36_spill] sm:$0xff] %v6287_v8  ;;  %v1039_v0 = vpop.permute.xlu0 %1038  ;;  %v1198_v36 = vadd.f32 %v6190_v34, %v1049_v49  ;;  %v1230_v34 = vadd.f32 %v6232_v19, %v1069_v11 }
 0x292   : > { %v1504_v15 = vpop.f32.mrf.mxu2 }
 0x293   : > { %v1375_v22 = vadd.f32 %v6203_v27, %v1198_v36 }
 0x297   : > { %v6291_v25 = vpop.f32.mrf.mxu0  ;;  %v6293_v21 = vpop.f32.mrf.mxu1 }
 0x298   : > { %8104 = vst [vmem:[#allocation38_spill] sm:$0xff] %v6291_v25  ;;  %v1034_v32 = vpop.permute.xlu1 %1033 }
 0x299   : > { %8105 = vst [vmem:[#allocation39_spill] sm:$0xff] %v6293_v21  ;;  %v1054_v21 = vpop.permute.xlu2 %1053  ;;  %v1024_v20 = vpop.permute.xlu0 %1023 }
 0x29a   : > { %v1206_v29 = vadd.f32 %v6201_v6, %v1054_v21 }
 0x29c   : > { %v1379_v2 = vadd.f32 %v6214_v38, %v1206_v29  ;;  %v1174_v38 = vadd.f32 %v6163_v44, %v1034_v32  ;;  %v8115_v32 = vld [vmem:[#allocation31_spill] sm:$0xff] }
 0x29e   : > { %v1505_v31 = vadd.f32 %v1504_v15, %v1379_v2  ;;  %v1363_v2 = vadd.f32 %v6174_v28, %v1174_v38  ;;  %v8117_v15 = vld [vmem:[#allocation40_spill] sm:$0xff] }
 0x29f   : > { %v6299_v61 = vpop.f32.mrf.mxu0  ;;  %v6301_v16 = vpop.f32.mrf.mxu1 }
 0x2a0   : > { %8107 = vst [vmem:[#allocation41_spill] sm:$0xff] %v6299_v61  ;;  %v1019_v1 = vpop.permute.xlu1 %1018 }
 0x2a1   : > { %8108 = vst [vmem:[#allocation42_spill] sm:$0xff] %v6301_v16  ;;  %v1630_v16 = vpop.f32.mrf.mxu3  ;;  %v1044_v18 = vpop.permute.xlu2 %1043 }
 0x2a2   : > { %v1190_v52 = vadd.f32 %v6181_v45, %v1044_v18 }
 0x2a7   : > { %v6305_v56 = vpop.f32.mrf.mxu0  ;;  %v6307_v7 = vpop.f32.mrf.mxu1 }
 0x2a8   : > { %8109 = vst [vmem:[#allocation43_spill] sm:$0xff] %v6305_v56 }
 0x2a9   : > { %8110 = vst [vmem:[#allocation44_spill] sm:$0xff] %v6307_v7  ;;  %v1509_v7 = vpop.f32.mrf.mxu2  ;;  %v1636_v25 = vpop.f32.mrf.mxu3 }
 0x2aa   : > { %v1029_v53 = vpop.permute.xlu2 %1028 }
 0x2af   : > { %v6309_v63 = vpop.f32.mrf.mxu0  ;;  %v6311_v8 = vpop.f32.mrf.mxu1 }
 0x2b0   : > { %8111 = vst [vmem:[#allocation45_spill] sm:$0xff] %v6309_v63 }
 0x2b1   : > { %8112 = vst [vmem:[#allocation46_spill] sm:$0xff] %v6311_v8  ;;  %v1009_v8 = vpop.permute.xlu0 %1008  ;;  %v1514_v56 = vpop.f32.mrf.mxu2 }
 0x2b2   : > { %v1642_v13 = vpop.f32.mrf.mxu3  ;;  %v1515_v60 = vadd.f32 %v1514_v56, %v1387_v5  ;;  %v1014_v18 = vpop.permute.xlu2 %1013  ;;  %v1134_v44 = vadd.f32 %v6118_v47, %v1009_v8  ;;  %v1485_v47 = vadd.f32 %v6283_v39, %v1363_v2  ;;  %v8121_v5 = vld [vmem:[#allocation37_spill] sm:$0xff] }
 0x2b3   : > { %v1142_v28 = vadd.f32 %v6127_v4, %v1014_v18  ;;  %v8128_v18 = vld [vmem:[#allocation41_spill] sm:$0xff] }
 0x2b4   : > { %v1643_v21 = vadd.f32 %v1642_v13, %v1515_v60  ;;  %v8123_v13 = vld [vmem:[#allocation23_spill] sm:$0xff] }
 0x2b7   : > { %v6313_v23 = vpop.f32.mrf.mxu0  ;;  %v6315_v35 = vpop.f32.mrf.mxu1 }
 0x2b8   : > { %8113 = vst [vmem:[#allocation47_spill] sm:$0xff] %v6315_v35  ;;  %v1383_v35 = vadd.f32 %v6224_v26, %v1214_v17  ;;  %v1371_v17 = vadd.f32 %v6192_v59, %v1190_v52  ;;  %v1166_v59 = vadd.f32 %v6154_v40, %v1029_v53  ;;  %v8130_v2 = vld [vmem:[#allocation46_spill] sm:$0xff] }
 0x2b9   : > { %v994_v6 = vpop.permute.xlu0 %993  ;;  %v1519_v52 = vpop.f32.mrf.mxu2 }
 0x2ba   : > { %v1510_v9 = vadd.f32 %v1509_v7, %v1383_v35  ;;  %v6334_v45 = vadd.f32 %v6093_v43, %v994_v6  ;;  %v1391_v7 = vadd.f32 %v6240_v57, %v1230_v34  ;;  %v1158_v35 = vadd.f32 %v6145_v50, %v1024_v20  ;;  %v8126_v34 = vld [vmem:[#allocation6_spill] sm:$0xff] }
 0x2bb   : > { %v1495_v19 = vadd.f32 %v1494_v24, %v1371_v17  ;;  %v1150_v43 = vadd.f32 %v6136_v37, %v1019_v1  ;;  %v1359_v56 = vadd.f32 %v6165_v42, %v1166_v59  ;;  %v1004_v37 = vpop.permute.xlu1 %1003 }
 0x2bc   : > { %v1637_v27 = vadd.f32 %v1636_v25, %v1510_v9  ;;  %v1520_v20 = vadd.f32 %v1519_v52, %v1391_v7  ;;  %v1355_v24 = vadd.f32 %v6156_v33, %v1158_v35  ;;  %v1607_v25 = vadd.f32 %v8121_v5, %v1485_v47  ;;  %v8124_v9 = vld [vmem:[#allocation43_spill] sm:$0xff]  ;;  %v8129_v35 = vld [vmem:[#allocation17_spill] sm:$0xff] }
 0x2bd   : > { %v1351_v42 = vadd.f32 %v6147_v46, %v1150_v43  ;;  %v1480_v4 = vadd.f32 %v8115_v32, %v1359_v56  ;;  %v8119_v46 = vld [vmem:[#allocation7_spill] sm:$0xff]  ;;  %v8133_v43 = vld [vmem:[#allocation44_spill] sm:$0xff] }
 0x2be   : > { %v1343_v8 = vadd.f32 %v8119_v46, %v1134_v44  ;;  %v8131_v44 = vld [vmem:[#allocation28_spill] sm:$0xff]  ;;  %v8138_v47 = vld [vmem:[#allocation35_spill] sm:$0xff]  ;;  %v8146_v46 = vld [vmem:[#allocation29_spill] sm:$0xff] }
 0x2bf   : > { %v1765_v30 = vpop.f32.mrf.mxu0  ;;  %v6317_v62 = vpop.f32.mrf.mxu1  ;;  %v1470_v1 = vadd.f32 %v8123_v13, %v1351_v42 }
 0x2c0   : > { %8114 = vst [vmem:[#allocation48_spill] sm:$0xff] %v6317_v62  ;;  %v1182_v62 = vadd.f32 %v6172_v41, %v1039_v0  ;;  %v1500_v0 = vadd.f32 %v1499_v51, %v1375_v22 }
 0x2c2   : > { %v1367_v41 = vadd.f32 %v6183_v48, %v1182_v62  ;;  %v1631_v48 = vadd.f32 %v1630_v16, %v1505_v31  ;;  %v1625_v57 = vadd.f32 %v1624_v3, %v1500_v0  ;;  %v1648_v16 = vpop.f32.mrf.mxu3  ;;  %v8116_v3 = vld [vmem:[#allocation45_spill] sm:$0xff] }
 0x2c4   : > { %v1490_v29 = vadd.f32 %v6295_v12, %v1367_v41  ;;  %v1766_v50 = vadd.f32 %v1765_v30, %v1631_v48  ;;  %v1762_v12 = vadd.f32 %v6313_v23, %v1625_v57  ;;  %v1126_v30 = vadd.f32 %v6109_v10, %v1004_v37  ;;  %v8120_v23 = vld [vmem:[#allocation27_spill] sm:$0xff]  ;;  %v8127_v41 = vld [vmem:[#allocation34_spill] sm:$0xff]  ;;  %v8134_v57 = vld [vmem:[#allocation5_spill] sm:$0xff] }
 0x2c5   : > { %v8122_v10 = vld [vmem:[#allocation47_spill] sm:$0xff]  ;;  %v1601_v0 = vadd.f32 %v8127_v41, %v1480_v4  ;;  %v8142_v4 = vld [vmem:[#allocation32_spill] sm:$0xff] }
 0x2c6   : > { %v1613_v14 = vadd.f32 %v8117_v15, %v1490_v29  ;;  %v1339_v38 = vadd.f32 %v8126_v34, %v1126_v30 }
 0x2c7   : > { %v1769_v58 = vpop.f32.mrf.mxu0  ;;  %v1862_v61 = vpop.f32.mrf.mxu1  ;;  %v8118_v39 = vld [vmem:[#allocation48_spill] sm:$0xff] }
 0x2c8   : > { %v1770_v51 = vadd.f32 %v1769_v58, %v1637_v27  ;;  %v1619_v58 = vadd.f32 %v6303_v54, %v1495_v19  ;;  %v1863_v36 = vadd.f32 %v1862_v61, %v1766_v50  ;;  %v1649_v54 = vadd.f32 %v1648_v16, %v1520_v20  ;;  %v8135_v20 = vld [vmem:[#allocation14_spill] sm:$0xff] }
 0x2c9   : > { %v1859_v49 = vadd.f32 %v8118_v39, %v1762_v12  ;;  %v1475_v61 = vadd.f32 %v8120_v23, %v1355_v24  ;;  %v1754_v6 = vadd.f32 %v8124_v9, %v1613_v14  ;;  %v1750_v27 = vadd.f32 %v8128_v18, %v1607_v25  ;;  %v8139_v16 = vld [vmem:[#allocation42_spill] sm:$0xff]  ;;  %v8145_v39 = vld [vmem:[#allocation16_spill] sm:$0xff]  ;;  %v8152_v18 = vld [vmem:[#allocation11_spill] sm:$0xff] }
 0x2ca   : > { %v1758_v33 = vadd.f32 %v8116_v3, %v1619_v58  ;;  %v1460_v50 = vadd.f32 %v8135_v20, %v1343_v8  ;;  %v8144_v14 = vld [vmem:[#allocation10_spill] sm:$0xff]  ;;  %v8147_v23 = vld [vmem:[#allocation36_spill] sm:$0xff] }
 0x2cb   : > { %v1851_v19 = vadd.f32 %v8130_v2, %v1754_v6  ;;  %v1595_v48 = vadd.f32 %v8131_v44, %v1475_v61  ;;  %v1847_v56 = vadd.f32 %v8133_v43, %v1750_v27  ;;  %v8150_v6 = vld [vmem:[#allocation25_spill] sm:$0xff]  ;;  %v8156_v43 = vld [vmem:[#allocation18_spill] sm:$0xff] }
 0x2cc   : > { %v1855_v22 = vadd.f32 %v8122_v10, %v1758_v33  ;;  %v8143_v33 = vld [vmem:[#allocation39_spill] sm:$0xff] }
 0x2cd   : > { %v1742_v58 = vadd.f32 %v8138_v47, %v1595_v48  ;;  %v8159_v47 = vld [vmem:[#allocation22_spill] sm:$0xff] }
 0x2cf   : > { %v1866_v63 = vpop.f32.mrf.mxu1  ;;  %v1773_v26 = vpop.f32.mrf.mxu0 }
 0x2d0   : > { %v1774_v62 = vadd.f32 %v1773_v26, %v1643_v21  ;;  %v1867_v53 = vadd.f32 %v1866_v63, %v1770_v51  ;;  %v1347_v63 = vadd.f32 %v6138_v55, %v1142_v28  ;;  %v999_v55 = vpop.permute.xlu2 %998  ;;  %v8125_v26 = vld [vmem:[#allocation3_spill] sm:$0xff]  ;;  %v8132_v51 = vld [vmem:[#allocation38_spill] sm:$0xff]  ;;  %v8137_v28 = vld [vmem:[#allocation4_spill] sm:$0xff] }
 0x2d1   : > { %v1118_v31 = vadd.f32 %v8125_v26, %v999_v55  ;;  %v1331_v24 = vadd.f32 %v8137_v28, %v6334_v45  ;;  %v8148_v55 = vld [vmem:[#allocation8_spill] sm:$0xff]  ;;  %v8151_v26 = vld [vmem:[#allocation33_spill] sm:$0xff]  ;;  %v8158_v28 = vld [vmem:[#allocation15_spill] sm:$0xff] }
 0x2d2   : > { %v1465_v59 = vadd.f32 %v8129_v35, %v1347_v63  ;;  %v8141_v63 = vld [vmem:[#allocation20_spill] sm:$0xff]  ;;  %v8154_v35 = vld [vmem:[#allocation30_spill] sm:$0xff] }
 0x2d3   : > { %v1445_v13 = vadd.f32 %v8148_v55, %v1331_v24  ;;  %v1893_v55 = vld [vmem:[%s8054_s7] sm:$0xff] }
 0x2d4   : > { %v1583_v32 = vadd.f32 %v8141_v63, %v1465_v59 }
 0x2d6   : > { %v1734_v8 = vadd.f32 %v8146_v46, %v1583_v32 }
 0x2d7   : > { %v1870_v11 = vpop.f32.mrf.mxu1  ;;  %v1777_v60 = vpop.f32.mrf.mxu0 }
 0x2d8   : > { %v1871_v40 = vadd.f32 %v1870_v11, %v1774_v62  ;;  %v1778_v17 = vadd.f32 %v1777_v60, %v1649_v54  ;;  %v1746_v62 = vadd.f32 %v8132_v51, %v1601_v0  ;;  %v1335_v11 = vadd.f32 %v8134_v57, %v1118_v31  ;;  %v8155_v51 = vld [vmem:[#allocation9_spill] sm:$0xff] }
 0x2d9   : > { %v1839_v60 = vadd.f32 %v8143_v33, %v1742_v58  ;;  %v1831_v31 = vadd.f32 %v8151_v26, %v1734_v8 }
 0x2da   : > { %4996 = vtanh.f32 %v1871_v40  ;;  %v1843_v37 = vadd.f32 %v8139_v16, %v1746_v62  ;;  %v1450_v54 = vadd.f32 %v8144_v14, %v1335_v11  ;;  %v1559_v62 = vadd.f32 %v8155_v51, %v1445_v13 }
 0x2db   : > { %4998 = vtanh.f32 %v1867_v53  ;;  %v8136_v53 = vld [vmem:[#allocation24_spill] sm:$0xff] }
 0x2dc   : > { %5000 = vtanh.f32 %v1863_v36  ;;  %v1589_v40 = vadd.f32 %v8136_v53, %v1470_v1  ;;  %v8140_v36 = vld [vmem:[#allocation12_spill] sm:$0xff]  ;;  %v8149_v1 = vld [vmem:[#allocation13_spill] sm:$0xff]  ;;  %v1565_v27 = vadd.f32 %v8152_v18, %v1450_v54  ;;  %v1718_v24 = vadd.f32 %v8158_v28, %v1559_v62 }
 0x2dd   : > { %5002 = vtanh.f32 %v1859_v49  ;;  %v1455_v30 = vadd.f32 %v8140_v36, %v1339_v38  ;;  %v1577_v49 = vadd.f32 %v8145_v39, %v1460_v50 }
 0x2de   : > { %5004 = vtanh.f32 %v1855_v22  ;;  %v1738_v3 = vadd.f32 %v8142_v4, %v1589_v40  ;;  %v8160_v4 = vld [vmem:[#allocation19_spill] sm:$0xff] }
 0x2df   : > { %v1874_v21 = vpop.f32.mrf.mxu1  ;;  %v1571_v9 = vadd.f32 %v8149_v1, %v1455_v30 }
 0x2e0   : > { %v4997_v7 = vpop.eup %4996  ;;  %v1875_v52 = vadd.f32 %v1874_v21, %v1778_v17  ;;  %v1835_v61 = vadd.f32 %v8147_v23, %v1738_v3  ;;  %v1730_v17 = vadd.f32 %v8150_v6, %v1577_v49  ;;  %v8153_v21 = vld [vmem:[#allocation21_spill] sm:$0xff]  ;;  %v1815_v3 = vadd.f32 %v8160_v4, %v1718_v24 }
 0x2e1   : > { %v4999_v29 = vpop.eup %4998  ;;  %v6378_v42 = vand.u32 4294901760, %v4997_v7 }
 0x2e2   : > { %5006 = vtanh.f32 %v1875_v52  ;;  %v5001_v12 = vpop.eup %5000  ;;  %v6384_v15 = vand.u32 4294901760, %v4999_v29  ;;  %v1827_v59 = vadd.f32 %v8154_v35, %v1730_v17 }
 0x2e3   : > { %5008 = vtanh.f32 %v1851_v19  ;;  %v5003_v45 = vpop.eup %5002  ;;  %v6391_v25 = vsub.f32 %v4997_v7, %v6378_v42  ;;  %v6393_v10 = vand.u32 4294901760, %v5001_v12  ;;  %v1726_v7 = vadd.f32 %v8153_v21, %v1571_v9 }
 0x2e4   : > { %5010 = vtanh.f32 %v1847_v56  ;;  %v5005_v5 = vpop.eup %5004  ;;  %v6402_v38 = vsub.f32 %v4999_v29, %v6384_v15  ;;  %v6404_v41 = vand.u32 4294901760, %v5003_v45  ;;  %v1722_v56 = vadd.f32 %v8156_v43, %v1565_v27  ;;  %v8157_v29 = vld [vmem:[#allocation26_spill] sm:$0xff] }
 0x2e5   : > { %5012 = vtanh.f32 %v1843_v37  ;;  %v6415_v52 = vsub.f32 %v5001_v12, %v6393_v10  ;;  %v6417_v44 = vand.u32 4294901760, %v5005_v5  ;;  %v2174_v48 = vand.u32 4294901760, %v6391_v25 }
 0x2e6   : > { %5014 = vtanh.f32 %v1839_v60  ;;  %v1823_v57 = vadd.f32 %v8157_v29, %v1726_v7  ;;  %v6427_v50 = vsub.f32 %v5003_v45, %v6404_v41  ;;  %v2180_v40 = vand.u32 4294901760, %v6402_v38 }
 0x2e7   : > { %5016 = vtanh.f32 %v1835_v61  ;;  %v1819_v58 = vadd.f32 %v8159_v47, %v1722_v56  ;;  %v2175_v36 = vsub.f32 %v6391_v25, %v2174_v48  ;;  %v6446_v30 = vsub.f32 %v5005_v5, %v6417_v44 }
 0x2e8   : > { %v5007_v22 = vpop.eup %5006  ;;  %5018 = vtanh.f32 %v1831_v31  ;;  %v2186_v63 = vand.u32 4294901760, %v6415_v52  ;;  %v2181_v45 = vsub.f32 %v6402_v38, %v2180_v40  ;;  %v2192_v54 = vand.u32 4294901760, %v6427_v50 }
 0x2e9   : > { %v6399_v34 = vand.u32 4294901760, %v5007_v22  ;;  %v5009_v0 = vpop.eup %5008  ;;  %5020 = vtanh.f32 %v1827_v59  ;;  %v2176_v46 = vand.u32 4294901760, %v2175_v36  ;;  %v2198_v61 = vand.u32 4294901760, %v6446_v30 }
 0x2ea   : > { %v5011_v2 = vpop.eup %5010  ;;  %v6429_v53 = vand.u32 4294901760, %v5009_v0  ;;  %5022 = vtanh.f32 %v1823_v57  ;;  %v2187_v8 = vsub.f32 %v6415_v52, %v2186_v63  ;;  %v2182_v13 = vand.u32 4294901760, %v2181_v45 }
 0x2eb   : > { %2006 = vmatpush.msrb.mxu2 %v6399_v34  ;;  %2457 = vmatpush.msra.mxu1 %v6399_v34  ;;  %v6412_v19 = vsub.f32 %v5007_v22, %v6399_v34  ;;  %v5013_v11 = vpop.eup %5012  ;;  %v6435_v16 = vand.u32 4294901760, %v5011_v2  ;;  %5024 = vtanh.f32 %v1819_v58  ;;  %v2193_v1 = vsub.f32 %v6427_v50, %v2192_v54  ;;  %v1894_v58 = vld [vmem:[%s8054_s7 + $0x8] sm:$0xff] }
 0x2ec   : > { %v5015_v37 = vpop.eup %5014  ;;  %v6451_v33 = vand.u32 4294901760, %v5013_v11  ;;  %v6459_v14 = vsub.f32 %v5009_v0, %v6429_v53  ;;  %5026 = vtanh.f32 %v1815_v3  ;;  %v2188_v0 = vand.u32 4294901760, %v2187_v8 }
 0x2ed   : > { %2008 = vmatpush.msrb.mxu2 %v6378_v42  ;;  %2329 = vmatpush.msra.mxu0 %v6412_v19  ;;  %v2168_v20 = vand.u32 4294901760, %v6412_v19  ;;  %v5017_v32 = vpop.eup %5016  ;;  %v6463_v49 = vand.u32 4294901760, %v5015_v37  ;;  %v6470_v23 = vsub.f32 %v5011_v2, %v6435_v16  ;;  %v2199_v18 = vsub.f32 %v6446_v30, %v2198_v61 }
 0x2ee   : > { %2459 = vmatpush.msra.mxu1 %v6378_v42  ;;  %v5019_v39 = vpop.eup %5018  ;;  %v6475_v22 = vand.u32 4294901760, %v5017_v32  ;;  %v6485_v9 = vsub.f32 %v5013_v11, %v6451_v33  ;;  %v2204_v6 = vand.u32 4294901760, %v6459_v14  ;;  %v6500_v21 = vand.u32 4294901760, %v1893_v55 }
 0x2ef   : > { %2010 = vmatpush.msrb.mxu2 %v6384_v15  ;;  %2332 = vmatpush.msra.mxu0 %v6391_v25  ;;  %v2169_v12 = vsub.f32 %v6412_v19, %v2168_v20  ;;  %v5021_v5 = vpop.eup %5020  ;;  %v6491_v26 = vsub.f32 %v5015_v37, %v6463_v49  ;;  %v6493_v31 = vand.u32 4294901760, %v5019_v39  ;;  %v2210_v27 = vand.u32 4294901760, %v6470_v23 }
 0x2f0   : > { %2461 = vmatpush.msra.mxu1 %v6384_v15  ;;  %v5023_v17 = vpop.eup %5022  ;;  %v6504_v35 = vand.u32 4294901760, %v5021_v5  ;;  %v2194_v59 = vand.u32 4294901760, %v2193_v1  ;;  %v2205_v2 = vsub.f32 %v6459_v14, %v2204_v6  ;;  %v6511_v51 = vsub.f32 %v5017_v32, %v6475_v22 }
 0x2f1   : > { %2012 = vmatpush.msrb.mxu2 %v6393_v10  ;;  %2335 = vmatpush.msra.mxu0 %v6402_v38  ;;  %v2170_v60 = vand.u32 4294901760, %v2169_v12  ;;  %v5025_v7 = vpop.eup %5024  ;;  %v2216_v62 = vand.u32 4294901760, %v6485_v9  ;;  %v6517_v56 = vsub.f32 %v5019_v39, %v6493_v31  ;;  %v6519_v29 = vand.u32 4294901760, %v5023_v17  ;;  %v1897_v38 = vld [vmem:[%s8054_s7 + $0x20] sm:$0xff] }
 0x2f2   : > { %2463 = vmatpush.msra.mxu1 %v6393_v10  ;;  %v5027_v43 = vpop.eup %5026  ;;  %v2200_v57 = vand.u32 4294901760, %v2199_v18  ;;  %v2211_v11 = vsub.f32 %v6470_v23, %v2210_v27  ;;  %v2222_v28 = vand.u32 4294901760, %v6491_v26  ;;  %v6527_v24 = vsub.f32 %v1893_v55, %v6500_v21 }
 0x2f3   : > { %2014 = vmatpush.msrb.mxu2 %v6404_v41  ;;  %2171 = vmatpush.msrb.mxu3 %v2170_v60  ;;  %v6531_v47 = vand.u32 4294901760, %v5025_v7  ;;  %v2206_v37 = vand.u32 4294901760, %v2205_v2  ;;  %v2217_v12 = vsub.f32 %v6485_v9, %v2216_v62  ;;  %v6541_v36 = vsub.f32 %v5021_v5, %v6504_v35 }
 0x2f4   : > { %2338 = vmatpush.msra.mxu0 %v6415_v52  ;;  %2465 = vmatpush.msra.mxu1 %v6404_v41  ;;  %v2228_v32 = vand.u32 4294901760, %v6511_v51  ;;  %v6547_v4 = vsub.f32 %v5023_v17, %v6519_v29  ;;  %v6549_v3 = vand.u32 4294901760, %v5027_v43  ;;  %v2234_v60 = vand.u32 4294901760, %v6517_v56 }
 0x2f5   : > { %2016 = vmatpush.msrb.mxu2 %v6417_v44  ;;  %2177 = vmatpush.msrb.mxu3 %v2176_v46  ;;  %v2212_v45 = vand.u32 4294901760, %v2211_v11  ;;  %v2223_v39 = vsub.f32 %v6491_v26, %v2222_v28  ;;  %v2039_v46 = vand.u32 4294901760, %v6527_v24  ;;  %v6557_v8 = vand.u32 4294901760, %v1894_v58 }
 0x2f6   : > { %2341 = vmatpush.msra.mxu0 %v6427_v50  ;;  %2467 = vmatpush.msra.mxu1 %v6417_v44  ;;  %v2218_v5 = vand.u32 4294901760, %v2217_v12  ;;  %v2229_v55 = vsub.f32 %v6511_v51, %v2228_v32  ;;  %v8064_v1 = vand.u32 4294901760, %v6541_v36  ;;  %v6572_v17 = vsub.f32 %v5027_v43, %v6549_v3  ;;  %v1895_v43 = vld [vmem:[%s8054_s7 + $0x10] sm:$0xff]  ;;  %v1898_v50 = vld [vmem:[%s8054_s7 + $0x28] sm:$0xff] }
 0x2f7   : > { %2018 = vmatpush.msrb.mxu2 %v6429_v53  ;;  %2183 = vmatpush.msrb.mxu3 %v2182_v13  ;;  %v6566_v13 = vsub.f32 %v5025_v7, %v6531_v47  ;;  %v2224_v18 = vand.u32 4294901760, %v2223_v39  ;;  %v2235_v7 = vsub.f32 %v6517_v56, %v2234_v60  ;;  %v2046_v2 = vsub.f32 %v1894_v58, %v6557_v8 }
 0x2f8   : > { %2344 = vmatpush.msra.mxu0 %v6446_v30  ;;  %2469 = vmatpush.msra.mxu1 %v6429_v53  ;;  %v2241_v11 = vsub.f32 %v6541_v36, %v8064_v1  ;;  %v2258_v12 = vand.u32 4294901760, %v6572_v17  ;;  %v8161_v30 = vand.u32 4294901760, %v6541_v36 }
 0x2f9   : > { %2020 = vmatpush.msrb.mxu2 %v6435_v16  ;;  %2189 = vmatpush.msrb.mxu3 %v2188_v0  ;;  %v8063_v0 = vand.u32 4294901760, %v6547_v4 }
 0x2fa   : > { %2347 = vmatpush.msra.mxu0 %v6459_v14  ;;  %2471 = vmatpush.msra.mxu1 %v6435_v16 }
 0x2fb   : > { %2022 = vmatpush.msrb.mxu2 %v6451_v33  ;;  %2195 = vmatpush.msrb.mxu3 %v2194_v59  ;;  %v2040_v59 = vsub.f32 %v6527_v24, %v2039_v46  ;;  %v2247_v58 = vsub.f32 %v6547_v4, %v8063_v0 }
 0x2fc   : > { %2350 = vmatpush.msra.mxu0 %v6470_v23  ;;  %2473 = vmatpush.msra.mxu1 %v6451_v33 }
 0x2fd   : > { %2024 = vmatpush.msrb.mxu2 %v6463_v49  ;;  %2201 = vmatpush.msrb.mxu3 %v2200_v57  ;;  %v2230_v57 = vand.u32 4294901760, %v2229_v55  ;;  %v2041_v39 = vand.u32 4294901760, %v2040_v59  ;;  %v6598_v55 = vand.u32 4294901760, %v1895_v43  ;;  %v2259_v59 = vsub.f32 %v6572_v17, %v2258_v12 }
 0x2fe   : > { %2353 = vmatpush.msra.mxu0 %v6485_v9  ;;  %2475 = vmatpush.msra.mxu1 %v6463_v49 }
 0x2ff   : > { %2026 = vmatpush.msrb.mxu2 %v6475_v22  ;;  %2207 = vmatpush.msrb.mxu3 %v2206_v37  ;;  %v2252_v37 = vand.u32 4294901760, %v6566_v13  ;;  %v2054_v1 = vsub.f32 %v1895_v43, %v6598_v55 }
 0x300   : > { %2356 = vmatpush.msra.mxu0 %v6491_v26  ;;  %2477 = vmatpush.msra.mxu1 %v6475_v22 }
 0x301   : > { %2028 = vmatpush.msrb.mxu2 %v6493_v31  ;;  %2213 = vmatpush.msrb.mxu3 %v2212_v45  ;;  %v2236_v45 = vand.u32 4294901760, %v2235_v7  ;;  %v2253_v0 = vsub.f32 %v6566_v13, %v2252_v37  ;;  %v2248_v7 = vand.u32 4294901760, %v2247_v58  ;;  %v2260_v58 = vand.u32 4294901760, %v2259_v59 }
 0x302   : > { %2359 = vmatpush.msra.mxu0 %v6511_v51  ;;  %2479 = vmatpush.msra.mxu1 %v6493_v31 }
 0x303   : > { %2030 = vmatpush.msrb.mxu2 %v6504_v35  ;;  %2219 = vmatpush.msrb.mxu3 %v2218_v5  ;;  %v2047_v5 = vand.u32 4294901760, %v2046_v2 }
 0x304   : > { %2362 = vmatpush.msra.mxu0 %v6517_v56  ;;  %2481 = vmatpush.msra.mxu1 %v6504_v35 }
 0x305   : > { %2032 = vmatpush.msrb.mxu2 %v6519_v29  ;;  %2225 = vmatpush.msrb.mxu3 %v2224_v18  ;;  %v2242_v18 = vand.u32 4294901760, %v2241_v11  ;;  %v1896_v11 = vld [vmem:[%s8054_s7 + $0x18] sm:$0xff] }
 0x306   : > { %2365 = vmatpush.msra.mxu0 %v6541_v36  ;;  %2483 = vmatpush.msra.mxu1 %v6519_v29  ;;  %v6621_v19 = vand.u32 4294901760, %v1896_v11 }
 0x307   : > { %2034 = vmatpush.msrb.mxu2 %v6531_v47  ;;  %2231 = vmatpush.msrb.mxu3 %v2230_v57  ;;  %v2048_v57 = vsub.f32 %v2046_v2, %v2047_v5 }
 0x308   : > { %2368 = vmatpush.msra.mxu0 %v6547_v4  ;;  %2485 = vmatpush.msra.mxu1 %v6531_v47 }
 0x309   : > { %2036 = vmatpush.msrb.mxu2 %v6549_v3  ;;  %2237 = vmatpush.msrb.mxu3 %v2236_v45  ;;  %v2254_v45 = vand.u32 4294901760, %v2253_v0  ;;  %v2049_v43 = vand.u32 4294901760, %v2048_v57  ;;  %v1904_v0 = vld [vmem:[%s8054_s7 + $0x58] sm:$0xff] }
 0x30a   : > { %2371 = vmatpush.msra.mxu0 %v6566_v13  ;;  %2487 = vmatpush.msra.mxu1 %v6549_v3 }
 0x30b   : > { %2042 = vmatmul.f32.vlgmr.msrb.gmra.mxu2 %v2041_v39  ;;  %2243 = vmatpush.msrb.mxu3 %v2242_v18  ;;  %v2055_v39 = vand.u32 4294901760, %v2054_v1 }
 0x30c   : > { %2588 = vmatpush.msra.mxu2 %v2168_v20  ;;  %2374 = vmatpush.msra.mxu0 %v6572_v17  ;;  %v6639_v20 = vand.u32 4294901760, %v1897_v38 }
 0x30d   : > { %2249 = vmatpush.msrb.mxu3 %v2248_v7  ;;  %2377 = vmatmul.f32.vlgmr.msra.gmra.mxu0 %v6527_v24  ;;  %v2056_v25 = vsub.f32 %v2054_v1, %v2055_v39  ;;  %v1905_v7 = vld [vmem:[%s8054_s7 + $0x60] sm:$0xff] }
 0x30e   : > { %2592 = vmatpush.msra.mxu2 %v2174_v48  ;;  %2491 = vmatmul.f32.vlgmr.msra.gmra.mxu1 %v2039_v46  ;;  %v2062_v48 = vsub.f32 %v1896_v11, %v6621_v19  ;;  %v6728_v11 = vand.u32 4294901760, %v1905_v7 }
 0x30f   : > { %2255 = vmatpush.msrb.mxu3 %v2254_v45 }
 0x310   : > { %2596 = vmatpush.msra.mxu2 %v2180_v40  ;;  %v2063_v52 = vand.u32 4294901760, %v2062_v48  ;;  %v6658_v40 = vand.u32 4294901760, %v1898_v50 }
 0x311   : > { %2261 = vmatpush.msrb.mxu3 %v2260_v58  ;;  %v2134_v58 = vsub.f32 %v1905_v7, %v6728_v11 }
 0x312   : > { %2600 = vmatpush.msra.mxu2 %v2186_v63  ;;  %2263 = vmatmul.f32.vlgmr.msrb.gmra.mxu3 %v6500_v21  ;;  %v1899_v63 = vld [vmem:[%s8054_s7 + $0x30] sm:$0xff] }
 0x313   : > { %2050 = vmatmul.f32.gmra.mxu2 %v2049_v43  ;;  %2715 = vmatpush.msra.mxu3 %v6399_v34  ;;  %v2057_v34 = vand.u32 4294901760, %v2056_v25  ;;  %v1906_v43 = vld [vmem:[%s8054_s7 + $0x68] sm:$0xff]  ;;  %v2135_v25 = vand.u32 4294901760, %v2134_v58 }
 0x314   : > { %2604 = vmatpush.msra.mxu2 %v2192_v54  ;;  %v6677_v54 = vand.u32 4294901760, %v1899_v63 }
 0x315   : > { %2717 = vmatpush.msra.mxu3 %v6378_v42  ;;  %2382 = vmatmul.f32.gmra.mxu0 %v2046_v2  ;;  %v2064_v42 = vsub.f32 %v2062_v48, %v2063_v52 }
 0x316   : > { %2608 = vmatpush.msra.mxu2 %v2198_v61  ;;  %2497 = vmatmul.f32.gmra.mxu1 %v2047_v5  ;;  %v2086_v23 = vsub.f32 %v1899_v63, %v6677_v54  ;;  %v1900_v61 = vld [vmem:[%s8054_s7 + $0x38] sm:$0xff] }
 0x317   : > { %2719 = vmatpush.msra.mxu3 %v6384_v15  ;;  %v2070_v15 = vsub.f32 %v1897_v38, %v6639_v20  ;;  %v6737_v38 = vpop.permute.xlu1 %2002 }
 0x318   : > { %2612 = vmatpush.msra.mxu2 %v2204_v6  ;;  %v2087_v9 = vand.u32 4294901760, %v2086_v23  ;;  %v6692_v6 = vand.u32 4294901760, %v1900_v61 }
 0x319   : > { %2721 = vmatpush.msra.mxu3 %v6393_v10  ;;  %v2065_v10 = vand.u32 4294901760, %v2064_v42  ;;  %v1907_v42 = vld [vmem:[%s8054_s7 + $0x70] sm:$0xff] }
 0x31a   : > { %2616 = vmatpush.msra.mxu2 %v2210_v27  ;;  %2267 = vmatmul.f32.gmra.mxu3 %v6557_v8  ;;  %v2088_v26 = vsub.f32 %v2086_v23, %v2087_v9  ;;  %v1901_v27 = vld [vmem:[%s8054_s7 + $0x40] sm:$0xff] }
 0x31b   : > { %2058 = vmatmul.f32.gmra.mxu2 %v2057_v34  ;;  %2723 = vmatpush.msra.mxu3 %v6404_v41  ;;  %v2071_v41 = vand.u32 4294901760, %v2070_v15  ;;  %v2136_v34 = vsub.f32 %v2134_v58, %v2135_v25 }
 0x31c   : > { %2620 = vmatpush.msra.mxu2 %v2216_v62  ;;  %v6700_v62 = vand.u32 4294901760, %v1901_v27 }
 0x31d   : > { %2725 = vmatpush.msra.mxu3 %v6417_v44  ;;  %2387 = vmatmul.f32.gmra.mxu0 %v2054_v1  ;;  %v2072_v44 = vsub.f32 %v2070_v15, %v2071_v41 }
 0x31e   : > { %2624 = vmatpush.msra.mxu2 %v2222_v28  ;;  %2503 = vmatmul.f32.gmra.mxu1 %v2055_v39  ;;  %v1902_v28 = vld [vmem:[%s8054_s7 + $0x48] sm:$0xff] }
 0x31f   : > { %2727 = vmatpush.msra.mxu3 %v6429_v53  ;;  %v2078_v53 = vsub.f32 %v1898_v50, %v6658_v40  ;;  %v6707_v36 = vand.u32 4294901760, %v1902_v28 }
 0x320   : > { %2628 = vmatpush.msra.mxu2 %v2228_v32 }
 0x321   : > { %2729 = vmatpush.msra.mxu3 %v6435_v16  ;;  %v8162_v16 = vand.u32 4294901760, %v6547_v4  ;;  %v2079_v14 = vand.u32 4294901760, %v2078_v53  ;;  %v2110_v4 = vsub.f32 %v1902_v28, %v6707_v36 }
 0x322   : > { %2632 = vmatpush.msra.mxu2 %v2234_v60  ;;  %2271 = vmatmul.f32.gmra.mxu3 %v6598_v55 }
 0x323   : > { %2066 = vmatmul.f32.gmra.mxu2 %v2065_v10  ;;  %2731 = vmatpush.msra.mxu3 %v6451_v33  ;;  %v2073_v33 = vand.u32 4294901760, %v2072_v44  ;;  %v2111_v46 = vand.u32 4294901760, %v2110_v4  ;;  %v6744_v10 = vand.u32 4294901760, %v1907_v42 }
 0x324   : > { %2636 = vmatpush.msra.mxu2 %v8161_v30  ;;  %v1908_v30 = vld [vmem:[%s8054_s7 + $0x78] sm:$0xff] }
 0x325   : > { %2733 = vmatpush.msra.mxu3 %v6463_v49  ;;  %2392 = vmatmul.f32.gmra.mxu0 %v2062_v48  ;;  %v2080_v49 = vsub.f32 %v2078_v53, %v2079_v14  ;;  %v2112_v1 = vsub.f32 %v2110_v4, %v2111_v46  ;;  %v6735_v48 = vand.u32 4294901760, %v1906_v43 }
 0x326   : > { %2640 = vmatpush.msra.mxu2 %v8162_v16  ;;  %2509 = vmatmul.f32.gmra.mxu1 %v2063_v52 }
 0x327   : > { %2735 = vmatpush.msra.mxu3 %v6475_v22  ;;  %v2081_v22 = vand.u32 4294901760, %v2080_v49  ;;  %v2113_v2 = vand.u32 4294901760, %v2112_v1  ;;  %v2142_v52 = vsub.f32 %v1906_v43, %v6735_v48 }
 0x328   : > { %2644 = vmatpush.msra.mxu2 %v2252_v37 }
 0x329   : > { %2737 = vmatpush.msra.mxu3 %v6493_v31  ;;  %v2094_v31 = vsub.f32 %v1900_v61, %v6692_v6  ;;  %v2143_v50 = vand.u32 4294901760, %v2142_v52 }
 0x32a   : > { %2648 = vmatpush.msra.mxu2 %v2258_v12  ;;  %2275 = vmatmul.f32.gmra.mxu3 %v6621_v19  ;;  %v6721_v12 = vand.u32 4294901760, %v1904_v0 }
 0x32b   : > { %2074 = vmatmul.f32.gmra.mxu2 %v2073_v33  ;;  %2739 = vmatpush.msra.mxu3 %v6504_v35  ;;  %v2089_v35 = vand.u32 4294901760, %v2088_v26  ;;  %v2095_v51 = vand.u32 4294901760, %v2094_v31  ;;  %v2144_v44 = vsub.f32 %v2142_v52, %v2143_v50  ;;  %v6753_v33 = vand.u32 4294901760, %v1908_v30  ;;  %v6762_v26 = vpop.permute.xlu2 %1997 }
 0x32c   : > { %v2126_v18 = vsub.f32 %v1904_v0, %v6721_v12 }
 0x32d   : > { %2741 = vmatpush.msra.mxu3 %v6519_v29  ;;  %2397 = vmatmul.f32.gmra.mxu0 %v2070_v15  ;;  %v2096_v56 = vsub.f32 %v2094_v31, %v2095_v51  ;;  %v2102_v29 = vsub.f32 %v1901_v27, %v6700_v62  ;;  %v2137_v15 = vand.u32 4294901760, %v2136_v34  ;;  %v2145_v63 = vand.u32 4294901760, %v2144_v44 }
 0x32e   : > { %2515 = vmatmul.f32.gmra.mxu1 %v2071_v41  ;;  %v2127_v57 = vand.u32 4294901760, %v2126_v18  ;;  %v6747_v41 = vpop.permute.xlu1 %1987 }
 0x32f   : > { %2743 = vmatpush.msra.mxu3 %v6531_v47  ;;  %v2097_v24 = vand.u32 4294901760, %v2096_v56  ;;  %v2103_v47 = vand.u32 4294901760, %v2102_v29 }
 0x330   : > { %v2128_v45 = vsub.f32 %v2126_v18, %v2127_v57 }
 0x331   : > { %2745 = vmatpush.msra.mxu3 %v6549_v3  ;;  %v2104_v32 = vsub.f32 %v2102_v29, %v2103_v47  ;;  %v1903_v3 = vld [vmem:[%s8054_s7 + $0x50] sm:$0xff] }
 0x332   : > { %2279 = vmatmul.f32.gmra.mxu3 %v6639_v20  ;;  %v6714_v13 = vand.u32 4294901760, %v1903_v3  ;;  %v2129_v39 = vand.u32 4294901760, %v2128_v45 }
 0x333   : > { %2082 = vmatmul.f32.gmra.mxu2 %v2081_v22  ;;  %v2105_v60 = vand.u32 4294901760, %v2104_v32  ;;  %v6767_v56 = vpop.permute.xlu2 %1982 }
 0x334   : > { %v2118_v17 = vsub.f32 %v1903_v3, %v6714_v13 }
 0x335   : > { %2402 = vmatmul.f32.gmra.mxu0 %v2078_v53  ;;  %v2150_v53 = vsub.f32 %v1907_v42, %v6744_v10 }
 0x336   : > { %2521 = vmatmul.f32.gmra.mxu1 %v2079_v14  ;;  %v2119_v37 = vand.u32 4294901760, %v2118_v17  ;;  %v6756_v14 = vpop.permute.xlu0 %1992  ;;  %v6759_v61 = vpop.permute.xlu1 %1972 }
 0x337   : > { %v2151_v16 = vand.u32 4294901760, %v2150_v53 }
 0x338   : > { %v2120_v5 = vsub.f32 %v2118_v17, %v2119_v37 }
 0x339   : > { %v2152_v49 = vsub.f32 %v2150_v53, %v2151_v16 }
 0x33a   : > { %2283 = vmatmul.f32.gmra.mxu3 %v6658_v40  ;;  %v2121_v59 = vand.u32 4294901760, %v2120_v5 }
 0x33b   : > { %2090 = vmatmul.f32.gmra.mxu2 %v2089_v35  ;;  %v2153_v22 = vand.u32 4294901760, %v2152_v49 }
 0x33d   : > { %2407 = vmatmul.f32.gmra.mxu0 %v2086_v23  ;;  %v2158_v23 = vsub.f32 %v1908_v30, %v6753_v33 }
 0x33e   : > { %2527 = vmatmul.f32.gmra.mxu1 %v2087_v9  ;;  %v6764_v27 = vpop.permute.xlu0 %1977  ;;  %v1958_v35 = vpop.permute.xlu1 %1957 }
 0x33f   : > { %v2159_v9 = vand.u32 4294901760, %v2158_v23 }
 0x342   : > { %2287 = vmatmul.f32.gmra.mxu3 %v6677_v54 }
 0x343   : > { %2098 = vmatmul.f32.gmra.mxu2 %v2097_v24 }
 0x345   : > { %2412 = vmatmul.f32.gmra.mxu0 %v2094_v31  ;;  %v2160_v31 = vsub.f32 %v2158_v23, %v2159_v9 }
 0x346   : > { %2533 = vmatmul.f32.gmra.mxu1 %v2095_v51  ;;  %v1943_v28 = vpop.permute.xlu1 %1942 }
 0x347   : > { %v2161_v51 = vand.u32 4294901760, %v2160_v31 }
 0x34a   : > { %2291 = vmatmul.f32.gmra.mxu3 %v6692_v6 }
 0x34b   : > { %2106 = vmatmul.f32.gmra.mxu2 %v2105_v60 }
 0x34d   : > { %2417 = vmatmul.f32.gmra.mxu0 %v2102_v29  ;;  %v1963_v29 = vpop.permute.xlu0 %1962 }
 0x34e   : > { %2539 = vmatmul.f32.gmra.mxu1 %v2103_v47  ;;  %v6771_v47 = vpop.permute.xlu2 %1967 }
 0x352   : > { %2295 = vmatmul.f32.gmra.mxu3 %v6700_v62 }
 0x353   : > { %2114 = vmatmul.f32.gmra.mxu2 %v2113_v2 }
 0x355   : > { %2422 = vmatmul.f32.gmra.mxu0 %v2110_v4  ;;  %v1948_v32 = vpop.permute.xlu0 %1947  ;;  %v1928_v4 = vpop.permute.xlu1 %1927 }
 0x356   : > { %2545 = vmatmul.f32.gmra.mxu1 %v2111_v46 }
 0x35a   : > { %2299 = vmatmul.f32.gmra.mxu3 %v6707_v36 }
 0x35b   : > { %2122 = vmatmul.f32.gmra.mxu2 %v2121_v59 }
 0x35d   : > { %2427 = vmatmul.f32.gmra.mxu0 %v2118_v17  ;;  %v1953_v17 = vpop.permute.xlu2 %1952  ;;  %v1933_v0 = vpop.permute.xlu0 %1932 }
 0x35e   : > { %2551 = vmatmul.f32.gmra.mxu1 %v2119_v37 }
 0x362   : > { %2303 = vmatmul.f32.gmra.mxu3 %v6714_v13 }
 0x363   : > { %2130 = vmatmul.f32.gmra.mxu2 %v2129_v39 }
 0x365   : > { %2432 = vmatmul.f32.gmra.mxu0 %v2126_v18 }
 0x366   : > { %2557 = vmatmul.f32.gmra.mxu1 %v2127_v57 }
 0x36a   : > { %2307 = vmatmul.f32.gmra.mxu3 %v6721_v12 }
 0x36b   : > { %2138 = vmatmul.f32.gmra.mxu2 %v2137_v15 }
 0x36d   : > { %2437 = vmatmul.f32.gmra.mxu0 %v2134_v58 }
 0x36e   : > { %2563 = vmatmul.f32.gmra.mxu1 %v2135_v25 }
 0x372   : > { %2311 = vmatmul.f32.gmra.mxu3 %v6728_v11 }
 0x373   : > { %2146 = vmatmul.f32.gmra.mxu2 %v2145_v63 }
 0x375   : > { %2442 = vmatmul.f32.gmra.mxu0 %v2142_v52 }
 0x376   : > { %2569 = vmatmul.f32.gmra.mxu1 %v2143_v50 }
 0x37a   : > { %2315 = vmatmul.f32.gmra.mxu3 %v6735_v48 }
 0x37b   : > { %2154 = vmatmul.f32.gmra.mxu2 %v2153_v22 }
 0x37d   : > { %2447 = vmatmul.f32.gmra.mxu0 %v2150_v53 }
 0x37e   : > { %2575 = vmatmul.f32.gmra.mxu1 %v2151_v16 }
 0x382   : > { %2319 = vmatmul.f32.gmra.mxu3 %v6744_v10 }
 0x383   : > { %2162 = vmatmul.f32.gmra.mxu2 %v2161_v51 }
 0x385   : > { %2452 = vmatmul.f32.gmra.mxu0 %v2158_v23 }
 0x386   : > { %2581 = vmatmul.f32.gmra.mxu1 %v2159_v9 }
 0x38a   : > { %2323 = vmatmul.f32.gmra.mxu3 %v6753_v33  ;;  %v6827_v31 = vpop.f32.mrf.mxu0 }
 0x38b   : > { %2650 = vmatmul.f32.vlgmr.msra.gmra.mxu2 %v6500_v21  ;;  %8167 = vst [vmem:[#allocation7_spill] sm:$0xff] %v6827_v31  ;;  %v6833_v51 = vpop.f32.mrf.mxu1 }
 0x38c   : > { %8168 = vst [vmem:[#allocation27_spill] sm:$0xff] %v6833_v51 }
 0x38e   : > { %v2043_v24 = vpop.f32.mrf.mxu2 }
 0x38f   : > { %v2044_v3 = vadd.f32 %v2043_v24, %v1928_v4 }
 0x392   : > { %2747 = vmatmul.f32.vlgmr.msra.gmra.mxu3 %v6500_v21  ;;  %v1938_v21 = vpop.permute.xlu2 %1937 }
 0x393   : > { %2654 = vmatmul.f32.gmra.mxu2 %v6557_v8 }
 0x395   : > { %v2264_v60 = vpop.f32.mrf.mxu3 }
 0x396   : > { %v2051_v46 = vpop.f32.mrf.mxu2  ;;  %v6775_v1 = vadd.f32 %v2264_v60, %v2044_v3 }
 0x397   : > { %v2052_v2 = vadd.f32 %v2051_v46, %v1933_v0 }
 0x398   : > { %8163 = vst [vmem:[#allocation31_spill] sm:$0xff] %v6775_v1 }
 0x39a   : > { %2751 = vmatmul.f32.gmra.mxu3 %v6557_v8 }
 0x39b   : > { %2658 = vmatmul.f32.gmra.mxu2 %v6598_v55 }
 0x39d   : > { %v2268_v37 = vpop.f32.mrf.mxu3 }
 0x39e   : > { %v2059_v5 = vpop.f32.mrf.mxu2  ;;  %v6779_v18 = vadd.f32 %v2268_v37, %v2052_v2 }
 0x39f   : > { %v2060_v7 = vadd.f32 %v2059_v5, %v1938_v21 }
 0x3a0   : > { %8164 = vst [vmem:[#allocation45_spill] sm:$0xff] %v6779_v18 }
 0x3a2   : > { %2755 = vmatmul.f32.gmra.mxu3 %v6598_v55 }
 0x3a3   : > { %2662 = vmatmul.f32.gmra.mxu2 %v6621_v19 }
 0x3a5   : > { %v2272_v59 = vpop.f32.mrf.mxu3 }
 0x3a6   : > { %v2067_v57 = vpop.f32.mrf.mxu2  ;;  %v6783_v45 = vadd.f32 %v2272_v59, %v2060_v7 }
 0x3a7   : > { %v2068_v8 = vadd.f32 %v2067_v57, %v1943_v28  ;;  %v6841_v28 = vpop.f32.mrf.mxu0 }
 0x3a8   : > { %8165 = vst [vmem:[#allocation40_spill] sm:$0xff] %v6783_v45 }
 0x3a9   : > { %8169 = vst [vmem:[#allocation37_spill] sm:$0xff] %v6841_v28 }
 0x3aa   : > { %2759 = vmatmul.f32.gmra.mxu3 %v6621_v19 }
 0x3ab   : > { %2666 = vmatmul.f32.gmra.mxu2 %v6639_v20 }
 0x3ad   : > { %v2276_v58 = vpop.f32.mrf.mxu3 }
 0x3ae   : > { %v2075_v43 = vpop.f32.mrf.mxu2  ;;  %v6787_v39 = vadd.f32 %v2276_v58, %v2068_v8 }
 0x3af   : > { %v2076_v55 = vadd.f32 %v2075_v43, %v1948_v32  ;;  %v6849_v4 = vpop.f32.mrf.mxu0 }
 0x3b0   : > { %8166 = vst [vmem:[#allocation48_spill] sm:$0xff] %v6787_v39 }
 0x3b1   : > { %8171 = vst [vmem:[#allocation23_spill] sm:$0xff] %v6849_v4 }
 0x3b2   : > { %2763 = vmatmul.f32.gmra.mxu3 %v6639_v20 }
 0x3b3   : > { %2670 = vmatmul.f32.gmra.mxu2 %v6658_v40 }
 0x3b5   : > { %v2280_v25 = vpop.f32.mrf.mxu3 }
 0x3b6   : > { %v2083_v34 = vpop.f32.mrf.mxu2  ;;  %v6791_v52 = vadd.f32 %v2280_v25, %v2076_v55 }
 0x3b7   : > { %v2084_v19 = vadd.f32 %v2083_v34, %v1953_v17 }
 0x3ba   : > { %2767 = vmatmul.f32.gmra.mxu3 %v6658_v40 }
 0x3bb   : > { %2674 = vmatmul.f32.gmra.mxu2 %v6677_v54 }
 0x3bd   : > { %v2284_v42 = vpop.f32.mrf.mxu3 }
 0x3be   : > { %v2091_v15 = vpop.f32.mrf.mxu2  ;;  %v6795_v50 = vadd.f32 %v2284_v42, %v2084_v19 }
 0x3bf   : > { %v2092_v20 = vadd.f32 %v2091_v15, %v1958_v35 }
 0x3c2   : > { %2771 = vmatmul.f32.gmra.mxu3 %v6677_v54 }
 0x3c3   : > { %2678 = vmatmul.f32.gmra.mxu2 %v6692_v6 }
 0x3c5   : > { %v2288_v44 = vpop.f32.mrf.mxu3 }
 0x3c6   : > { %v2099_v53 = vpop.f32.mrf.mxu2  ;;  %v6799_v30 = vadd.f32 %v2288_v44, %v2092_v20 }
 0x3c7   : > { %v2100_v40 = vadd.f32 %v2099_v53, %v1963_v29 }
 0x3ca   : > { %2775 = vmatmul.f32.gmra.mxu3 %v6692_v6 }
 0x3cb   : > { %2682 = vmatmul.f32.gmra.mxu2 %v6700_v62 }
 0x3cd   : > { %v2292_v63 = vpop.f32.mrf.mxu3 }
 0x3ce   : > { %v6803_v16 = vpop.f32.mrf.mxu2  ;;  %v6805_v49 = vadd.f32 %v2292_v63, %v2100_v40 }
 0x3d2   : > { %2779 = vmatmul.f32.gmra.mxu3 %v6700_v62 }
 0x3d3   : > { %2686 = vmatmul.f32.gmra.mxu2 %v6707_v36 }
 0x3d5   : > { %v6809_v54 = vpop.f32.mrf.mxu3 }
 0x3d6   : > { %v6811_v23 = vpop.f32.mrf.mxu2 }
 0x3da   : > { %2783 = vmatmul.f32.gmra.mxu3 %v6707_v36 }
 0x3db   : > { %2690 = vmatmul.f32.gmra.mxu2 %v6714_v13 }
 0x3dd   : > { %v6815_v6 = vpop.f32.mrf.mxu3 }
 0x3de   : > { %v6817_v22 = vpop.f32.mrf.mxu2 }
 0x3e2   : > { %2787 = vmatmul.f32.gmra.mxu3 %v6714_v13 }
 0x3e3   : > { %2694 = vmatmul.f32.gmra.mxu2 %v6721_v12 }
 0x3e5   : > { %v6821_v9 = vpop.f32.mrf.mxu3 }
 0x3e6   : > { %v6823_v62 = vpop.f32.mrf.mxu2 }
 0x3ea   : > { %2791 = vmatmul.f32.gmra.mxu3 %v6721_v12  ;;  %v6844_v12 = vpop.f32.mrf.mxu1 }
 0x3eb   : > { %2698 = vmatmul.f32.gmra.mxu2 %v6728_v11  ;;  %8170 = vst [vmem:[#allocation47_spill] sm:$0xff] %v6844_v12 }
 0x3ed   : > { %v6829_v36 = vpop.f32.mrf.mxu3 }
 0x3ee   : > { %v6831_v35 = vpop.f32.mrf.mxu2 }
 0x3f2   : > { %2795 = vmatmul.f32.gmra.mxu3 %v6728_v11  ;;  %v6853_v11 = vpop.f32.mrf.mxu1 }
 0x3f3   : > { %2702 = vmatmul.f32.gmra.mxu2 %v6735_v48  ;;  %8172 = vst [vmem:[#allocation43_spill] sm:$0xff] %v6853_v11 }
 0x3f5   : > { %v6837_v13 = vpop.f32.mrf.mxu3 }
 0x3f6   : > { %v6839_v29 = vpop.f32.mrf.mxu2 }
 0x3f7   : > { %v2148_v45 = vadd.f32 %v6839_v29, %v6756_v14 }
 0x3fa   : > { %2799 = vmatmul.f32.gmra.mxu3 %v6735_v48  ;;  %v6858_v48 = vpop.f32.mrf.mxu0  ;;  %v6864_v0 = vpop.f32.mrf.mxu1 }
 0x3fb   : > { %2706 = vmatmul.f32.gmra.mxu2 %v6744_v10  ;;  %8173 = vst [vmem:[#allocation3_spill] sm:$0xff] %v6858_v48 }
 0x3fc   : > { %8175 = vst [vmem:[#allocation34_spill] sm:$0xff] %v6864_v0 }
 0x3fd   : > { %v6847_v24 = vpop.f32.mrf.mxu3 }
 0x3fe   : > { %v2155_v32 = vpop.f32.mrf.mxu2  ;;  %v2317_v48 = vadd.f32 %v6847_v24, %v2148_v45 }
 0x402   : > { %2803 = vmatmul.f32.gmra.mxu3 %v6744_v10  ;;  %v6866_v2 = vpop.f32.mrf.mxu0  ;;  %v6872_v5 = vpop.f32.mrf.mxu1 }
 0x403   : > { %2710 = vmatmul.f32.gmra.mxu2 %v6753_v33  ;;  %8178 = vst [vmem:[#allocation46_spill] sm:$0xff] %v6872_v5 }
 0x405   : > { %v2320_v3 = vpop.f32.mrf.mxu3 }
 0x406   : > { %v6855_v60 = vpop.f32.mrf.mxu2 }
 0x40a   : > { %2807 = vmatmul.f32.gmra.mxu3 %v6753_v33  ;;  %v6878_v33 = vpop.f32.mrf.mxu0  ;;  %v6880_v59 = vpop.f32.mrf.mxu1 }
 0x40b   : > { %8181 = vst [vmem:[#allocation44_spill] sm:$0xff] %v6880_v59  ;;  %v2140_v59 = vadd.f32 %v6831_v35, %v6747_v41  ;;  %v2116_v41 = vadd.f32 %v6811_v23, %v6759_v61 }
 0x40d   : > { %v6860_v46 = vpop.f32.mrf.mxu3 }
 0x40e   : > { %v6862_v17 = vpop.f32.mrf.mxu2 }
 0x40f   : > { %8174 = vst [vmem:[#allocation6_spill] sm:$0xff] %v6862_v17 }
 0x412   : > { %v6886_v58 = vpop.f32.mrf.mxu0  ;;  %v6888_v43 = vpop.f32.mrf.mxu1 }
 0x413   : > { %8184 = vst [vmem:[#allocation24_spill] sm:$0xff] %v6888_v43  ;;  %v2124_v43 = vadd.f32 %v6817_v22, %v6764_v27  ;;  %v2301_v27 = vadd.f32 %v6815_v6, %v2116_v41 }
 0x415   : > { %v6868_v10 = vpop.f32.mrf.mxu3  ;;  %v2305_v45 = vadd.f32 %v6821_v9, %v2124_v43 }
 0x416   : > { %8176 = vst [vmem:[#allocation41_spill] sm:$0xff] %v6868_v10  ;;  %v6870_v37 = vpop.f32.mrf.mxu2 }
 0x417   : > { %8177 = vst [vmem:[#allocation17_spill] sm:$0xff] %v6870_v37 }
 0x41a   : > { %v6894_v34 = vpop.f32.mrf.mxu0  ;;  %v6900_v15 = vpop.f32.mrf.mxu1 }
 0x41d   : > { %v6874_v21 = vpop.f32.mrf.mxu3 }
 0x41e   : > { %8179 = vst [vmem:[#allocation28_spill] sm:$0xff] %v6874_v21  ;;  %v6876_v7 = vpop.f32.mrf.mxu2 }
 0x41f   : > { %8180 = vst [vmem:[#allocation38_spill] sm:$0xff] %v6876_v7 }
 0x422   : > { %v6902_v20 = vpop.f32.mrf.mxu0  ;;  %v6908_v40 = vpop.f32.mrf.mxu1 }
 0x425   : > { %v6882_v57 = vpop.f32.mrf.mxu3 }
 0x426   : > { %8182 = vst [vmem:[#allocation5_spill] sm:$0xff] %v6882_v57  ;;  %v6884_v8 = vpop.f32.mrf.mxu2 }
 0x427   : > { %8183 = vst [vmem:[#allocation14_spill] sm:$0xff] %v6884_v8 }
 0x42a   : > { %v2423_v21 = vpop.f32.mrf.mxu0  ;;  %v6914_v17 = vpop.f32.mrf.mxu1 }
 0x42d   : > { %v6890_v55 = vpop.f32.mrf.mxu3 }
 0x42e   : > { %8185 = vst [vmem:[#allocation4_spill] sm:$0xff] %v6890_v55  ;;  %v6892_v25 = vpop.f32.mrf.mxu2 }
 0x42f   : > { %8186 = vst [vmem:[#allocation35_spill] sm:$0xff] %v6892_v25 }
 0x432   : > { %v2428_v51 = vpop.f32.mrf.mxu0  ;;  %v2552_v55 = vpop.f32.mrf.mxu1 }
 0x433   : > { %v2429_v61 = vadd.f32 %v2428_v51, %v2305_v45 }
 0x435   : > { %v6896_v19 = vpop.f32.mrf.mxu3 }
 0x436   : > { %8187 = vst [vmem:[#allocation42_spill] sm:$0xff] %v6896_v19  ;;  %v6898_v42 = vpop.f32.mrf.mxu2 }
 0x437   : > { %8188 = vst [vmem:[#allocation12_spill] sm:$0xff] %v6898_v42 }
 0x43a   : > { %v2433_v19 = vpop.f32.mrf.mxu0  ;;  %v2558_v31 = vpop.f32.mrf.mxu1 }
 0x43d   : > { %v6904_v44 = vpop.f32.mrf.mxu3 }
 0x43e   : > { %8189 = vst [vmem:[#allocation20_spill] sm:$0xff] %v6904_v44  ;;  %v6906_v53 = vpop.f32.mrf.mxu2 }
 0x43f   : > { %8190 = vst [vmem:[#allocation32_spill] sm:$0xff] %v6906_v53 }
 0x442   : > { %v2438_v1 = vpop.f32.mrf.mxu0  ;;  %v2564_v0 = vpop.f32.mrf.mxu1 }
 0x445   : > { %v6910_v63 = vpop.f32.mrf.mxu3 }
 0x446   : > { %8191 = vst [vmem:[#allocation39_spill] sm:$0xff] %v6910_v63  ;;  %v6912_v10 = vpop.f32.mrf.mxu2 }
 0x447   : > { %8192 = vst [vmem:[#allocation10_spill] sm:$0xff] %v6912_v10  ;;  %v2313_v10 = vadd.f32 %v6837_v13, %v2140_v59 }
 0x449   : > { %v2439_v24 = vadd.f32 %v2438_v1, %v2313_v10  ;;  %v2424_v10 = vadd.f32 %v2423_v21, %v2301_v27  ;;  %v8207_v27 = vld [vmem:[#allocation46_spill] sm:$0xff] }
 0x44a   : > { %v2443_v63 = vpop.f32.mrf.mxu0  ;;  %v2570_v42 = vpop.f32.mrf.mxu1 }
 0x44b   : > { %v2565_v9 = vadd.f32 %v2564_v0, %v2439_v24  ;;  %v2547_v0 = vadd.f32 %v6914_v17, %v2424_v10  ;;  %v8205_v24 = vld [vmem:[#allocation40_spill] sm:$0xff]  ;;  %v8212_v10 = vld [vmem:[#allocation34_spill] sm:$0xff] }
 0x44d   : > { %v6916_v57 = vpop.f32.mrf.mxu3 }
 0x44e   : > { %8193 = vst [vmem:[#allocation16_spill] sm:$0xff] %v6916_v57  ;;  %v6918_v37 = vpop.f32.mrf.mxu2  ;;  %v2156_v57 = vadd.f32 %v2155_v32, %v6762_v26  ;;  %v2444_v26 = vadd.f32 %v2443_v63, %v2317_v48 }
 0x450   : > { %v2321_v39 = vadd.f32 %v2320_v3, %v2156_v57  ;;  %v2553_v57 = vadd.f32 %v2552_v55, %v2429_v61 }
 0x452   : > { %v2448_v53 = vpop.f32.mrf.mxu0  ;;  %v2576_v14 = vpop.f32.mrf.mxu1 }
 0x453   : > { %v2449_v32 = vadd.f32 %v2448_v53, %v2321_v39 }
 0x455   : > { %v6920_v7 = vpop.f32.mrf.mxu3  ;;  %v2577_v13 = vadd.f32 %v2576_v14, %v2449_v32  ;;  %v8201_v14 = vld [vmem:[#allocation3_spill] sm:$0xff]  ;;  %v8203_v32 = vld [vmem:[#allocation32_spill] sm:$0xff] }
 0x456   : > { %8194 = vst [vmem:[#allocation29_spill] sm:$0xff] %v6920_v7  ;;  %v6922_v12 = vpop.f32.mrf.mxu2  ;;  %v2132_v7 = vadd.f32 %v6823_v62, %v6767_v56  ;;  %v2164_v56 = vadd.f32 %v6855_v60, %v6737_v38  ;;  %v2108_v62 = vadd.f32 %v6803_v16, %v6771_v47 }
 0x458   : > { %v2325_v39 = vadd.f32 %v6860_v46, %v2164_v56  ;;  %v2297_v3 = vadd.f32 %v6809_v54, %v2108_v62  ;;  %v2414_v54 = vadd.f32 %v6894_v34, %v6805_v49  ;;  %v8206_v56 = vld [vmem:[#allocation23_spill] sm:$0xff] }
 0x459   : > { %v2389_v62 = vadd.f32 %v8206_v56, %v8205_v24 }
 0x45a   : > { %v2453_v23 = vpop.f32.mrf.mxu0  ;;  %v2419_v6 = vadd.f32 %v6902_v20, %v2297_v3 }
 0x45b   : > { %v2454_v60 = vadd.f32 %v2453_v23, %v2325_v39  ;;  %v8209_v39 = vld [vmem:[#allocation39_spill] sm:$0xff] }
 0x45d   : > { %v6924_v8 = vpop.f32.mrf.mxu3 }
 0x45e   : > { %8195 = vst [vmem:[#allocation36_spill] sm:$0xff] %v6924_v8  ;;  %v2691_v11 = vpop.f32.mrf.mxu2  ;;  %v2309_v8 = vadd.f32 %v6829_v36, %v2132_v7  ;;  %v2571_v36 = vadd.f32 %v2570_v42, %v2444_v26  ;;  %v2399_v42 = vadd.f32 %v6866_v2, %v6791_v52  ;;  %v8204_v2 = vld [vmem:[#allocation16_spill] sm:$0xff] }
 0x45f   : > { %v2692_v51 = vadd.f32 %v2691_v11, %v2553_v57  ;;  %v2535_v11 = vadd.f32 %v6900_v15, %v2414_v54  ;;  %v8200_v15 = vld [vmem:[#allocation48_spill] sm:$0xff] }
 0x460   : > { %v2434_v22 = vadd.f32 %v2433_v19, %v2309_v8  ;;  %v2582_v8 = vpop.f32.mrf.mxu1  ;;  %v2541_v19 = vadd.f32 %v6908_v40, %v2419_v6 }
 0x462   : > { %v2559_v7 = vadd.f32 %v2558_v31, %v2434_v22  ;;  %v2583_v31 = vadd.f32 %v2582_v8, %v2454_v60  ;;  %v2684_v17 = vadd.f32 %v6918_v37, %v2541_v19  ;;  %v2394_v37 = vadd.f32 %v8201_v14, %v8200_v15 }
 0x463   : > { %v2517_v22 = vadd.f32 %v8207_v27, %v2399_v42 }
 0x465   : > { %v2788_v44 = vpop.f32.mrf.mxu3 }
 0x466   : > { %v2695_v25 = vpop.f32.mrf.mxu2  ;;  %v2789_v55 = vadd.f32 %v2788_v44, %v2692_v51  ;;  %v8197_v44 = vld [vmem:[#allocation24_spill] sm:$0xff]  ;;  %v8217_v51 = vld [vmem:[#allocation43_spill] sm:$0xff] }
 0x467   : > { %v2696_v43 = vadd.f32 %v2695_v25, %v2559_v7  ;;  %v2688_v25 = vadd.f32 %v6922_v12, %v2547_v0  ;;  %v8199_v12 = vld [vmem:[#allocation29_spill] sm:$0xff]  ;;  %v2511_v7 = vadd.f32 %v8212_v10, %v2394_v37  ;;  %v8218_v0 = vld [vmem:[#allocation14_spill] sm:$0xff] }
 0x468   : > { %v2781_v40 = vadd.f32 %v8199_v12, %v2684_v17  ;;  %v8221_v17 = vld [vmem:[#allocation38_spill] sm:$0xff]  ;;  %v8224_v12 = vld [vmem:[#allocation17_spill] sm:$0xff] }
 0x46d   : > { %v2792_v28 = vpop.f32.mrf.mxu3 }
 0x46e   : > { %v2699_v18 = vpop.f32.mrf.mxu2  ;;  %v2793_v21 = vadd.f32 %v2792_v28, %v2696_v43  ;;  %v8215_v43 = vld [vmem:[#allocation31_spill] sm:$0xff] }
 0x46f   : > { %v2700_v59 = vadd.f32 %v2699_v18, %v2565_v9  ;;  %v2409_v18 = vadd.f32 %v6886_v58, %v6799_v30  ;;  %v8196_v30 = vld [vmem:[#allocation36_spill] sm:$0xff]  ;;  %v8210_v9 = vld [vmem:[#allocation45_spill] sm:$0xff] }
 0x470   : > { %v2785_v58 = vadd.f32 %v8196_v30, %v2688_v25 }
 0x471   : > { %v2529_v53 = vadd.f32 %v8197_v44, %v2409_v18 }
 0x473   : > { %v2676_v52 = vadd.f32 %v8203_v32, %v2529_v53 }
 0x475   : > { %v2796_v5 = vpop.f32.mrf.mxu3  ;;  %v2773_v3 = vadd.f32 %v8209_v39, %v2676_v52  ;;  %v8226_v52 = vld [vmem:[#allocation6_spill] sm:$0xff]  ;;  %v8228_v39 = vld [vmem:[#allocation41_spill] sm:$0xff] }
 0x476   : > { %v2703_v4 = vpop.f32.mrf.mxu2  ;;  %v2797_v46 = vadd.f32 %v2796_v5, %v2700_v59  ;;  %v2404_v5 = vadd.f32 %v6878_v33, %v6795_v50  ;;  %v8198_v50 = vld [vmem:[#allocation10_spill] sm:$0xff]  ;;  %v8214_v59 = vld [vmem:[#allocation20_spill] sm:$0xff] }
 0x477   : > { %v2704_v48 = vadd.f32 %v2703_v4, %v2571_v36  ;;  %v2680_v33 = vadd.f32 %v8198_v50, %v2535_v11  ;;  %v8208_v36 = vld [vmem:[#allocation12_spill] sm:$0xff]  ;;  %v8223_v50 = vld [vmem:[#allocation27_spill] sm:$0xff] }
 0x479   : > { %v2777_v41 = vadd.f32 %v8204_v2, %v2680_v33 }
 0x47d   : > { %v2800_v29 = vpop.f32.mrf.mxu3 }
 0x47e   : > { %v2707_v35 = vpop.f32.mrf.mxu2  ;;  %v2801_v47 = vadd.f32 %v2800_v29, %v2704_v48  ;;  %v8202_v29 = vld [vmem:[#allocation44_spill] sm:$0xff]  ;;  %v8211_v48 = vld [vmem:[#allocation37_spill] sm:$0xff] }
 0x47f   : > { %v2708_v1 = vadd.f32 %v2707_v35, %v2577_v13  ;;  %v2523_v26 = vadd.f32 %v8202_v29, %v2404_v5 }
 0x481   : > { %v2672_v13 = vadd.f32 %v8208_v36, %v2523_v26 }
 0x485   : > { %v2804_v38 = vpop.f32.mrf.mxu3 }
 0x486   : > { %v2805_v16 = vadd.f32 %v2804_v38, %v2708_v1  ;;  %v2711_v4 = vpop.f32.mrf.mxu2  ;;  %v2384_v1 = vadd.f32 %v8211_v48, %v8210_v9  ;;  %v8213_v38 = vld [vmem:[#allocation35_spill] sm:$0xff] }
 0x487   : > { %v2712_v49 = vadd.f32 %v2711_v4, %v2583_v31  ;;  %v2668_v60 = vadd.f32 %v8213_v38, %v2517_v22  ;;  %v2505_v4 = vadd.f32 %v8217_v51, %v2389_v62  ;;  %v2664_v31 = vadd.f32 %v8218_v0, %v2511_v7 }
 0x488   : > { %5028 = vtanh.f32 %v2805_v16 }
 0x489   : > { %5030 = vtanh.f32 %v2801_v47  ;;  %v2769_v47 = vadd.f32 %v8214_v59, %v2672_v13 }
 0x48a   : > { %5032 = vtanh.f32 %v2797_v46  ;;  %v8216_v46 = vld [vmem:[#allocation7_spill] sm:$0xff] }
 0x48b   : > { %5034 = vtanh.f32 %v2793_v21  ;;  %v2379_v54 = vadd.f32 %v8216_v46, %v8215_v43  ;;  %v8219_v21 = vld [vmem:[#allocation42_spill] sm:$0xff] }
 0x48c   : > { %5036 = vtanh.f32 %v2789_v55  ;;  %v2765_v18 = vadd.f32 %v8219_v21, %v2668_v60  ;;  %v2827_v46 = vld [vmem:[%s8056_s9] sm:$0xff] }
 0x48d   : > { %v2808_v34 = vpop.f32.mrf.mxu3  ;;  %v2493_v33 = vadd.f32 %v8223_v50, %v2379_v54 }
 0x48e   : > { %v5029_v28 = vpop.eup %5028  ;;  %v2809_v20 = vadd.f32 %v2808_v34, %v2712_v49  ;;  %v8220_v49 = vld [vmem:[#allocation47_spill] sm:$0xff]  ;;  %v2660_v34 = vadd.f32 %v8221_v17, %v2505_v4  ;;  %v7096_v17 = vand.u32 4294901760, %v2827_v46 }
 0x48f   : > { %v5031_v63 = vpop.eup %5030  ;;  %v6971_v45 = vand.u32 4294901760, %v5029_v28  ;;  %v2499_v11 = vadd.f32 %v8220_v49, %v2384_v1  ;;  %v2652_v2 = vadd.f32 %v8226_v52, %v2493_v33 }
 0x490   : > { %5038 = vtanh.f32 %v2809_v20  ;;  %v5033_v35 = vpop.eup %5032  ;;  %v6978_v61 = vand.u32 4294901760, %v5031_v63 }
 0x491   : > { %5040 = vtanh.f32 %v2785_v58  ;;  %v5035_v23 = vpop.eup %5034  ;;  %v6986_v6 = vsub.f32 %v5029_v28, %v6971_v45  ;;  %v6988_v57 = vand.u32 4294901760, %v5033_v35  ;;  %v8222_v28 = vld [vmem:[#allocation4_spill] sm:$0xff] }
 0x492   : > { %5042 = vtanh.f32 %v2781_v40  ;;  %v5037_v16 = vpop.eup %5036  ;;  %v6998_v55 = vsub.f32 %v5031_v63, %v6978_v61  ;;  %v7000_v5 = vand.u32 4294901760, %v5035_v23  ;;  %v2761_v42 = vadd.f32 %v8222_v28, %v2664_v31  ;;  %v8225_v63 = vld [vmem:[#allocation5_spill] sm:$0xff] }
 0x493   : > { %5044 = vtanh.f32 %v2777_v41  ;;  %v7011_v20 = vsub.f32 %v5033_v35, %v6988_v57  ;;  %v7013_v44 = vand.u32 4294901760, %v5037_v16  ;;  %v3108_v53 = vand.u32 4294901760, %v6986_v6  ;;  %v8227_v41 = vld [vmem:[#allocation28_spill] sm:$0xff] }
 0x494   : > { %5046 = vtanh.f32 %v2773_v3  ;;  %v2656_v40 = vadd.f32 %v8224_v12, %v2499_v11  ;;  %v2757_v15 = vadd.f32 %v8225_v63, %v2660_v34  ;;  %v7023_v29 = vsub.f32 %v5035_v23, %v7000_v5 }
 0x495   : > { %5048 = vtanh.f32 %v2769_v47  ;;  %v3114_v32 = vand.u32 4294901760, %v6998_v55  ;;  %v3109_v27 = vsub.f32 %v6986_v6, %v3108_v53  ;;  %v7042_v22 = vsub.f32 %v5037_v16, %v7013_v44 }
 0x496   : > { %v5039_v8 = vpop.eup %5038  ;;  %5050 = vtanh.f32 %v2765_v18  ;;  %v2753_v35 = vadd.f32 %v8227_v41, %v2656_v40  ;;  %v3120_v36 = vand.u32 4294901760, %v7011_v20  ;;  %v2749_v3 = vadd.f32 %v8228_v39, %v2652_v2 }
 0x497   : > { %v6995_v19 = vand.u32 4294901760, %v5039_v8  ;;  %v5041_v25 = vpop.eup %5040  ;;  %5052 = vtanh.f32 %v2761_v42  ;;  %v3115_v48 = vsub.f32 %v6998_v55, %v3114_v32  ;;  %v3126_v10 = vand.u32 4294901760, %v7023_v29 }
 0x498   : > { %v5043_v30 = vpop.eup %5042  ;;  %v7025_v26 = vand.u32 4294901760, %v5041_v25  ;;  %5054 = vtanh.f32 %v2757_v15  ;;  %v3110_v60 = vand.u32 4294901760, %v3109_v27  ;;  %v3121_v59 = vsub.f32 %v7011_v20, %v3120_v36 }
 0x499   : > { %2940 = vmatpush.msrb.mxu0 %v6995_v19  ;;  %3391 = vmatpush.msrb.mxu3 %v6995_v19  ;;  %v7008_v58 = vsub.f32 %v5039_v8, %v6995_v19  ;;  %v5045_v14 = vpop.eup %5044  ;;  %v7031_v24 = vand.u32 4294901760, %v5043_v30  ;;  %5056 = vtanh.f32 %v2753_v35  ;;  %v3132_v16 = vand.u32 4294901760, %v7042_v22  ;;  %v2828_v35 = vld [vmem:[%s8056_s9 + $0x8] sm:$0xff] }
 0x49a   : > { %v5047_v56 = vpop.eup %5046  ;;  %v7047_v23 = vand.u32 4294901760, %v5045_v14  ;;  %v7055_v1 = vsub.f32 %v5041_v25, %v7025_v26  ;;  %5058 = vtanh.f32 %v2749_v3  ;;  %v3116_v54 = vand.u32 4294901760, %v3115_v48 }
 0x49b   : > { %2942 = vmatpush.msrb.mxu0 %v6971_v45  ;;  %3263 = vmatpush.msrb.mxu2 %v7008_v58  ;;  %v3102_v37 = vand.u32 4294901760, %v7008_v58  ;;  %v5049_v13 = vpop.eup %5048  ;;  %v7059_v38 = vand.u32 4294901760, %v5047_v56  ;;  %v7066_v47 = vsub.f32 %v5043_v30, %v7031_v24  ;;  %v3127_v51 = vsub.f32 %v7023_v29, %v3126_v10 }
 0x49c   : > { %3393 = vmatpush.msrb.mxu3 %v6971_v45  ;;  %v5051_v7 = vpop.eup %5050  ;;  %v7071_v43 = vand.u32 4294901760, %v5049_v13  ;;  %v7081_v4 = vsub.f32 %v5045_v14, %v7047_v23  ;;  %v3138_v0 = vand.u32 4294901760, %v7055_v1  ;;  %v3122_v25 = vand.u32 4294901760, %v3121_v59 }
 0x49d   : > { %2944 = vmatpush.msrb.mxu0 %v6978_v61  ;;  %3266 = vmatpush.msrb.mxu2 %v6986_v6  ;;  %v3103_v62 = vsub.f32 %v7008_v58, %v3102_v37  ;;  %v5053_v8 = vpop.eup %5052  ;;  %v7087_v21 = vsub.f32 %v5047_v56, %v7059_v38  ;;  %v7089_v18 = vand.u32 4294901760, %v5051_v7  ;;  %v3133_v49 = vsub.f32 %v7042_v22, %v3132_v16 }
 0x49e   : > { %3395 = vmatpush.msrb.mxu3 %v6978_v61  ;;  %v5055_v31 = vpop.eup %5054  ;;  %v3144_v11 = vand.u32 4294901760, %v7066_v47  ;;  %v7100_v28 = vand.u32 4294901760, %v5053_v8  ;;  %v3128_v42 = vand.u32 4294901760, %v3127_v51  ;;  %v3139_v30 = vsub.f32 %v7055_v1, %v3138_v0 }
 0x49f   : > { %2946 = vmatpush.msrb.mxu0 %v6988_v57  ;;  %3269 = vmatpush.msrb.mxu2 %v6998_v55  ;;  %v3104_v9 = vand.u32 4294901760, %v3103_v62  ;;  %v5057_v34 = vpop.eup %5056  ;;  %v7107_v50 = vsub.f32 %v5049_v13, %v7071_v43  ;;  %v3150_v33 = vand.u32 4294901760, %v7081_v4  ;;  %v7113_v40 = vsub.f32 %v5051_v7, %v7089_v18  ;;  %v2831_v55 = vld [vmem:[%s8056_s9 + $0x20] sm:$0xff] }
 0x4a0   : > { %3397 = vmatpush.msrb.mxu3 %v6988_v57  ;;  %v5059_v12 = vpop.eup %5058  ;;  %v7115_v63 = vand.u32 4294901760, %v5055_v31  ;;  %v3134_v15 = vand.u32 4294901760, %v3133_v49  ;;  %v3145_v14 = vsub.f32 %v7066_v47, %v3144_v11  ;;  %v3156_v52 = vand.u32 4294901760, %v7087_v21 }
 0x4a1   : > { %2948 = vmatpush.msrb.mxu0 %v7000_v5  ;;  %3105 = vmatpush.msrb.mxu1 %v3104_v9  ;;  %v7123_v2 = vsub.f32 %v2827_v46, %v7096_v17  ;;  %v7127_v41 = vand.u32 4294901760, %v5057_v34  ;;  %v3140_v56 = vand.u32 4294901760, %v3139_v30  ;;  %v3151_v62 = vsub.f32 %v7081_v4, %v3150_v33 }
 0x4a2   : > { %3272 = vmatpush.msrb.mxu2 %v7011_v20  ;;  %3399 = vmatpush.msrb.mxu3 %v7000_v5  ;;  %v7137_v27 = vsub.f32 %v5053_v8, %v7100_v28  ;;  %v3162_v13 = vand.u32 4294901760, %v7107_v50  ;;  %v7143_v39 = vsub.f32 %v5055_v31, %v7115_v63  ;;  %v7145_v3 = vand.u32 4294901760, %v5059_v12 }
 0x4a3   : > { %2950 = vmatpush.msrb.mxu0 %v7013_v44  ;;  %3111 = vmatpush.msrb.mxu1 %v3110_v60  ;;  %v3168_v9 = vand.u32 4294901760, %v7113_v40  ;;  %v3146_v48 = vand.u32 4294901760, %v3145_v14  ;;  %v3157_v7 = vsub.f32 %v7087_v21, %v3156_v52  ;;  %v2973_v60 = vand.u32 4294901760, %v7123_v2 }
 0x4a4   : > { %3275 = vmatpush.msrb.mxu2 %v7023_v29  ;;  %3401 = vmatpush.msrb.mxu3 %v7013_v44  ;;  %v7153_v59 = vand.u32 4294901760, %v2828_v35  ;;  %v3152_v8 = vand.u32 4294901760, %v3151_v62  ;;  %v3163_v46 = vsub.f32 %v7107_v50, %v3162_v13  ;;  %v8066_v51 = vand.u32 4294901760, %v7137_v27  ;;  %v2832_v29 = vld [vmem:[%s8056_s9 + $0x28] sm:$0xff] }
 0x4a5   : > { %2952 = vmatpush.msrb.mxu0 %v7025_v26  ;;  %3117 = vmatpush.msrb.mxu1 %v3116_v54  ;;  %v7162_v54 = vsub.f32 %v5057_v34, %v7127_v41  ;;  %v7168_v31 = vsub.f32 %v5059_v12, %v7145_v3  ;;  %v3158_v49 = vand.u32 4294901760, %v3157_v7  ;;  %v3169_v34 = vsub.f32 %v7113_v40, %v3168_v9  ;;  %v2829_v12 = vld [vmem:[%s8056_s9 + $0x10] sm:$0xff] }
 0x4a6   : > { %3278 = vmatpush.msrb.mxu2 %v7042_v22  ;;  %3403 = vmatpush.msrb.mxu3 %v7025_v26  ;;  %v2980_v30 = vsub.f32 %v2828_v35, %v7153_v59  ;;  %v3175_v14 = vsub.f32 %v7137_v27, %v8066_v51  ;;  %v8229_v22 = vand.u32 4294901760, %v7137_v27 }
 0x4a7   : > { %2954 = vmatpush.msrb.mxu0 %v7031_v24  ;;  %3123 = vmatpush.msrb.mxu1 %v3122_v25  ;;  %v8065_v25 = vand.u32 4294901760, %v7143_v39  ;;  %v3192_v62 = vand.u32 4294901760, %v7168_v31 }
 0x4a8   : > { %3281 = vmatpush.msrb.mxu2 %v7055_v1  ;;  %3405 = vmatpush.msrb.mxu3 %v7031_v24 }
 0x4a9   : > { %2956 = vmatpush.msrb.mxu0 %v7047_v23  ;;  %3129 = vmatpush.msrb.mxu1 %v3128_v42  ;;  %v2974_v42 = vsub.f32 %v7123_v2, %v2973_v60  ;;  %v3181_v35 = vsub.f32 %v7143_v39, %v8065_v25 }
 0x4aa   : > { %3284 = vmatpush.msrb.mxu2 %v7066_v47  ;;  %3407 = vmatpush.msrb.mxu3 %v7047_v23 }
 0x4ab   : > { %2958 = vmatpush.msrb.mxu0 %v7059_v38  ;;  %3135 = vmatpush.msrb.mxu1 %v3134_v15  ;;  %v3164_v15 = vand.u32 4294901760, %v3163_v46  ;;  %v2975_v7 = vand.u32 4294901760, %v2974_v42  ;;  %v7194_v46 = vand.u32 4294901760, %v2829_v12  ;;  %v3193_v42 = vsub.f32 %v7168_v31, %v3192_v62 }
 0x4ac   : > { %3287 = vmatpush.msrb.mxu2 %v7081_v4  ;;  %3409 = vmatpush.msrb.mxu3 %v7059_v38 }
 0x4ad   : > { %2960 = vmatpush.msrb.mxu0 %v7071_v43  ;;  %3141 = vmatpush.msrb.mxu1 %v3140_v56  ;;  %v3186_v56 = vand.u32 4294901760, %v7162_v54  ;;  %v2988_v51 = vsub.f32 %v2829_v12, %v7194_v46 }
 0x4ae   : > { %3290 = vmatpush.msrb.mxu2 %v7087_v21  ;;  %3411 = vmatpush.msrb.mxu3 %v7071_v43 }
 0x4af   : > { %2962 = vmatpush.msrb.mxu0 %v7089_v18  ;;  %3147 = vmatpush.msrb.mxu1 %v3146_v48  ;;  %v3170_v48 = vand.u32 4294901760, %v3169_v34  ;;  %v3187_v25 = vsub.f32 %v7162_v54, %v3186_v56  ;;  %v3182_v34 = vand.u32 4294901760, %v3181_v35 }
 0x4b0   : > { %3293 = vmatpush.msrb.mxu2 %v7107_v50  ;;  %3413 = vmatpush.msrb.mxu3 %v7089_v18 }
 0x4b1   : > { %2964 = vmatpush.msrb.mxu0 %v7100_v28  ;;  %3153 = vmatpush.msrb.mxu1 %v3152_v8  ;;  %v2981_v8 = vand.u32 4294901760, %v2980_v30  ;;  %v3188_v35 = vand.u32 4294901760, %v3187_v25  ;;  %v2838_v25 = vld [vmem:[%s8056_s9 + $0x58] sm:$0xff] }
 0x4b2   : > { %3296 = vmatpush.msrb.mxu2 %v7113_v40  ;;  %3415 = vmatpush.msrb.mxu3 %v7100_v28 }
 0x4b3   : > { %2966 = vmatpush.msrb.mxu0 %v7115_v63  ;;  %3159 = vmatpush.msrb.mxu1 %v3158_v49  ;;  %v3176_v49 = vand.u32 4294901760, %v3175_v14  ;;  %v2830_v14 = vld [vmem:[%s8056_s9 + $0x18] sm:$0xff] }
 0x4b4   : > { %3299 = vmatpush.msrb.mxu2 %v7137_v27  ;;  %3417 = vmatpush.msrb.mxu3 %v7115_v63  ;;  %v7217_v58 = vand.u32 4294901760, %v2830_v14 }
 0x4b5   : > { %2968 = vmatpush.msrb.mxu0 %v7127_v41  ;;  %3165 = vmatpush.msrb.mxu1 %v3164_v15  ;;  %v2982_v15 = vsub.f32 %v2980_v30, %v2981_v8 }
 0x4b6   : > { %3302 = vmatpush.msrb.mxu2 %v7143_v39  ;;  %3419 = vmatpush.msrb.mxu3 %v7127_v41 }
 0x4b7   : > { %2970 = vmatpush.msrb.mxu0 %v7145_v3  ;;  %3171 = vmatpush.msrb.mxu1 %v3170_v48  ;;  %v3194_v48 = vand.u32 4294901760, %v3193_v42  ;;  %v2983_v12 = vand.u32 4294901760, %v2982_v15 }
 0x4b8   : > { %3305 = vmatpush.msrb.mxu2 %v7162_v54  ;;  %3421 = vmatpush.msrb.mxu3 %v7145_v3 }
 0x4b9   : > { %2976 = vmatmul.f32.vlgmr.msrb.gmra.mxu0 %v2975_v7  ;;  %3177 = vmatpush.msrb.mxu1 %v3176_v49  ;;  %v2989_v7 = vand.u32 4294901760, %v2988_v51 }
 0x4ba   : > { %3522 = vmatpush.msra.mxu0 %v3102_v37  ;;  %3308 = vmatpush.msrb.mxu2 %v7168_v31  ;;  %v7235_v37 = vand.u32 4294901760, %v2831_v55 }
 0x4bb   : > { %3183 = vmatpush.msrb.mxu1 %v3182_v34  ;;  %3311 = vmatmul.f32.vlgmr.msrb.gmra.mxu2 %v7123_v2  ;;  %v2990_v6 = vsub.f32 %v2988_v51, %v2989_v7  ;;  %v2839_v34 = vld [vmem:[%s8056_s9 + $0x60] sm:$0xff] }
 0x4bc   : > { %3526 = vmatpush.msra.mxu0 %v3108_v53  ;;  %3425 = vmatmul.f32.vlgmr.msrb.gmra.mxu3 %v2973_v60  ;;  %v2996_v53 = vsub.f32 %v2830_v14, %v7217_v58  ;;  %v7324_v14 = vand.u32 4294901760, %v2839_v34 }
 0x4bd   : > { %3189 = vmatpush.msrb.mxu1 %v3188_v35 }
 0x4be   : > { %3530 = vmatpush.msra.mxu0 %v3114_v32  ;;  %v2997_v20 = vand.u32 4294901760, %v2996_v53  ;;  %v7254_v32 = vand.u32 4294901760, %v2832_v29 }
 0x4bf   : > { %3195 = vmatpush.msrb.mxu1 %v3194_v48  ;;  %v3068_v48 = vsub.f32 %v2839_v34, %v7324_v14 }
 0x4c0   : > { %3534 = vmatpush.msra.mxu0 %v3120_v36  ;;  %3197 = vmatmul.f32.vlgmr.msrb.gmra.mxu1 %v7096_v17  ;;  %v2833_v36 = vld [vmem:[%s8056_s9 + $0x30] sm:$0xff] }
 0x4c1   : > { %2984 = vmatmul.f32.gmra.mxu0 %v2983_v12  ;;  %3649 = vmatpush.msra.mxu1 %v6995_v19  ;;  %v2991_v19 = vand.u32 4294901760, %v2990_v6  ;;  %v2840_v12 = vld [vmem:[%s8056_s9 + $0x68] sm:$0xff]  ;;  %v3069_v6 = vand.u32 4294901760, %v3068_v48 }
 0x4c2   : > { %3538 = vmatpush.msra.mxu0 %v3126_v10  ;;  %v7273_v10 = vand.u32 4294901760, %v2833_v36 }
 0x4c3   : > { %3651 = vmatpush.msra.mxu1 %v6971_v45  ;;  %3316 = vmatmul.f32.gmra.mxu2 %v2980_v30  ;;  %v2998_v45 = vsub.f32 %v2996_v53, %v2997_v20 }
 0x4c4   : > { %3542 = vmatpush.msra.mxu0 %v3132_v16  ;;  %3431 = vmatmul.f32.gmra.mxu3 %v2981_v8  ;;  %v3020_v47 = vsub.f32 %v2833_v36, %v7273_v10  ;;  %v2834_v16 = vld [vmem:[%s8056_s9 + $0x38] sm:$0xff] }
 0x4c5   : > { %3653 = vmatpush.msra.mxu1 %v6978_v61  ;;  %v3004_v61 = vsub.f32 %v2831_v55, %v7235_v37  ;;  %v3070_v55 = vsub.f32 %v3068_v48, %v3069_v6 }
 0x4c6   : > { %3546 = vmatpush.msra.mxu0 %v3138_v0  ;;  %v3021_v4 = vand.u32 4294901760, %v3020_v47  ;;  %v7288_v0 = vand.u32 4294901760, %v2834_v16 }
 0x4c7   : > { %3655 = vmatpush.msra.mxu1 %v6988_v57  ;;  %v2999_v57 = vand.u32 4294901760, %v2998_v45  ;;  %v3071_v45 = vand.u32 4294901760, %v3070_v55 }
 0x4c8   : > { %3550 = vmatpush.msra.mxu0 %v3144_v11  ;;  %3201 = vmatmul.f32.gmra.mxu1 %v7153_v59  ;;  %v3022_v21 = vsub.f32 %v3020_v47, %v3021_v4  ;;  %v2835_v11 = vld [vmem:[%s8056_s9 + $0x40] sm:$0xff] }
 0x4c9   : > { %2992 = vmatmul.f32.gmra.mxu0 %v2991_v19  ;;  %3657 = vmatpush.msra.mxu1 %v7000_v5  ;;  %v3005_v5 = vand.u32 4294901760, %v3004_v61 }
 0x4ca   : > { %3554 = vmatpush.msra.mxu0 %v3150_v33  ;;  %v7296_v33 = vand.u32 4294901760, %v2835_v11 }
 0x4cb   : > { %3659 = vmatpush.msra.mxu1 %v7013_v44  ;;  %3321 = vmatmul.f32.gmra.mxu2 %v2988_v51  ;;  %v3006_v44 = vsub.f32 %v3004_v61, %v3005_v5 }
 0x4cc   : > { %3558 = vmatpush.msra.mxu0 %v3156_v52  ;;  %3437 = vmatmul.f32.gmra.mxu3 %v2989_v7  ;;  %v2836_v52 = vld [vmem:[%s8056_s9 + $0x48] sm:$0xff] }
 0x4cd   : > { %3661 = vmatpush.msra.mxu1 %v7025_v26  ;;  %v3012_v26 = vsub.f32 %v2832_v29, %v7254_v32  ;;  %v7303_v27 = vand.u32 4294901760, %v2836_v52 }
 0x4ce   : > { %3562 = vmatpush.msra.mxu0 %v3162_v13 }
 0x4cf   : > { %3663 = vmatpush.msra.mxu1 %v7031_v24  ;;  %v8230_v24 = vand.u32 4294901760, %v7143_v39  ;;  %v3013_v1 = vand.u32 4294901760, %v3012_v26  ;;  %v3044_v39 = vsub.f32 %v2836_v52, %v7303_v27 }
 0x4d0   : > { %3566 = vmatpush.msra.mxu0 %v3168_v9  ;;  %3205 = vmatmul.f32.gmra.mxu1 %v7194_v46 }
 0x4d1   : > { %3000 = vmatmul.f32.gmra.mxu0 %v2999_v57  ;;  %3665 = vmatpush.msra.mxu1 %v7047_v23  ;;  %v3007_v23 = vand.u32 4294901760, %v3006_v44  ;;  %v3045_v60 = vand.u32 4294901760, %v3044_v39  ;;  %v2842_v44 = vld [vmem:[%s8056_s9 + $0x78] sm:$0xff] }
 0x4d2   : > { %3570 = vmatpush.msra.mxu0 %v8229_v22  ;;  %v7345_v36 = vand.u32 4294901760, %v2842_v44 }
 0x4d3   : > { %3667 = vmatpush.msra.mxu1 %v7059_v38  ;;  %3326 = vmatmul.f32.gmra.mxu2 %v2996_v53  ;;  %v3014_v38 = vsub.f32 %v3012_v26, %v3013_v1  ;;  %v3046_v51 = vsub.f32 %v3044_v39, %v3045_v60  ;;  %v7331_v53 = vand.u32 4294901760, %v2840_v12 }
 0x4d4   : > { %3574 = vmatpush.msra.mxu0 %v8230_v24  ;;  %3443 = vmatmul.f32.gmra.mxu3 %v2997_v20  ;;  %v2841_v20 = vld [vmem:[%s8056_s9 + $0x70] sm:$0xff] }
 0x4d5   : > { %3669 = vmatpush.msra.mxu1 %v7071_v43  ;;  %v3015_v43 = vand.u32 4294901760, %v3014_v38  ;;  %v3047_v30 = vand.u32 4294901760, %v3046_v51  ;;  %v3076_v19 = vsub.f32 %v2840_v12, %v7331_v53  ;;  %v7338_v29 = vand.u32 4294901760, %v2841_v20 }
 0x4d6   : > { %3578 = vmatpush.msra.mxu0 %v3186_v56 }
 0x4d7   : > { %3671 = vmatpush.msra.mxu1 %v7089_v18  ;;  %v3028_v18 = vsub.f32 %v2834_v16, %v7288_v0 }
 0x4d8   : > { %3582 = vmatpush.msra.mxu0 %v3192_v62  ;;  %3209 = vmatmul.f32.gmra.mxu1 %v7217_v58  ;;  %v7317_v62 = vand.u32 4294901760, %v2838_v25 }
 0x4d9   : > { %3008 = vmatmul.f32.gmra.mxu0 %v3007_v23  ;;  %3673 = vmatpush.msra.mxu1 %v7100_v28  ;;  %v3023_v28 = vand.u32 4294901760, %v3022_v21  ;;  %v3029_v50 = vand.u32 4294901760, %v3028_v18  ;;  %v3092_v23 = vsub.f32 %v2842_v44, %v7345_v36 }
 0x4da   : > { %v3060_v49 = vsub.f32 %v2838_v25, %v7317_v62 }
 0x4db   : > { %3675 = vmatpush.msra.mxu1 %v7115_v63  ;;  %3331 = vmatmul.f32.gmra.mxu2 %v3004_v61  ;;  %v3030_v40 = vsub.f32 %v3028_v18, %v3029_v50  ;;  %v3036_v63 = vsub.f32 %v2835_v11, %v7296_v33  ;;  %v3077_v61 = vand.u32 4294901760, %v3076_v19  ;;  %v3093_v38 = vand.u32 4294901760, %v3092_v23 }
 0x4dc   : > { %3449 = vmatmul.f32.gmra.mxu3 %v3005_v5  ;;  %v3061_v15 = vand.u32 4294901760, %v3060_v49  ;;  %v3084_v5 = vsub.f32 %v2841_v20, %v7338_v29 }
 0x4dd   : > { %3677 = vmatpush.msra.mxu1 %v7127_v41  ;;  %v3031_v2 = vand.u32 4294901760, %v3030_v40  ;;  %v3037_v41 = vand.u32 4294901760, %v3036_v63  ;;  %v3078_v57 = vsub.f32 %v3076_v19, %v3077_v61 }
 0x4de   : > { %v3062_v35 = vsub.f32 %v3060_v49, %v3061_v15  ;;  %v3085_v22 = vand.u32 4294901760, %v3084_v5 }
 0x4df   : > { %3679 = vmatpush.msra.mxu1 %v7145_v3  ;;  %v3038_v13 = vsub.f32 %v3036_v63, %v3037_v41  ;;  %v2837_v3 = vld [vmem:[%s8056_s9 + $0x50] sm:$0xff] }
 0x4e0   : > { %3213 = vmatmul.f32.gmra.mxu1 %v7235_v37  ;;  %v7310_v54 = vand.u32 4294901760, %v2837_v3  ;;  %v3063_v7 = vand.u32 4294901760, %v3062_v35  ;;  %v3086_v24 = vsub.f32 %v3084_v5, %v3085_v22 }
 0x4e1   : > { %3016 = vmatmul.f32.gmra.mxu0 %v3015_v43  ;;  %v3039_v9 = vand.u32 4294901760, %v3038_v13 }
 0x4e2   : > { %v3052_v31 = vsub.f32 %v2837_v3, %v7310_v54 }
 0x4e3   : > { %3336 = vmatmul.f32.gmra.mxu2 %v3012_v26  ;;  %v3079_v26 = vand.u32 4294901760, %v3078_v57 }
 0x4e4   : > { %3455 = vmatmul.f32.gmra.mxu3 %v3013_v1  ;;  %v3053_v56 = vand.u32 4294901760, %v3052_v31  ;;  %v3087_v1 = vand.u32 4294901760, %v3086_v24 }
 0x4e6   : > { %v3054_v8 = vsub.f32 %v3052_v31, %v3053_v56 }
 0x4e8   : > { %3217 = vmatmul.f32.gmra.mxu1 %v7254_v32  ;;  %v3055_v42 = vand.u32 4294901760, %v3054_v8 }
 0x4e9   : > { %3024 = vmatmul.f32.gmra.mxu0 %v3023_v28 }
 0x4eb   : > { %3341 = vmatmul.f32.gmra.mxu2 %v3020_v47  ;;  %v3094_v47 = vsub.f32 %v3092_v23, %v3093_v38 }
 0x4ec   : > { %3461 = vmatmul.f32.gmra.mxu3 %v3021_v4 }
 0x4ed   : > { %v3095_v16 = vand.u32 4294901760, %v3094_v47 }
 0x4f0   : > { %3221 = vmatmul.f32.gmra.mxu1 %v7273_v10 }
 0x4f1   : > { %3032 = vmatmul.f32.gmra.mxu0 %v3031_v2 }
 0x4f3   : > { %3346 = vmatmul.f32.gmra.mxu2 %v3028_v18 }
 0x4f4   : > { %3467 = vmatmul.f32.gmra.mxu3 %v3029_v50 }
 0x4f8   : > { %3225 = vmatmul.f32.gmra.mxu1 %v7288_v0 }
 0x4f9   : > { %3040 = vmatmul.f32.gmra.mxu0 %v3039_v9 }
 0x4fb   : > { %3351 = vmatmul.f32.gmra.mxu2 %v3036_v63 }
 0x4fc   : > { %3473 = vmatmul.f32.gmra.mxu3 %v3037_v41 }
 0x500   : > { %3229 = vmatmul.f32.gmra.mxu1 %v7296_v33 }
 0x501   : > { %3048 = vmatmul.f32.gmra.mxu0 %v3047_v30 }
 0x503   : > { %3356 = vmatmul.f32.gmra.mxu2 %v3044_v39 }
 0x504   : > { %3479 = vmatmul.f32.gmra.mxu3 %v3045_v60 }
 0x508   : > { %3233 = vmatmul.f32.gmra.mxu1 %v7303_v27 }
 0x509   : > { %3056 = vmatmul.f32.gmra.mxu0 %v3055_v42 }
 0x50b   : > { %3361 = vmatmul.f32.gmra.mxu2 %v3052_v31 }
 0x50c   : > { %3485 = vmatmul.f32.gmra.mxu3 %v3053_v56 }
 0x510   : > { %3237 = vmatmul.f32.gmra.mxu1 %v7310_v54 }
 0x511   : > { %3064 = vmatmul.f32.gmra.mxu0 %v3063_v7 }
 0x513   : > { %3366 = vmatmul.f32.gmra.mxu2 %v3060_v49 }
 0x514   : > { %3491 = vmatmul.f32.gmra.mxu3 %v3061_v15 }
 0x518   : > { %3241 = vmatmul.f32.gmra.mxu1 %v7317_v62 }
 0x519   : > { %3072 = vmatmul.f32.gmra.mxu0 %v3071_v45 }
 0x51b   : > { %3371 = vmatmul.f32.gmra.mxu2 %v3068_v48 }
 0x51c   : > { %3497 = vmatmul.f32.gmra.mxu3 %v3069_v6 }
 0x520   : > { %3245 = vmatmul.f32.gmra.mxu1 %v7324_v14 }
 0x521   : > { %3080 = vmatmul.f32.gmra.mxu0 %v3079_v26  ;;  %v2932_v26 = vpop.permute.xlu0 %2931 }
 0x523   : > { %3376 = vmatmul.f32.gmra.mxu2 %v3076_v19 }
 0x524   : > { %3503 = vmatmul.f32.gmra.mxu3 %v3077_v61 }
 0x528   : > { %3249 = vmatmul.f32.gmra.mxu1 %v7331_v53 }
 0x529   : > { %3088 = vmatmul.f32.gmra.mxu0 %v3087_v1  ;;  %v2917_v1 = vpop.permute.xlu0 %2916 }
 0x52b   : > { %3381 = vmatmul.f32.gmra.mxu2 %v3084_v5 }
 0x52c   : > { %3509 = vmatmul.f32.gmra.mxu3 %v3085_v22 }
 0x530   : > { %3253 = vmatmul.f32.gmra.mxu1 %v7338_v29 }
 0x531   : > { %3096 = vmatmul.f32.gmra.mxu0 %v3095_v16 }
 0x533   : > { %3386 = vmatmul.f32.gmra.mxu2 %v3092_v23 }
 0x534   : > { %3515 = vmatmul.f32.gmra.mxu3 %v3093_v38 }
 0x536   : > { %v7351_v43 = vpop.f32.mrf.mxu0 }
 0x537   : > { %8231 = vst [vmem:[#allocation8_spill] sm:$0xff] %v7351_v43 }
 0x538   : > { %3257 = vmatmul.f32.gmra.mxu1 %v7345_v36 }
 0x539   : > { %3584 = vmatmul.f32.vlgmr.msra.gmra.mxu0 %v7096_v17 }
 0x53d   : > { %v7355_v4 = vpop.f32.mrf.mxu1 }
 0x53e   : > { %8232 = vst [vmem:[#allocation13_spill] sm:$0xff] %v7355_v4  ;;  %v7357_v21 = vpop.f32.mrf.mxu0  ;;  %v7421_v9 = vpop.f32.mrf.mxu2 }
 0x53f   : > { %8233 = vst [vmem:[#allocation25_spill] sm:$0xff] %v7357_v21  ;;  %v7428_v51 = vpop.f32.mrf.mxu3 }
 0x540   : > { %3681 = vmatmul.f32.vlgmr.msra.gmra.mxu1 %v7096_v17  ;;  %8236 = vst [vmem:[#allocation21_spill] sm:$0xff] %v7421_v9 }
 0x541   : > { %3588 = vmatmul.f32.gmra.mxu0 %v7153_v59  ;;  %8237 = vst [vmem:[#allocation30_spill] sm:$0xff] %v7428_v51 }
 0x545   : > { %v7361_v18 = vpop.f32.mrf.mxu1 }
 0x546   : > { %8234 = vst [vmem:[#allocation33_spill] sm:$0xff] %v7361_v18  ;;  %v7363_v11 = vpop.f32.mrf.mxu0  ;;  %v7435_v25 = vpop.f32.mrf.mxu2 }
 0x547   : > { %8238 = vst [vmem:[#allocation9_spill] sm:$0xff] %v7435_v25 }
 0x548   : > { %3685 = vmatmul.f32.gmra.mxu1 %v7153_v59 }
 0x549   : > { %3592 = vmatmul.f32.gmra.mxu0 %v7194_v46 }
 0x54d   : > { %v7367_v28 = vpop.f32.mrf.mxu1 }
 0x54e   : > { %8235 = vst [vmem:[#allocation11_spill] sm:$0xff] %v7367_v28  ;;  %v7369_v50 = vpop.f32.mrf.mxu0 }
 0x550   : > { %3689 = vmatmul.f32.gmra.mxu1 %v7194_v46 }
 0x551   : > { %3596 = vmatmul.f32.gmra.mxu0 %v7217_v58 }
 0x555   : > { %v7373_v40 = vpop.f32.mrf.mxu1 }
 0x556   : > { %v7375_v17 = vpop.f32.mrf.mxu0 }
 0x558   : > { %3693 = vmatmul.f32.gmra.mxu1 %v7217_v58 }
 0x559   : > { %3600 = vmatmul.f32.gmra.mxu0 %v7235_v37 }
 0x55d   : > { %v7379_v63 = vpop.f32.mrf.mxu1 }
 0x55e   : > { %v7381_v59 = vpop.f32.mrf.mxu0 }
 0x560   : > { %3697 = vmatmul.f32.gmra.mxu1 %v7235_v37 }
 0x561   : > { %3604 = vmatmul.f32.gmra.mxu0 %v7254_v32 }
 0x565   : > { %v7385_v52 = vpop.f32.mrf.mxu1 }
 0x566   : > { %v7387_v46 = vpop.f32.mrf.mxu0 }
 0x568   : > { %3701 = vmatmul.f32.gmra.mxu1 %v7254_v32 }
 0x569   : > { %3608 = vmatmul.f32.gmra.mxu0 %v7273_v10 }
 0x56d   : > { %v7391_v2 = vpop.f32.mrf.mxu1 }
 0x56e   : > { %v7393_v58 = vpop.f32.mrf.mxu0 }
 0x570   : > { %3705 = vmatmul.f32.gmra.mxu1 %v7273_v10 }
 0x571   : > { %3612 = vmatmul.f32.gmra.mxu0 %v7288_v0 }
 0x575   : > { %v7397_v41 = vpop.f32.mrf.mxu1 }
 0x576   : > { %v7399_v37 = vpop.f32.mrf.mxu0 }
 0x578   : > { %3709 = vmatmul.f32.gmra.mxu1 %v7288_v0 }
 0x579   : > { %3616 = vmatmul.f32.gmra.mxu0 %v7296_v33 }
 0x57d   : > { %v7403_v13 = vpop.f32.mrf.mxu1 }
 0x57e   : > { %v7405_v32 = vpop.f32.mrf.mxu0 }
 0x580   : > { %3713 = vmatmul.f32.gmra.mxu1 %v7296_v33 }
 0x581   : > { %3620 = vmatmul.f32.gmra.mxu0 %v7303_v27 }
 0x585   : > { %v7409_v39 = vpop.f32.mrf.mxu1 }
 0x586   : > { %v7411_v10 = vpop.f32.mrf.mxu0 }
 0x588   : > { %3717 = vmatmul.f32.gmra.mxu1 %v7303_v27 }
 0x589   : > { %3624 = vmatmul.f32.gmra.mxu0 %v7310_v54 }
 0x58d   : > { %v7415_v3 = vpop.f32.mrf.mxu1 }
 0x58e   : > { %v7417_v0 = vpop.f32.mrf.mxu0 }
 0x590   : > { %3721 = vmatmul.f32.gmra.mxu1 %v7310_v54  ;;  %v7439_v54 = vpop.f32.mrf.mxu3 }
 0x591   : > { %3628 = vmatmul.f32.gmra.mxu0 %v7317_v62  ;;  %8239 = vst [vmem:[#allocation18_spill] sm:$0xff] %v7439_v54 }
 0x595   : > { %v7423_v33 = vpop.f32.mrf.mxu1 }
 0x596   : > { %v7425_v60 = vpop.f32.mrf.mxu0 }
 0x598   : > { %3725 = vmatmul.f32.gmra.mxu1 %v7317_v62  ;;  %v7446_v62 = vpop.f32.mrf.mxu2  ;;  %v7449_v8 = vpop.f32.mrf.mxu3 }
 0x599   : > { %3632 = vmatmul.f32.gmra.mxu0 %v7324_v14  ;;  %8240 = vst [vmem:[#allocation26_spill] sm:$0xff] %v7446_v62 }
 0x59a   : > { %8241 = vst [vmem:[#allocation15_spill] sm:$0xff] %v7449_v8 }
 0x59d   : > { %v7431_v27 = vpop.f32.mrf.mxu1 }
 0x59e   : > { %v7433_v31 = vpop.f32.mrf.mxu0 }
 0x5a0   : > { %3729 = vmatmul.f32.gmra.mxu1 %v7324_v14  ;;  %v7457_v42 = vpop.f32.mrf.mxu2  ;;  %v7463_v35 = vpop.f32.mrf.mxu3 }
 0x5a1   : > { %3636 = vmatmul.f32.gmra.mxu0 %v7331_v53  ;;  %8242 = vst [vmem:[#allocation22_spill] sm:$0xff] %v7457_v42 }
 0x5a2   : > { %8244 = vst [vmem:[#allocation36_spill] sm:$0xff] %v7463_v35 }
 0x5a5   : > { %v7441_v30 = vpop.f32.mrf.mxu1 }
 0x5a6   : > { %v7443_v56 = vpop.f32.mrf.mxu0 }
 0x5a7   : > { %v3090_v18 = vadd.f32 %v7443_v56, %v2932_v26 }
 0x5a8   : > { %3733 = vmatmul.f32.gmra.mxu1 %v7331_v53  ;;  %v7466_v48 = vpop.f32.mrf.mxu2  ;;  %v7472_v6 = vpop.f32.mrf.mxu3 }
 0x5a9   : > { %3640 = vmatmul.f32.gmra.mxu0 %v7338_v29  ;;  %8245 = vst [vmem:[#allocation24_spill] sm:$0xff] %v7466_v48 }
 0x5aa   : > { %8248 = vst [vmem:[#allocation48_spill] sm:$0xff] %v7472_v6  ;;  %v2927_v6 = vpop.permute.xlu1 %2926 }
 0x5ab   : > { %v3082_v42 = vadd.f32 %v7433_v31, %v2927_v6 }
 0x5ad   : > { %v7451_v49 = vpop.f32.mrf.mxu1 }
 0x5ae   : > { %v7453_v34 = vpop.f32.mrf.mxu0  ;;  %v3255_v48 = vadd.f32 %v7451_v49, %v3090_v18 }
 0x5b0   : > { %3737 = vmatmul.f32.gmra.mxu1 %v7338_v29  ;;  %v7478_v19 = vpop.f32.mrf.mxu2  ;;  %v7480_v20 = vpop.f32.mrf.mxu3 }
 0x5b1   : > { %3644 = vmatmul.f32.gmra.mxu0 %v7345_v36  ;;  %8251 = vst [vmem:[#allocation32_spill] sm:$0xff] %v7478_v19 }
 0x5b2   : > { %8252 = vst [vmem:[#allocation16_spill] sm:$0xff] %v7480_v20  ;;  %v2912_v62 = vpop.permute.xlu1 %2911 }
 0x5b3   : > { %v3058_v21 = vadd.f32 %v7411_v10, %v2912_v62 }
 0x5b5   : > { %v7459_v15 = vpop.f32.mrf.mxu1 }
 0x5b6   : > { %v7461_v14 = vpop.f32.mrf.mxu0 }
 0x5b7   : > { %8243 = vst [vmem:[#allocation19_spill] sm:$0xff] %v7461_v14 }
 0x5b8   : > { %3741 = vmatmul.f32.gmra.mxu1 %v7345_v36  ;;  %v7486_v29 = vpop.f32.mrf.mxu2  ;;  %v7488_v57 = vpop.f32.mrf.mxu3 }
 0x5b9   : > { %8255 = vst [vmem:[#allocation46_spill] sm:$0xff] %v7488_v57 }
 0x5ba   : > { %v2897_v20 = vpop.permute.xlu1 %2896 }
 0x5bb   : > { %v3034_v49 = vadd.f32 %v7393_v58, %v2897_v20 }
 0x5bd   : > { %v7468_v12 = vpop.f32.mrf.mxu1 }
 0x5be   : > { %8246 = vst [vmem:[#allocation10_spill] sm:$0xff] %v7468_v12  ;;  %v7470_v7 = vpop.f32.mrf.mxu0 }
 0x5bf   : > { %8247 = vst [vmem:[#allocation29_spill] sm:$0xff] %v7470_v7 }
 0x5c0   : > { %v7494_v22 = vpop.f32.mrf.mxu2  ;;  %v7500_v23 = vpop.f32.mrf.mxu3 }
 0x5c1   : > { %8260 = vst [vmem:[#allocation34_spill] sm:$0xff] %v7500_v23  ;;  %v3066_v23 = vadd.f32 %v7417_v0, %v2917_v1 }
 0x5c5   : > { %v7474_v53 = vpop.f32.mrf.mxu1 }
 0x5c6   : > { %8249 = vst [vmem:[#allocation3_spill] sm:$0xff] %v7474_v53  ;;  %v7476_v55 = vpop.f32.mrf.mxu0 }
 0x5c7   : > { %8250 = vst [vmem:[#allocation44_spill] sm:$0xff] %v7476_v55 }
 0x5c8   : > { %v3352_v38 = vpop.f32.mrf.mxu2  ;;  %v3474_v12 = vpop.f32.mrf.mxu3 }
 0x5cd   : > { %v7482_v45 = vpop.f32.mrf.mxu1 }
 0x5ce   : > { %8253 = vst [vmem:[#allocation40_spill] sm:$0xff] %v7482_v45  ;;  %v7484_v61 = vpop.f32.mrf.mxu0  ;;  %v2902_v45 = vpop.permute.xlu0 %2901 }
 0x5cf   : > { %8254 = vst [vmem:[#allocation23_spill] sm:$0xff] %v7484_v61  ;;  %v3042_v51 = vadd.f32 %v7399_v37, %v2902_v45  ;;  %v2937_v37 = vpop.permute.xlu2 %2936 }
 0x5d0   : > { %v7510_v7 = vpop.f32.mrf.mxu2  ;;  %v7514_v55 = vpop.f32.mrf.mxu3  ;;  %v3098_v18 = vadd.f32 %v7453_v34, %v2937_v37 }
 0x5d5   : > { %v7490_v5 = vpop.f32.mrf.mxu1 }
 0x5d6   : > { %8256 = vst [vmem:[#allocation12_spill] sm:$0xff] %v7490_v5  ;;  %v7492_v44 = vpop.f32.mrf.mxu0  ;;  %v3231_v5 = vadd.f32 %v7403_v13, %v3042_v51 }
 0x5d7   : > { %8257 = vst [vmem:[#allocation39_spill] sm:$0xff] %v7492_v44 }
 0x5d8   : > { %v3362_v8 = vpop.f32.mrf.mxu2  ;;  %v7518_v44 = vpop.f32.mrf.mxu3 }
 0x5dd   : > { %v7496_v36 = vpop.f32.mrf.mxu1 }
 0x5de   : > { %8258 = vst [vmem:[#allocation45_spill] sm:$0xff] %v7496_v36  ;;  %v7498_v24 = vpop.f32.mrf.mxu0  ;;  %v3353_v36 = vadd.f32 %v3352_v38, %v3231_v5 }
 0x5df   : > { %8259 = vst [vmem:[#allocation37_spill] sm:$0xff] %v7498_v24 }
 0x5e0   : > { %v3475_v9 = vadd.f32 %v3474_v12, %v3353_v36  ;;  %v3367_v24 = vpop.f32.mrf.mxu2  ;;  %v3492_v51 = vpop.f32.mrf.mxu3 }
 0x5e1   : > { %v2922_v12 = vpop.permute.xlu2 %2921 }
 0x5e2   : > { %v3074_v43 = vadd.f32 %v7425_v60, %v2922_v12  ;;  %v3239_v60 = vadd.f32 %v7415_v3, %v3058_v21 }
 0x5e4   : > { %v3247_v28 = vadd.f32 %v7431_v27, %v3074_v43  ;;  %v2882_v27 = vpop.permute.xlu1 %2881 }
 0x5e5   : > { %v7502_v47 = vpop.f32.mrf.mxu1 }
 0x5e6   : > { %8261 = vst [vmem:[#allocation35_spill] sm:$0xff] %v7502_v47  ;;  %v7504_v16 = vpop.f32.mrf.mxu0 }
 0x5e7   : > { %8262 = vst [vmem:[#allocation20_spill] sm:$0xff] %v7504_v16 }
 0x5e8   : > { %v3372_v5 = vpop.f32.mrf.mxu2 }
 0x5ed   : > { %v7506_v53 = vpop.f32.mrf.mxu1 }
 0x5ee   : > { %8263 = vst [vmem:[#allocation31_spill] sm:$0xff] %v7506_v53  ;;  %v7508_v14 = vpop.f32.mrf.mxu0 }
 0x5ef   : > { %8264 = vst [vmem:[#allocation7_spill] sm:$0xff] %v7508_v14 }
 0x5f5   : > { %v7516_v54 = vpop.f32.mrf.mxu1 }
 0x5f6   : > { %8265 = vst [vmem:[#allocation43_spill] sm:$0xff] %v7516_v54  ;;  %v3617_v61 = vpop.f32.mrf.mxu0 }
 0x5f7   : > { %v3618_v47 = vadd.f32 %v3617_v61, %v3475_v9  ;;  %v3498_v61 = vpop.f32.mrf.mxu3 }
 0x5fd   : > { %v3714_v35 = vpop.f32.mrf.mxu1 }
 0x5fe   : > { %v7520_v25 = vpop.f32.mrf.mxu0  ;;  %v7522_v53 = vadd.f32 %v3714_v35, %v3618_v47  ;;  %v3377_v35 = vpop.f32.mrf.mxu2 }
 0x5ff   : > { %8266 = vst [vmem:[#allocation14_spill] sm:$0xff] %v7520_v25  ;;  %v2907_v47 = vpop.permute.xlu2 %2906  ;;  %v3243_v25 = vadd.f32 %v7423_v33, %v3066_v23  ;;  %v3259_v33 = vadd.f32 %v7459_v15, %v3098_v18  ;;  %v8276_v18 = vld [vmem:[#allocation8_spill] sm:$0xff] }
 0x600   : > { %8267 = vst [vmem:[#allocation42_spill] sm:$0xff] %v7522_v53  ;;  %v3504_v53 = vpop.f32.mrf.mxu3  ;;  %v3050_v26 = vadd.f32 %v7405_v32, %v2907_v47 }
 0x601   : > { %v3368_v43 = vadd.f32 %v3367_v24, %v3243_v25 }
 0x602   : > { %v3235_v0 = vadd.f32 %v7409_v39, %v3050_v26  ;;  %v3227_v39 = vadd.f32 %v7397_v41, %v3034_v49  ;;  %v8279_v49 = vld [vmem:[#allocation33_spill] sm:$0xff] }
 0x604   : > { %v3358_v25 = vadd.f32 %v7510_v7, %v3235_v0 }
 0x605   : > { %v7524_v45 = vpop.f32.mrf.mxu1 }
 0x606   : > { %8268 = vst [vmem:[#allocation47_spill] sm:$0xff] %v7524_v45  ;;  %v7526_v13 = vpop.f32.mrf.mxu0  ;;  %v3382_v14 = vpop.f32.mrf.mxu2  ;;  %v3251_v45 = vadd.f32 %v7441_v30, %v3082_v42  ;;  %v3373_v42 = vadd.f32 %v3372_v5, %v3247_v28 }
 0x607   : > { %v2892_v57 = vpop.permute.xlu2 %2891  ;;  %v3383_v56 = vadd.f32 %v3382_v14, %v3255_v48  ;;  %v2887_v30 = vpop.permute.xlu0 %2886  ;;  %v3363_v14 = vadd.f32 %v3362_v8, %v3239_v60  ;;  %v3010_v8 = vadd.f32 %v7375_v17, %v2882_v27 }
 0x608   : > { %v3510_v19 = vpop.f32.mrf.mxu3  ;;  %v3378_v6 = vadd.f32 %v3377_v35, %v3251_v45  ;;  %v3018_v21 = vadd.f32 %v7381_v59, %v2887_v30  ;;  %v3499_v3 = vadd.f32 %v3498_v61, %v3373_v42  ;;  %v3026_v34 = vadd.f32 %v7387_v46, %v2892_v57 }
 0x609   : > { %v3511_v62 = vadd.f32 %v3510_v19, %v3383_v56  ;;  %v3487_v59 = vadd.f32 %v7518_v44, %v3363_v14  ;;  %v3215_v7 = vadd.f32 %v7379_v63, %v3010_v8  ;;  %v8273_v56 = vld [vmem:[#allocation34_spill] sm:$0xff] }
 0x60a   : > { %v3505_v10 = vadd.f32 %v3504_v53, %v3378_v6  ;;  %v3493_v53 = vadd.f32 %v3492_v51, %v3368_v43  ;;  %v3223_v20 = vadd.f32 %v7391_v2, %v3026_v34  ;;  %v3219_v37 = vadd.f32 %v7385_v52, %v3018_v21  ;;  %v8272_v6 = vld [vmem:[#allocation11_spill] sm:$0xff]  ;;  %v8277_v43 = vld [vmem:[#allocation46_spill] sm:$0xff]  ;;  %v8281_v21 = vld [vmem:[#allocation16_spill] sm:$0xff] }
 0x60b   : > { %v3626_v45 = vadd.f32 %v7526_v13, %v3487_v59  ;;  %v3481_v2 = vadd.f32 %v7514_v55, %v3358_v25  ;;  %v8270_v13 = vld [vmem:[#allocation14_spill] sm:$0xff]  ;;  %v8271_v55 = vld [vmem:[#allocation25_spill] sm:$0xff]  ;;  %v8283_v34 = vld [vmem:[#allocation20_spill] sm:$0xff] }
 0x60c   : > { %v8284_v25 = vld [vmem:[#allocation43_spill] sm:$0xff] }
 0x60d   : > { %v7528_v38 = vpop.f32.mrf.mxu1  ;;  %v3622_v35 = vadd.f32 %v8270_v13, %v3481_v2  ;;  %v8275_v30 = vld [vmem:[#allocation47_spill] sm:$0xff] }
 0x60e   : > { %v3629_v9 = vpop.f32.mrf.mxu0  ;;  %v3387_v48 = vpop.f32.mrf.mxu2  ;;  %v3723_v63 = vadd.f32 %v7528_v38, %v3626_v45  ;;  %v8291_v45 = vld [vmem:[#allocation36_spill] sm:$0xff] }
 0x60f   : > { %v2877_v32 = vpop.permute.xlu2 %2876  ;;  %v3388_v24 = vadd.f32 %v3387_v48, %v3259_v33  ;;  %v3630_v46 = vadd.f32 %v3629_v9, %v3493_v53  ;;  %v2872_v17 = vpop.permute.xlu0 %2871  ;;  %v3719_v38 = vadd.f32 %v8275_v30, %v3622_v35  ;;  %v8280_v48 = vld [vmem:[#allocation22_spill] sm:$0xff]  ;;  %v8296_v35 = vld [vmem:[#allocation23_spill] sm:$0xff] }
 0x610   : > { %v3002_v41 = vadd.f32 %v7369_v50, %v2877_v32  ;;  %v2994_v52 = vadd.f32 %v7363_v11, %v2872_v17  ;;  %v3343_v50 = vadd.f32 %v7486_v29, %v3223_v20  ;;  %v2867_v9 = vpop.permute.xlu1 %2866  ;;  %v8287_v20 = vld [vmem:[#allocation37_spill] sm:$0xff]  ;;  %v8292_v17 = vld [vmem:[#allocation39_spill] sm:$0xff] }
 0x612   : > { %v3463_v27 = vadd.f32 %v8277_v43, %v3343_v50 }
 0x615   : > { %v7530_v36 = vpop.f32.mrf.mxu1 }
 0x616   : > { %v3633_v54 = vpop.f32.mrf.mxu0  ;;  %v3727_v44 = vadd.f32 %v7530_v36, %v3630_v46  ;;  %v3207_v36 = vadd.f32 %v8272_v6, %v2994_v52  ;;  %v8289_v46 = vld [vmem:[#allocation42_spill] sm:$0xff] }
 0x617   : > { %v3634_v15 = vadd.f32 %v3633_v54, %v3499_v3  ;;  %v3348_v54 = vadd.f32 %v7494_v22, %v3227_v39  ;;  %v8269_v22 = vld [vmem:[#allocation32_spill] sm:$0xff]  ;;  %v3610_v39 = vadd.f32 %v8283_v34, %v3463_v27  ;;  %v8301_v27 = vld [vmem:[#allocation30_spill] sm:$0xff] }
 0x618   : > { %v3338_v61 = vadd.f32 %v8269_v22, %v3219_v37 }
 0x619   : > { %v3469_v26 = vadd.f32 %v8273_v56, %v3348_v54 }
 0x61a   : > { %v3457_v3 = vadd.f32 %v8281_v21, %v3338_v61  ;;  %v8295_v61 = vld [vmem:[#allocation15_spill] sm:$0xff] }
 0x61c   : > { %v3606_v59 = vadd.f32 %v8287_v20, %v3457_v3 }
 0x61d   : > { %v3730_v16 = vpop.f32.mrf.mxu1 }
 0x61e   : > { %v3637_v4 = vpop.f32.mrf.mxu0  ;;  %v3731_v57 = vadd.f32 %v3730_v16, %v3634_v15  ;;  %v3211_v16 = vadd.f32 %v7373_v40, %v3002_v41  ;;  %v2862_v40 = vpop.permute.xlu2 %2861  ;;  %v8285_v15 = vld [vmem:[#allocation26_spill] sm:$0xff] }
 0x61f   : > { %v3638_v23 = vadd.f32 %v3637_v4, %v3505_v10  ;;  %v3516_v4 = vpop.f32.mrf.mxu3  ;;  %v2978_v0 = vadd.f32 %v8276_v18, %v2862_v40  ;;  %v8278_v10 = vld [vmem:[#allocation7_spill] sm:$0xff]  ;;  %v8299_v40 = vld [vmem:[#allocation44_spill] sm:$0xff] }
 0x620   : > { %v3517_v5 = vadd.f32 %v3516_v4, %v3388_v24  ;;  %v3328_v32 = vadd.f32 %v8280_v48, %v3211_v16  ;;  %v8288_v4 = vld [vmem:[#allocation31_spill] sm:$0xff] }
 0x621   : > { %v3707_v37 = vadd.f32 %v8288_v4, %v3610_v39  ;;  %v8305_v39 = vld [vmem:[#allocation3_spill] sm:$0xff] }
 0x625   : > { %v3734_v31 = vpop.f32.mrf.mxu1 }
 0x626   : > { %v3641_v12 = vpop.f32.mrf.mxu0  ;;  %v3735_v1 = vadd.f32 %v3734_v31, %v3638_v23  ;;  %v2986_v31 = vadd.f32 %v8271_v55, %v2867_v9  ;;  %v8282_v23 = vld [vmem:[#allocation13_spill] sm:$0xff] }
 0x627   : > { %v3642_v28 = vadd.f32 %v3641_v12, %v3511_v62  ;;  %v8274_v12 = vld [vmem:[#allocation24_spill] sm:$0xff]  ;;  %v3614_v62 = vadd.f32 %v8278_v10, %v3469_v26  ;;  %v8294_v9 = vld [vmem:[#allocation21_spill] sm:$0xff] }
 0x628   : > { %v3333_v29 = vadd.f32 %v8274_v12, %v3215_v7  ;;  %v3203_v14 = vadd.f32 %v8279_v49, %v2986_v31  ;;  %v8290_v7 = vld [vmem:[#allocation9_spill] sm:$0xff]  ;;  %v8303_v49 = vld [vmem:[#allocation40_spill] sm:$0xff] }
 0x629   : > { %v3711_v53 = vadd.f32 %v8284_v25, %v3614_v62  ;;  %v8297_v55 = vld [vmem:[#allocation45_spill] sm:$0xff] }
 0x62a   : > { %v3318_v54 = vadd.f32 %v8290_v7, %v3203_v14  ;;  %v8302_v62 = vld [vmem:[#allocation29_spill] sm:$0xff] }
 0x62d   : > { %v3738_v19 = vpop.f32.mrf.mxu1 }
 0x62e   : > { %v3739_v58 = vadd.f32 %v3738_v19, %v3642_v28  ;;  %v3645_v51 = vpop.f32.mrf.mxu0  ;;  %v3199_v28 = vadd.f32 %v8282_v23, %v2978_v0 }
 0x62f   : > { %v3646_v47 = vadd.f32 %v3645_v51, %v3517_v5  ;;  %v3445_v51 = vadd.f32 %v8291_v45, %v3328_v32  ;;  %v8293_v5 = vld [vmem:[#allocation35_spill] sm:$0xff] }
 0x630   : > { %5060 = vtanh.f32 %v3739_v58  ;;  %v8286_v58 = vld [vmem:[#allocation48_spill] sm:$0xff]  ;;  %v3313_v22 = vadd.f32 %v8294_v9, %v3199_v28  ;;  %v8304_v28 = vld [vmem:[#allocation19_spill] sm:$0xff] }
 0x631   : > { %5062 = vtanh.f32 %v3735_v1  ;;  %v3323_v1 = vadd.f32 %v8285_v15, %v3207_v36  ;;  %v3451_v8 = vadd.f32 %v8286_v58, %v3333_v29  ;;  %v8300_v29 = vld [vmem:[#allocation12_spill] sm:$0xff]  ;;  %v3761_v9 = vld [vmem:[%s8058_s11] sm:$0xff] }
 0x632   : > { %5064 = vtanh.f32 %v3731_v57  ;;  %v3427_v10 = vadd.f32 %v8301_v27, %v3313_v22 }
 0x633   : > { %5066 = vtanh.f32 %v3727_v44  ;;  %v3602_v2 = vadd.f32 %v8292_v17, %v3451_v8  ;;  %v3703_v44 = vadd.f32 %v8293_v5, %v3606_v59  ;;  %v3439_v13 = vadd.f32 %v8295_v61, %v3323_v1  ;;  %v8306_v59 = vld [vmem:[#allocation10_spill] sm:$0xff] }
 0x634   : > { %5068 = vtanh.f32 %v3723_v63  ;;  %v3586_v34 = vadd.f32 %v8304_v28, %v3427_v10 }
 0x635   : > { %v3742_v11 = vpop.f32.mrf.mxu1  ;;  %v3699_v31 = vadd.f32 %v8297_v55, %v3602_v2  ;;  %v3594_v12 = vadd.f32 %v8299_v40, %v3439_v13  ;;  %v7704_v40 = vand.u32 4294901760, %v3761_v9 }
 0x636   : > { %v5061_v60 = vpop.eup %5060  ;;  %v3743_v42 = vadd.f32 %v3742_v11, %v3646_v47  ;;  %v3598_v47 = vadd.f32 %v8296_v35, %v3445_v51  ;;  %v8298_v11 = vld [vmem:[#allocation18_spill] sm:$0xff]  ;;  %v3683_v4 = vadd.f32 %v8306_v59, %v3586_v34 }
 0x637   : > { %v5063_v33 = vpop.eup %5062  ;;  %v7581_v19 = vand.u32 4294901760, %v5061_v60  ;;  %v3691_v14 = vadd.f32 %v8303_v49, %v3594_v12  ;;  %v7731_v34 = vsub.f32 %v3761_v9, %v7704_v40 }
 0x638   : > { %5070 = vtanh.f32 %v3743_v42  ;;  %v5065_v24 = vpop.eup %5064  ;;  %v7588_v57 = vand.u32 4294901760, %v5063_v33  ;;  %v3695_v30 = vadd.f32 %v8300_v29, %v3598_v47 }
 0x639   : > { %5072 = vtanh.f32 %v3719_v38  ;;  %v5067_v41 = vpop.eup %5066  ;;  %v7595_v16 = vsub.f32 %v5061_v60, %v7581_v19  ;;  %v7597_v50 = vand.u32 4294901760, %v5065_v24  ;;  %v3433_v60 = vadd.f32 %v8298_v11, %v3318_v54 }
 0x63a   : > { %5074 = vtanh.f32 %v8289_v46  ;;  %v5069_v52 = vpop.eup %5068  ;;  %v7606_v36 = vsub.f32 %v5063_v33, %v7588_v57  ;;  %v7608_v56 = vand.u32 4294901760, %v5067_v41 }
 0x63b   : > { %5076 = vtanh.f32 %v3711_v53  ;;  %v7619_v18 = vsub.f32 %v5065_v24, %v7597_v50  ;;  %v7621_v0 = vand.u32 4294901760, %v5069_v52  ;;  %v4042_v43 = vand.u32 4294901760, %v7595_v16 }
 0x63c   : > { %5078 = vtanh.f32 %v3707_v37  ;;  %v3590_v33 = vadd.f32 %v8302_v62, %v3433_v60  ;;  %v7631_v21 = vsub.f32 %v5067_v41, %v7608_v56  ;;  %v4048_v23 = vand.u32 4294901760, %v7606_v36 }
 0x63d   : > { %5080 = vtanh.f32 %v3703_v44  ;;  %v4043_v1 = vsub.f32 %v7595_v16, %v4042_v43  ;;  %v7650_v58 = vsub.f32 %v5069_v52, %v7621_v0  ;;  %v4054_v8 = vand.u32 4294901760, %v7619_v18 }
 0x63e   : > { %v5071_v63 = vpop.eup %5070  ;;  %5082 = vtanh.f32 %v3699_v31  ;;  %v3687_v25 = vadd.f32 %v8305_v39, %v3590_v33  ;;  %v4049_v41 = vsub.f32 %v7606_v36, %v4048_v23  ;;  %v4060_v54 = vand.u32 4294901760, %v7631_v21 }
 0x63f   : > { %v7603_v6 = vand.u32 4294901760, %v5071_v63  ;;  %v5073_v26 = vpop.eup %5072  ;;  %5084 = vtanh.f32 %v3695_v30  ;;  %v4044_v17 = vand.u32 4294901760, %v4043_v1  ;;  %v4055_v2 = vsub.f32 %v7619_v18, %v4054_v8 }
 0x640   : > { %v5075_v38 = vpop.eup %5074  ;;  %v7633_v3 = vand.u32 4294901760, %v5073_v26  ;;  %5086 = vtanh.f32 %v3691_v14  ;;  %v4066_v44 = vand.u32 4294901760, %v7650_v58  ;;  %v4050_v22 = vand.u32 4294901760, %v4049_v41 }
 0x641   : > { %3874 = vmatpush.msra.mxu2 %v7603_v6  ;;  %4325 = vmatpush.msrb.mxu1 %v7603_v6  ;;  %v7616_v42 = vsub.f32 %v5071_v63, %v7603_v6  ;;  %v5077_v48 = vpop.eup %5076  ;;  %v7639_v53 = vand.u32 4294901760, %v5075_v38  ;;  %5088 = vtanh.f32 %v3687_v25  ;;  %v4061_v61 = vsub.f32 %v7631_v21, %v4060_v54  ;;  %v3762_v25 = vld [vmem:[%s8058_s11 + $0x8] sm:$0xff] }
 0x642   : > { %v5079_v24 = vpop.eup %5078  ;;  %v7655_v37 = vand.u32 4294901760, %v5077_v48  ;;  %v7663_v7 = vsub.f32 %v5073_v26, %v7633_v3  ;;  %5090 = vtanh.f32 %v3683_v4  ;;  %v4056_v26 = vand.u32 4294901760, %v4055_v2 }
 0x643   : > { %3876 = vmatpush.msra.mxu2 %v7581_v19  ;;  %4197 = vmatpush.msrb.mxu0 %v7616_v42  ;;  %v4036_v32 = vand.u32 4294901760, %v7616_v42  ;;  %v5081_v20 = vpop.eup %5080  ;;  %v7667_v51 = vand.u32 4294901760, %v5079_v24  ;;  %v7674_v5 = vsub.f32 %v5075_v38, %v7639_v53  ;;  %v4067_v11 = vsub.f32 %v7650_v58, %v4066_v44 }
 0x644   : > { %4327 = vmatpush.msrb.mxu1 %v7581_v19  ;;  %v5083_v45 = vpop.eup %5082  ;;  %v7679_v63 = vand.u32 4294901760, %v5081_v20  ;;  %v7689_v13 = vsub.f32 %v5077_v48, %v7655_v37  ;;  %v4072_v35 = vand.u32 4294901760, %v7663_v7  ;;  %v4062_v30 = vand.u32 4294901760, %v4061_v61 }
 0x645   : > { %3878 = vmatpush.msra.mxu2 %v7588_v57  ;;  %4200 = vmatpush.msrb.mxu0 %v7595_v16  ;;  %v4037_v15 = vsub.f32 %v7616_v42, %v4036_v32  ;;  %v5085_v52 = vpop.eup %5084  ;;  %v7695_v55 = vsub.f32 %v5079_v24, %v7667_v51  ;;  %v7697_v31 = vand.u32 4294901760, %v5083_v45  ;;  %v4078_v60 = vand.u32 4294901760, %v7674_v5 }
 0x646   : > { %4329 = vmatpush.msrb.mxu1 %v7588_v57  ;;  %v5087_v47 = vpop.eup %5086  ;;  %v7708_v29 = vand.u32 4294901760, %v5085_v52  ;;  %v4073_v38 = vsub.f32 %v7663_v7, %v4072_v35  ;;  %v7715_v27 = vsub.f32 %v5081_v20, %v7679_v63  ;;  %v4084_v10 = vand.u32 4294901760, %v7689_v13 }
 0x647   : > { %3880 = vmatpush.msra.mxu2 %v7597_v50  ;;  %4203 = vmatpush.msrb.mxu0 %v7606_v36  ;;  %v4038_v46 = vand.u32 4294901760, %v4037_v15  ;;  %v5089_v12 = vpop.eup %5088  ;;  %v7721_v33 = vsub.f32 %v5083_v45, %v7697_v31  ;;  %v7723_v49 = vand.u32 4294901760, %v5087_v47  ;;  %v4068_v14 = vand.u32 4294901760, %v4067_v11  ;;  %v3765_v36 = vld [vmem:[%s8058_s11 + $0x20] sm:$0xff] }
 0x648   : > { %4331 = vmatpush.msrb.mxu1 %v7597_v50  ;;  %v5091_v62 = vpop.eup %5090  ;;  %v4079_v48 = vsub.f32 %v7674_v5, %v4078_v60  ;;  %v4090_v28 = vand.u32 4294901760, %v7695_v55  ;;  %v7735_v39 = vand.u32 4294901760, %v5089_v12  ;;  %v4074_v24 = vand.u32 4294901760, %v4073_v38 }
 0x649   : > { %3882 = vmatpush.msra.mxu2 %v7608_v56  ;;  %4039 = vmatpush.msra.mxu3 %v4038_v46  ;;  %v4085_v15 = vsub.f32 %v7689_v13, %v4084_v10  ;;  %v7745_v1 = vsub.f32 %v5085_v52, %v7708_v29  ;;  %v4096_v20 = vand.u32 4294901760, %v7715_v27  ;;  %v7751_v59 = vsub.f32 %v5087_v47, %v7723_v49 }
 0x64a   : > { %4206 = vmatpush.msrb.mxu0 %v7619_v18  ;;  %4333 = vmatpush.msrb.mxu1 %v7608_v56  ;;  %v7753_v4 = vand.u32 4294901760, %v5091_v62  ;;  %v4102_v46 = vand.u32 4294901760, %v7721_v33  ;;  %v4080_v41 = vand.u32 4294901760, %v4079_v48  ;;  %v4091_v45 = vsub.f32 %v7695_v55, %v4090_v28 }
 0x64b   : > { %3884 = vmatpush.msra.mxu2 %v7621_v0  ;;  %4045 = vmatpush.msra.mxu3 %v4044_v17  ;;  %v3907_v17 = vand.u32 4294901760, %v7731_v34  ;;  %v7761_v2 = vand.u32 4294901760, %v3762_v25  ;;  %v4086_v52 = vand.u32 4294901760, %v4085_v15  ;;  %v4097_v9 = vsub.f32 %v7715_v27, %v4096_v20 }
 0x64c   : > { %4209 = vmatpush.msrb.mxu0 %v7631_v21  ;;  %4335 = vmatpush.msrb.mxu1 %v7621_v0  ;;  %v8068_v61 = vand.u32 4294901760, %v7745_v1  ;;  %v7776_v47 = vsub.f32 %v5091_v62, %v7753_v4  ;;  %v4092_v11 = vand.u32 4294901760, %v4091_v45  ;;  %v3763_v62 = vld [vmem:[%s8058_s11 + $0x10] sm:$0xff]  ;;  %v3766_v21 = vld [vmem:[%s8058_s11 + $0x28] sm:$0xff] }
 0x64d   : > { %3886 = vmatpush.msra.mxu2 %v7633_v3  ;;  %4051 = vmatpush.msra.mxu3 %v4050_v22  ;;  %v7770_v22 = vsub.f32 %v5089_v12, %v7735_v39  ;;  %v4103_v12 = vsub.f32 %v7721_v33, %v4102_v46  ;;  %v3914_v38 = vsub.f32 %v3762_v25, %v7761_v2 }
 0x64e   : > { %4212 = vmatpush.msrb.mxu0 %v7650_v58  ;;  %4337 = vmatpush.msrb.mxu1 %v7633_v3  ;;  %v4109_v48 = vsub.f32 %v7745_v1, %v8068_v61  ;;  %v4126_v15 = vand.u32 4294901760, %v7776_v47  ;;  %v8307_v58 = vand.u32 4294901760, %v7745_v1 }
 0x64f   : > { %3888 = vmatpush.msra.mxu2 %v7639_v53  ;;  %4057 = vmatpush.msra.mxu3 %v4056_v26  ;;  %v8067_v26 = vand.u32 4294901760, %v7751_v59 }
 0x650   : > { %4215 = vmatpush.msrb.mxu0 %v7663_v7  ;;  %4339 = vmatpush.msrb.mxu1 %v7639_v53 }
 0x651   : > { %3890 = vmatpush.msra.mxu2 %v7655_v37  ;;  %4063 = vmatpush.msra.mxu3 %v4062_v30  ;;  %v3908_v30 = vsub.f32 %v7731_v34, %v3907_v17  ;;  %v4115_v25 = vsub.f32 %v7751_v59, %v8067_v26 }
 0x652   : > { %4218 = vmatpush.msrb.mxu0 %v7674_v5  ;;  %4341 = vmatpush.msrb.mxu1 %v7655_v37 }
 0x653   : > { %3892 = vmatpush.msra.mxu2 %v7667_v51  ;;  %4069 = vmatpush.msra.mxu3 %v4068_v14  ;;  %v4098_v14 = vand.u32 4294901760, %v4097_v9  ;;  %v3909_v45 = vand.u32 4294901760, %v3908_v30  ;;  %v7802_v9 = vand.u32 4294901760, %v3763_v62  ;;  %v4127_v30 = vsub.f32 %v7776_v47, %v4126_v15 }
 0x654   : > { %4221 = vmatpush.msrb.mxu0 %v7689_v13  ;;  %4343 = vmatpush.msrb.mxu1 %v7667_v51 }
 0x655   : > { %3894 = vmatpush.msra.mxu2 %v7679_v63  ;;  %4075 = vmatpush.msra.mxu3 %v4074_v24  ;;  %v4120_v24 = vand.u32 4294901760, %v7770_v22  ;;  %v3922_v61 = vsub.f32 %v3763_v62, %v7802_v9 }
 0x656   : > { %4224 = vmatpush.msrb.mxu0 %v7695_v55  ;;  %4345 = vmatpush.msrb.mxu1 %v7679_v63 }
 0x657   : > { %3896 = vmatpush.msra.mxu2 %v7697_v31  ;;  %4081 = vmatpush.msra.mxu3 %v4080_v41  ;;  %v4104_v41 = vand.u32 4294901760, %v4103_v12  ;;  %v4121_v26 = vsub.f32 %v7770_v22, %v4120_v24  ;;  %v4116_v12 = vand.u32 4294901760, %v4115_v25  ;;  %v4128_v25 = vand.u32 4294901760, %v4127_v30 }
 0x658   : > { %4227 = vmatpush.msrb.mxu0 %v7715_v27  ;;  %4347 = vmatpush.msrb.mxu1 %v7697_v31 }
 0x659   : > { %3898 = vmatpush.msra.mxu2 %v7708_v29  ;;  %4087 = vmatpush.msra.mxu3 %v4086_v52  ;;  %v3915_v52 = vand.u32 4294901760, %v3914_v38 }
 0x65a   : > { %4230 = vmatpush.msrb.mxu0 %v7721_v33  ;;  %4349 = vmatpush.msrb.mxu1 %v7708_v29 }
 0x65b   : > { %3900 = vmatpush.msra.mxu2 %v7723_v49  ;;  %4093 = vmatpush.msra.mxu3 %v4092_v11  ;;  %v4110_v11 = vand.u32 4294901760, %v4109_v48  ;;  %v3764_v48 = vld [vmem:[%s8058_s11 + $0x18] sm:$0xff] }
 0x65c   : > { %4233 = vmatpush.msrb.mxu0 %v7745_v1  ;;  %4351 = vmatpush.msrb.mxu1 %v7723_v49  ;;  %v7825_v42 = vand.u32 4294901760, %v3764_v48 }
 0x65d   : > { %3902 = vmatpush.msra.mxu2 %v7735_v39  ;;  %4099 = vmatpush.msra.mxu3 %v4098_v14  ;;  %v3916_v14 = vsub.f32 %v3914_v38, %v3915_v52 }
 0x65e   : > { %4236 = vmatpush.msrb.mxu0 %v7751_v59  ;;  %4353 = vmatpush.msrb.mxu1 %v7735_v39 }
 0x65f   : > { %3904 = vmatpush.msra.mxu2 %v7753_v4  ;;  %4105 = vmatpush.msra.mxu3 %v4104_v41  ;;  %v4122_v41 = vand.u32 4294901760, %v4121_v26  ;;  %v3917_v62 = vand.u32 4294901760, %v3916_v14  ;;  %v3772_v26 = vld [vmem:[%s8058_s11 + $0x58] sm:$0xff] }
 0x660   : > { %4239 = vmatpush.msrb.mxu0 %v7770_v22  ;;  %4355 = vmatpush.msrb.mxu1 %v7753_v4 }
 0x661   : > { %3910 = vmatmul.f32.vlgmr.msra.gmra.mxu2 %v3909_v45  ;;  %4111 = vmatpush.msra.mxu3 %v4110_v11  ;;  %v3923_v45 = vand.u32 4294901760, %v3922_v61 }
 0x662   : > { %4456 = vmatpush.msrb.mxu2 %v4036_v32  ;;  %4242 = vmatpush.msrb.mxu0 %v7776_v47  ;;  %v7843_v32 = vand.u32 4294901760, %v3765_v36 }
 0x663   : > { %4117 = vmatpush.msra.mxu3 %v4116_v12  ;;  %4245 = vmatmul.f32.vlgmr.msrb.gmra.mxu0 %v7731_v34  ;;  %v3924_v16 = vsub.f32 %v3922_v61, %v3923_v45  ;;  %v3773_v12 = vld [vmem:[%s8058_s11 + $0x60] sm:$0xff] }
 0x664   : > { %4460 = vmatpush.msrb.mxu2 %v4042_v43  ;;  %4359 = vmatmul.f32.vlgmr.msrb.gmra.mxu1 %v3907_v17  ;;  %v3930_v43 = vsub.f32 %v3764_v48, %v7825_v42  ;;  %v7932_v48 = vand.u32 4294901760, %v3773_v12 }
 0x665   : > { %4123 = vmatpush.msra.mxu3 %v4122_v41 }
 0x666   : > { %4464 = vmatpush.msrb.mxu2 %v4048_v23  ;;  %v3931_v18 = vand.u32 4294901760, %v3930_v43  ;;  %v7862_v23 = vand.u32 4294901760, %v3766_v21 }
 0x667   : > { %4129 = vmatpush.msra.mxu3 %v4128_v25  ;;  %v4002_v25 = vsub.f32 %v3773_v12, %v7932_v48 }
 0x668   : > { %4468 = vmatpush.msrb.mxu2 %v4054_v8  ;;  %4131 = vmatmul.f32.vlgmr.msra.gmra.mxu3 %v7704_v40  ;;  %v3767_v8 = vld [vmem:[%s8058_s11 + $0x30] sm:$0xff] }
 0x669   : > { %3918 = vmatmul.f32.gmra.mxu2 %v3917_v62  ;;  %4583 = vmatpush.msrb.mxu3 %v7603_v6  ;;  %v3925_v6 = vand.u32 4294901760, %v3924_v16  ;;  %v3774_v62 = vld [vmem:[%s8058_s11 + $0x68] sm:$0xff]  ;;  %v4003_v16 = vand.u32 4294901760, %v4002_v25 }
 0x66a   : > { %4472 = vmatpush.msrb.mxu2 %v4060_v54  ;;  %v7881_v54 = vand.u32 4294901760, %v3767_v8 }
 0x66b   : > { %4585 = vmatpush.msrb.mxu3 %v7581_v19  ;;  %4250 = vmatmul.f32.gmra.mxu0 %v3914_v38  ;;  %v3932_v19 = vsub.f32 %v3930_v43, %v3931_v18 }
 0x66c   : > { %4476 = vmatpush.msrb.mxu2 %v4066_v44  ;;  %4365 = vmatmul.f32.gmra.mxu1 %v3915_v52  ;;  %v3954_v5 = vsub.f32 %v3767_v8, %v7881_v54  ;;  %v3768_v44 = vld [vmem:[%s8058_s11 + $0x38] sm:$0xff] }
 0x66d   : > { %4587 = vmatpush.msrb.mxu3 %v7588_v57  ;;  %v3938_v57 = vsub.f32 %v3765_v36, %v7843_v32  ;;  %v4004_v36 = vsub.f32 %v4002_v25, %v4003_v16 }
 0x66e   : > { %4480 = vmatpush.msrb.mxu2 %v4072_v35  ;;  %v3955_v13 = vand.u32 4294901760, %v3954_v5  ;;  %v7896_v35 = vand.u32 4294901760, %v3768_v44 }
 0x66f   : > { %4589 = vmatpush.msrb.mxu3 %v7597_v50  ;;  %v3933_v50 = vand.u32 4294901760, %v3932_v19  ;;  %v4005_v19 = vand.u32 4294901760, %v4004_v36 }
 0x670   : > { %4484 = vmatpush.msrb.mxu2 %v4078_v60  ;;  %4135 = vmatmul.f32.gmra.mxu3 %v7761_v2  ;;  %v3956_v55 = vsub.f32 %v3954_v5, %v3955_v13  ;;  %v3769_v60 = vld [vmem:[%s8058_s11 + $0x40] sm:$0xff] }
 0x671   : > { %3926 = vmatmul.f32.gmra.mxu2 %v3925_v6  ;;  %4591 = vmatpush.msrb.mxu3 %v7608_v56  ;;  %v3939_v56 = vand.u32 4294901760, %v3938_v57 }
 0x672   : > { %4488 = vmatpush.msrb.mxu2 %v4084_v10  ;;  %v7904_v10 = vand.u32 4294901760, %v3769_v60 }
 0x673   : > { %4593 = vmatpush.msrb.mxu3 %v7621_v0  ;;  %4255 = vmatmul.f32.gmra.mxu0 %v3922_v61  ;;  %v3940_v0 = vsub.f32 %v3938_v57, %v3939_v56 }
 0x674   : > { %4492 = vmatpush.msrb.mxu2 %v4090_v28  ;;  %4371 = vmatmul.f32.gmra.mxu1 %v3923_v45  ;;  %v3770_v28 = vld [vmem:[%s8058_s11 + $0x48] sm:$0xff] }
 0x675   : > { %4595 = vmatpush.msrb.mxu3 %v7633_v3  ;;  %v3946_v3 = vsub.f32 %v3766_v21, %v7862_v23  ;;  %v7911_v1 = vand.u32 4294901760, %v3770_v28 }
 0x676   : > { %4496 = vmatpush.msrb.mxu2 %v4096_v20 }
 0x677   : > { %4597 = vmatpush.msrb.mxu3 %v7639_v53  ;;  %v8308_v53 = vand.u32 4294901760, %v7751_v59  ;;  %v3947_v7 = vand.u32 4294901760, %v3946_v3  ;;  %v3978_v59 = vsub.f32 %v3770_v28, %v7911_v1 }
 0x678   : > { %4500 = vmatpush.msrb.mxu2 %v4102_v46  ;;  %4139 = vmatmul.f32.gmra.mxu3 %v7802_v9 }
 0x679   : > { %3934 = vmatmul.f32.gmra.mxu2 %v3933_v50  ;;  %4599 = vmatpush.msrb.mxu3 %v7655_v37  ;;  %v3941_v37 = vand.u32 4294901760, %v3940_v0  ;;  %v3979_v17 = vand.u32 4294901760, %v3978_v59  ;;  %v3776_v0 = vld [vmem:[%s8058_s11 + $0x78] sm:$0xff] }
 0x67a   : > { %4504 = vmatpush.msrb.mxu2 %v8307_v58  ;;  %v7953_v8 = vand.u32 4294901760, %v3776_v0 }
 0x67b   : > { %4601 = vmatpush.msrb.mxu3 %v7667_v51  ;;  %4260 = vmatmul.f32.gmra.mxu0 %v3930_v43  ;;  %v3948_v51 = vsub.f32 %v3946_v3, %v3947_v7  ;;  %v3980_v61 = vsub.f32 %v3978_v59, %v3979_v17  ;;  %v7939_v43 = vand.u32 4294901760, %v3774_v62 }
 0x67c   : > { %4508 = vmatpush.msrb.mxu2 %v8308_v53  ;;  %4377 = vmatmul.f32.gmra.mxu1 %v3931_v18  ;;  %v3775_v18 = vld [vmem:[%s8058_s11 + $0x70] sm:$0xff] }
 0x67d   : > { %4603 = vmatpush.msrb.mxu3 %v7679_v63  ;;  %v3949_v63 = vand.u32 4294901760, %v3948_v51  ;;  %v3981_v38 = vand.u32 4294901760, %v3980_v61  ;;  %v4010_v6 = vsub.f32 %v3774_v62, %v7939_v43  ;;  %v7946_v21 = vand.u32 4294901760, %v3775_v18 }
 0x67e   : > { %4512 = vmatpush.msrb.mxu2 %v4120_v24 }
 0x67f   : > { %4605 = vmatpush.msrb.mxu3 %v7697_v31  ;;  %v3962_v31 = vsub.f32 %v3768_v44, %v7896_v35 }
 0x680   : > { %4516 = vmatpush.msrb.mxu2 %v4126_v15  ;;  %4143 = vmatmul.f32.gmra.mxu3 %v7825_v42  ;;  %v7925_v15 = vand.u32 4294901760, %v3772_v26 }
 0x681   : > { %3942 = vmatmul.f32.gmra.mxu2 %v3941_v37  ;;  %4607 = vmatpush.msrb.mxu3 %v7708_v29  ;;  %v3957_v29 = vand.u32 4294901760, %v3956_v55  ;;  %v3963_v27 = vand.u32 4294901760, %v3962_v31  ;;  %v4026_v37 = vsub.f32 %v3776_v0, %v7953_v8 }
 0x682   : > { %v3994_v11 = vsub.f32 %v3772_v26, %v7925_v15  ;;  %v3806_v26 = vpop.permute.xlu2 %3805 }
 0x683   : > { %4609 = vmatpush.msrb.mxu3 %v7723_v49  ;;  %4265 = vmatmul.f32.gmra.mxu0 %v3938_v57  ;;  %v3964_v33 = vsub.f32 %v3962_v31, %v3963_v27  ;;  %v3970_v49 = vsub.f32 %v3769_v60, %v7904_v10  ;;  %v4011_v57 = vand.u32 4294901760, %v4010_v6  ;;  %v4027_v51 = vand.u32 4294901760, %v4026_v37 }
 0x684   : > { %4383 = vmatmul.f32.gmra.mxu1 %v3939_v56  ;;  %v3995_v14 = vand.u32 4294901760, %v3994_v11  ;;  %v4018_v56 = vsub.f32 %v3775_v18, %v7946_v21 }
 0x685   : > { %4611 = vmatpush.msrb.mxu3 %v7735_v39  ;;  %v3965_v34 = vand.u32 4294901760, %v3964_v33  ;;  %v3971_v39 = vand.u32 4294901760, %v3970_v49  ;;  %v4012_v50 = vsub.f32 %v4010_v6, %v4011_v57 }
 0x686   : > { %v3996_v41 = vsub.f32 %v3994_v11, %v3995_v14  ;;  %v4019_v58 = vand.u32 4294901760, %v4018_v56 }
 0x687   : > { %4613 = vmatpush.msrb.mxu3 %v7753_v4  ;;  %v3972_v20 = vsub.f32 %v3970_v49, %v3971_v39  ;;  %v3771_v4 = vld [vmem:[%s8058_s11 + $0x50] sm:$0xff] }
 0x688   : > { %4147 = vmatmul.f32.gmra.mxu3 %v7843_v32  ;;  %v7918_v22 = vand.u32 4294901760, %v3771_v4  ;;  %v3997_v45 = vand.u32 4294901760, %v3996_v41  ;;  %v4020_v53 = vsub.f32 %v4018_v56, %v4019_v58 }
 0x689   : > { %3950 = vmatmul.f32.gmra.mxu2 %v3949_v63  ;;  %v3973_v46 = vand.u32 4294901760, %v3972_v20  ;;  %v3801_v20 = vpop.permute.xlu1 %3800 }
 0x68a   : > { %v3986_v47 = vsub.f32 %v3771_v4, %v7918_v22 }
 0x68b   : > { %4270 = vmatmul.f32.gmra.mxu0 %v3946_v3  ;;  %v4013_v3 = vand.u32 4294901760, %v4012_v50 }
 0x68c   : > { %4389 = vmatmul.f32.gmra.mxu1 %v3947_v7  ;;  %v3987_v24 = vand.u32 4294901760, %v3986_v47  ;;  %v4021_v7 = vand.u32 4294901760, %v4020_v53  ;;  %v3821_v53 = vpop.permute.xlu2 %3820 }
 0x68e   : > { %v3988_v52 = vsub.f32 %v3986_v47, %v3987_v24 }
 0x690   : > { %4151 = vmatmul.f32.gmra.mxu3 %v7862_v23  ;;  %v3989_v30 = vand.u32 4294901760, %v3988_v52 }
 0x691   : > { %3958 = vmatmul.f32.gmra.mxu2 %v3957_v29  ;;  %v3816_v18 = vpop.permute.xlu1 %3815 }
 0x693   : > { %4275 = vmatmul.f32.gmra.mxu0 %v3954_v5  ;;  %v4028_v5 = vsub.f32 %v4026_v37, %v4027_v51 }
 0x694   : > { %4395 = vmatmul.f32.gmra.mxu1 %v3955_v13 }
 0x695   : > { %v4029_v44 = vand.u32 4294901760, %v4028_v5 }
 0x698   : > { %4155 = vmatmul.f32.gmra.mxu3 %v7881_v54 }
 0x699   : > { %3966 = vmatmul.f32.gmra.mxu2 %v3965_v34 }
 0x69b   : > { %4280 = vmatmul.f32.gmra.mxu0 %v3962_v31  ;;  %v3796_v31 = vpop.permute.xlu0 %3795 }
 0x69c   : > { %4401 = vmatmul.f32.gmra.mxu1 %v3963_v27 }
 0x6a0   : > { %4159 = vmatmul.f32.gmra.mxu3 %v7896_v35 }
 0x6a1   : > { %3974 = vmatmul.f32.gmra.mxu2 %v3973_v46 }
 0x6a3   : > { %4285 = vmatmul.f32.gmra.mxu0 %v3970_v49 }
 0x6a4   : > { %4407 = vmatmul.f32.gmra.mxu1 %v3971_v39 }
 0x6a8   : > { %4163 = vmatmul.f32.gmra.mxu3 %v7904_v10 }
 0x6a9   : > { %3982 = vmatmul.f32.gmra.mxu2 %v3981_v38 }
 0x6ab   : > { %4290 = vmatmul.f32.gmra.mxu0 %v3978_v59 }
 0x6ac   : > { %4413 = vmatmul.f32.gmra.mxu1 %v3979_v17 }
 0x6b0   : > { %4167 = vmatmul.f32.gmra.mxu3 %v7911_v1 }
 0x6b1   : > { %3990 = vmatmul.f32.gmra.mxu2 %v3989_v30 }
 0x6b3   : > { %4295 = vmatmul.f32.gmra.mxu0 %v3986_v47 }
 0x6b4   : > { %4419 = vmatmul.f32.gmra.mxu1 %v3987_v24 }
 0x6b8   : > { %4171 = vmatmul.f32.gmra.mxu3 %v7918_v22 }
 0x6b9   : > { %3998 = vmatmul.f32.gmra.mxu2 %v3997_v45 }
 0x6bb   : > { %4300 = vmatmul.f32.gmra.mxu0 %v3994_v11 }
 0x6bc   : > { %4425 = vmatmul.f32.gmra.mxu1 %v3995_v14  ;;  %v3811_v14 = vpop.permute.xlu0 %3810 }
 0x6c0   : > { %4175 = vmatmul.f32.gmra.mxu3 %v7925_v15 }
 0x6c1   : > { %4006 = vmatmul.f32.gmra.mxu2 %v4005_v19 }
 0x6c3   : > { %4305 = vmatmul.f32.gmra.mxu0 %v4002_v25 }
 0x6c4   : > { %4431 = vmatmul.f32.gmra.mxu1 %v4003_v16  ;;  %v3826_v5 = vpop.permute.xlu0 %3825 }
 0x6c8   : > { %4179 = vmatmul.f32.gmra.mxu3 %v7932_v48 }
 0x6c9   : > { %4014 = vmatmul.f32.gmra.mxu2 %v4013_v3 }
 0x6cb   : > { %4310 = vmatmul.f32.gmra.mxu0 %v4010_v6 }
 0x6cc   : > { %4437 = vmatmul.f32.gmra.mxu1 %v4011_v57 }
 0x6d0   : > { %4183 = vmatmul.f32.gmra.mxu3 %v7939_v43 }
 0x6d1   : > { %4022 = vmatmul.f32.gmra.mxu2 %v4021_v7 }
 0x6d3   : > { %4315 = vmatmul.f32.gmra.mxu0 %v4018_v56 }
 0x6d4   : > { %4443 = vmatmul.f32.gmra.mxu1 %v4019_v58 }
 0x6d8   : > { %4187 = vmatmul.f32.gmra.mxu3 %v7946_v21 }
 0x6d9   : > { %4030 = vmatmul.f32.gmra.mxu2 %v4029_v44 }
 0x6db   : > { %4320 = vmatmul.f32.gmra.mxu0 %v4026_v37 }
 0x6dc   : > { %4449 = vmatmul.f32.gmra.mxu1 %v4027_v51 }
 0x6e0   : > { %4191 = vmatmul.f32.gmra.mxu3 %v7953_v8  ;;  %v4246_v63 = vpop.f32.mrf.mxu0 }
 0x6e1   : > { %4518 = vmatmul.f32.vlgmr.msrb.gmra.mxu2 %v7704_v40  ;;  %v4360_v55 = vpop.f32.mrf.mxu1 }
 0x6e4   : > { %v3911_v13 = vpop.f32.mrf.mxu2 }
 0x6e5   : > { %v3912_v60 = vadd.f32 %v3911_v13, %v3796_v31 }
 0x6e8   : > { %4615 = vmatmul.f32.vlgmr.msrb.gmra.mxu3 %v7704_v40  ;;  %v4251_v49 = vpop.f32.mrf.mxu0 }
 0x6e9   : > { %4522 = vmatmul.f32.gmra.mxu2 %v7761_v2  ;;  %v4366_v34 = vpop.f32.mrf.mxu1 }
 0x6eb   : > { %v4132_v29 = vpop.f32.mrf.mxu3 }
 0x6ec   : > { %v3919_v27 = vpop.f32.mrf.mxu2  ;;  %v4133_v33 = vadd.f32 %v4132_v29, %v3912_v60 }
 0x6ed   : > { %v3920_v59 = vadd.f32 %v3919_v27, %v3801_v20 }
 0x6ee   : > { %v4247_v28 = vadd.f32 %v4246_v63, %v4133_v33 }
 0x6f0   : > { %v7963_v39 = vadd.f32 %v4360_v55, %v4247_v28  ;;  %4619 = vmatmul.f32.gmra.mxu3 %v7761_v2  ;;  %v4256_v61 = vpop.f32.mrf.mxu0 }
 0x6f1   : > { %4526 = vmatmul.f32.gmra.mxu2 %v7802_v9  ;;  %v4372_v38 = vpop.f32.mrf.mxu1 }
 0x6f3   : > { %v4136_v4 = vpop.f32.mrf.mxu3 }
 0x6f4   : > { %v3927_v40 = vpop.f32.mrf.mxu2  ;;  %v4137_v46 = vadd.f32 %v4136_v4, %v3920_v59 }
 0x6f5   : > { %v3928_v24 = vadd.f32 %v3927_v40, %v3806_v26 }
 0x6f6   : > { %v4252_v17 = vadd.f32 %v4251_v49, %v4137_v46 }
 0x6f8   : > { %v7967_v47 = vadd.f32 %v4366_v34, %v4252_v17  ;;  %4623 = vmatmul.f32.gmra.mxu3 %v7802_v9  ;;  %v4261_v41 = vpop.f32.mrf.mxu0 }
 0x6f9   : > { %4530 = vmatmul.f32.gmra.mxu2 %v7825_v42  ;;  %v4378_v9 = vpop.f32.mrf.mxu1 }
 0x6fb   : > { %v4140_v52 = vpop.f32.mrf.mxu3 }
 0x6fc   : > { %v3935_v2 = vpop.f32.mrf.mxu2  ;;  %v4141_v11 = vadd.f32 %v4140_v52, %v3928_v24 }
 0x6fd   : > { %v3936_v25 = vadd.f32 %v3935_v2, %v3811_v14 }
 0x6fe   : > { %v4257_v12 = vadd.f32 %v4256_v61, %v4141_v11 }
 0x700   : > { %v7971_v30 = vadd.f32 %v4372_v38, %v4257_v12  ;;  %4627 = vmatmul.f32.gmra.mxu3 %v7825_v42  ;;  %v4266_v42 = vpop.f32.mrf.mxu0 }
 0x701   : > { %4534 = vmatmul.f32.gmra.mxu2 %v7843_v32  ;;  %v4384_v0 = vpop.f32.mrf.mxu1 }
 0x703   : > { %v4144_v62 = vpop.f32.mrf.mxu3 }
 0x704   : > { %v3943_v45 = vpop.f32.mrf.mxu2  ;;  %v4145_v16 = vadd.f32 %v4144_v62, %v3936_v25 }
 0x705   : > { %v3944_v19 = vadd.f32 %v3943_v45, %v3816_v18 }
 0x706   : > { %v4262_v36 = vadd.f32 %v4261_v41, %v4145_v16 }
 0x708   : > { %v7975_v6 = vadd.f32 %v4378_v9, %v4262_v36  ;;  %4631 = vmatmul.f32.gmra.mxu3 %v7843_v32 }
 0x709   : > { %4538 = vmatmul.f32.gmra.mxu2 %v7862_v23 }
 0x70b   : > { %v4148_v57 = vpop.f32.mrf.mxu3 }
 0x70c   : > { %v3951_v50 = vpop.f32.mrf.mxu2  ;;  %v4149_v56 = vadd.f32 %v4148_v57, %v3944_v19 }
 0x70d   : > { %v3952_v37 = vadd.f32 %v3951_v50, %v3821_v53 }
 0x70e   : > { %v4267_v3 = vadd.f32 %v4266_v42, %v4149_v56 }
 0x710   : > { %v7979_v58 = vadd.f32 %v4384_v0, %v4267_v3  ;;  %4635 = vmatmul.f32.gmra.mxu3 %v7862_v23  ;;  %v3831_v23 = vpop.permute.xlu1 %3830 }
 0x711   : > { %4542 = vmatmul.f32.gmra.mxu2 %v7881_v54 }
 0x713   : > { %v4152_v7 = vpop.f32.mrf.mxu3 }
 0x714   : > { %v3959_v32 = vpop.f32.mrf.mxu2  ;;  %v7983_v51 = vadd.f32 %v4152_v7, %v3952_v37 }
 0x715   : > { %v3960_v44 = vadd.f32 %v3959_v32, %v3826_v5 }
 0x718   : > { %4639 = vmatmul.f32.gmra.mxu3 %v7881_v54  ;;  %v3836_v54 = vpop.permute.xlu2 %3835 }
 0x719   : > { %4546 = vmatmul.f32.gmra.mxu2 %v7896_v35 }
 0x71b   : > { %v4156_v63 = vpop.f32.mrf.mxu3 }
 0x71c   : > { %v3967_v13 = vpop.f32.mrf.mxu2  ;;  %v7987_v55 = vadd.f32 %v4156_v63, %v3960_v44  ;;  %v4271_v44 = vpop.f32.mrf.mxu0 }
 0x71d   : > { %v3968_v31 = vadd.f32 %v3967_v13, %v3831_v23  ;;  %v4390_v63 = vpop.f32.mrf.mxu1 }
 0x720   : > { %4643 = vmatmul.f32.gmra.mxu3 %v7896_v35  ;;  %v3841_v35 = vpop.permute.xlu0 %3840 }
 0x721   : > { %4550 = vmatmul.f32.gmra.mxu2 %v7904_v10 }
 0x723   : > { %v4160_v60 = vpop.f32.mrf.mxu3 }
 0x724   : > { %v3975_v29 = vpop.f32.mrf.mxu2  ;;  %v7991_v27 = vadd.f32 %v4160_v60, %v3968_v31 }
 0x725   : > { %v3976_v33 = vadd.f32 %v3975_v29, %v3836_v54 }
 0x728   : > { %4647 = vmatmul.f32.gmra.mxu3 %v7904_v10  ;;  %v3846_v10 = vpop.permute.xlu1 %3845 }
 0x729   : > { %4554 = vmatmul.f32.gmra.mxu2 %v7911_v1 }
 0x72b   : > { %v4164_v49 = vpop.f32.mrf.mxu3 }
 0x72c   : > { %v3983_v28 = vpop.f32.mrf.mxu2  ;;  %v7995_v34 = vadd.f32 %v4164_v49, %v3976_v33 }
 0x72d   : > { %v3984_v20 = vadd.f32 %v3983_v28, %v3841_v35  ;;  %v4276_v28 = vpop.f32.mrf.mxu0 }
 0x730   : > { %4651 = vmatmul.f32.gmra.mxu3 %v7911_v1  ;;  %v3851_v1 = vpop.permute.xlu2 %3850 }
 0x731   : > { %4558 = vmatmul.f32.gmra.mxu2 %v7918_v22 }
 0x733   : > { %v4168_v59 = vpop.f32.mrf.mxu3 }
 0x734   : > { %v3991_v4 = vpop.f32.mrf.mxu2  ;;  %v7999_v40 = vadd.f32 %v4168_v59, %v3984_v20  ;;  %v4396_v20 = vpop.f32.mrf.mxu1 }
 0x735   : > { %v3992_v46 = vadd.f32 %v3991_v4, %v3846_v10 }
 0x738   : > { %4655 = vmatmul.f32.gmra.mxu3 %v7918_v22  ;;  %v3856_v22 = vpop.permute.xlu0 %3855 }
 0x739   : > { %4562 = vmatmul.f32.gmra.mxu2 %v7925_v15 }
 0x73b   : > { %v4172_v17 = vpop.f32.mrf.mxu3 }
 0x73c   : > { %v3999_v61 = vpop.f32.mrf.mxu2  ;;  %v8003_v26 = vadd.f32 %v4172_v17, %v3992_v46 }
 0x73d   : > { %v4000_v38 = vadd.f32 %v3999_v61, %v3851_v1 }
 0x740   : > { %4659 = vmatmul.f32.gmra.mxu3 %v7925_v15  ;;  %v3861_v15 = vpop.permute.xlu1 %3860 }
 0x741   : > { %4566 = vmatmul.f32.gmra.mxu2 %v7932_v48 }
 0x743   : > { %v4176_v24 = vpop.f32.mrf.mxu3 }
 0x744   : > { %v4007_v52 = vpop.f32.mrf.mxu2  ;;  %v8007_v2 = vadd.f32 %v4176_v24, %v4000_v38  ;;  %v4281_v38 = vpop.f32.mrf.mxu0 }
 0x745   : > { %v4008_v11 = vadd.f32 %v4007_v52, %v3856_v22 }
 0x748   : > { %4663 = vmatmul.f32.gmra.mxu3 %v7932_v48  ;;  %v3866_v48 = vpop.permute.xlu2 %3865  ;;  %v4714_v29 = vpop.permute.xlu1 %4713 }
 0x749   : > { %4570 = vmatmul.f32.gmra.mxu2 %v7939_v43 }
 0x74b   : > { %v4180_v12 = vpop.f32.mrf.mxu3 }
 0x74c   : > { %v4015_v14 = vpop.f32.mrf.mxu2  ;;  %v8011_v41 = vadd.f32 %v4180_v12, %v4008_v11 }
 0x74d   : > { %v4016_v25 = vadd.f32 %v4015_v14, %v3861_v15  ;;  %v4402_v14 = vpop.f32.mrf.mxu1 }
 0x750   : > { %4667 = vmatmul.f32.gmra.mxu3 %v7939_v43  ;;  %v3871_v43 = vpop.permute.xlu0 %3870  ;;  %v4719_v23 = vpop.permute.xlu2 %4718 }
 0x751   : > { %4574 = vmatmul.f32.gmra.mxu2 %v7946_v21  ;;  %v4729_v22 = vpop.permute.xlu1 %4728 }
 0x753   : > { %v4184_v62 = vpop.f32.mrf.mxu3 }
 0x754   : > { %v4023_v9 = vpop.f32.mrf.mxu2  ;;  %v8015_v45 = vadd.f32 %v4184_v62, %v4016_v25 }
 0x755   : > { %v4024_v16 = vadd.f32 %v4023_v9, %v3866_v48  ;;  %v4286_v48 = vpop.f32.mrf.mxu0 }
 0x758   : > { %4671 = vmatmul.f32.gmra.mxu3 %v7946_v21 }
 0x759   : > { %4578 = vmatmul.f32.gmra.mxu2 %v7953_v8 }
 0x75b   : > { %v4188_v36 = vpop.f32.mrf.mxu3 }
 0x75c   : > { %v4031_v18 = vpop.f32.mrf.mxu2  ;;  %v8019_v19 = vadd.f32 %v4188_v36, %v4024_v16 }
 0x75d   : > { %v4032_v57 = vadd.f32 %v4031_v18, %v3871_v43  ;;  %v4277_v18 = vadd.f32 %v4276_v28, %v7987_v55 }
 0x760   : > { %4675 = vmatmul.f32.gmra.mxu3 %v7953_v8 }
 0x763   : > { %v4192_v42 = vpop.f32.mrf.mxu3 }
 0x764   : > { %v8022_v50 = vadd.f32 %v4192_v42, %v4032_v57  ;;  %v4519_v56 = vpop.f32.mrf.mxu2 }
 0x765   : > { %v4520_v0 = vadd.f32 %v4519_v56, %v7963_v39  ;;  %v4408_v56 = vpop.f32.mrf.mxu1 }
 0x76b   : > { %v4616_v3 = vpop.f32.mrf.mxu3 }
 0x76c   : > { %v4523_v21 = vpop.f32.mrf.mxu2  ;;  %v4617_v53 = vadd.f32 %v4616_v3, %v4520_v0  ;;  %v4397_v0 = vadd.f32 %v4396_v20, %v4277_v18 }
 0x76d   : > { %v4524_v37 = vadd.f32 %v4523_v21, %v7967_v47 }
 0x76e   : > { %5092 = vtanh.f32 %v4617_v53 }
 0x773   : > { %v4620_v7 = vpop.f32.mrf.mxu3 }
 0x774   : > { %v4527_v32 = vpop.f32.mrf.mxu2  ;;  %v4621_v5 = vadd.f32 %v4620_v7, %v4524_v37  ;;  %v5093_v13 = vpop.eup %5092  ;;  %v4282_v7 = vadd.f32 %v4281_v38, %v7991_v27 }
 0x775   : > { %v4528_v8 = vadd.f32 %v4527_v32, %v7971_v30  ;;  %v4791_v33 = vmul.f32 %v5093_v13, %v4714_v29  ;;  %v4724_v30 = vpop.permute.xlu0 %4723  ;;  %v4414_v13 = vpop.f32.mrf.mxu1 }
 0x776   : > { %5094 = vtanh.f32 %v4621_v5  ;;  %v4403_v55 = vadd.f32 %v4402_v14, %v4282_v7  ;;  %v4744_v29 = vpop.permute.xlu1 %4743 }
 0x77b   : > { %v4624_v31 = vpop.f32.mrf.mxu3 }
 0x77c   : > { %v5095_v60 = vpop.eup %5094  ;;  %v4531_v39 = vpop.f32.mrf.mxu2  ;;  %v4625_v54 = vadd.f32 %v4624_v31, %v4528_v8 }
 0x77d   : > { %v4792_v49 = vmul.f32 %v5095_v60, %v4719_v23  ;;  %v4532_v47 = vadd.f32 %v4531_v39, %v7975_v6  ;;  %v4272_v6 = vadd.f32 %v4271_v44, %v7983_v51  ;;  %v4739_v37 = vpop.permute.xlu0 %4738  ;;  %v4291_v44 = vpop.f32.mrf.mxu0  ;;  %v4287_v39 = vadd.f32 %v4286_v48, %v7995_v34 }
 0x77e   : > { %5096 = vtanh.f32 %v4625_v54  ;;  %v4420_v20 = vpop.f32.mrf.mxu1 }
 0x77f   : > { %v4807_v35 = vadd.f32 %v4792_v49, %v4791_v33  ;;  %v4391_v62 = vadd.f32 %v4390_v63, %v4272_v6  ;;  %v4409_v28 = vadd.f32 %v4408_v56, %v4287_v39 }
 0x783   : > { %v4628_v59 = vpop.f32.mrf.mxu3 }
 0x784   : > { %v5097_v4 = vpop.eup %5096  ;;  %v4535_v10 = vpop.f32.mrf.mxu2  ;;  %v4629_v46 = vadd.f32 %v4628_v59, %v4532_v47 }
 0x785   : > { %v4793_v17 = vmul.f32 %v5097_v4, %v4724_v30  ;;  %v4536_v61 = vadd.f32 %v4535_v10, %v7979_v58  ;;  %v4734_v58 = vpop.permute.xlu2 %4733  ;;  %v4296_v47 = vpop.f32.mrf.mxu0  ;;  %v4292_v10 = vadd.f32 %v4291_v44, %v7999_v40 }
 0x786   : > { %5098 = vtanh.f32 %v4629_v46  ;;  %v4754_v6 = vpop.permute.xlu0 %4753 }
 0x787   : > { %v4808_v1 = vadd.f32 %v4807_v35, %v4793_v17  ;;  %v4415_v34 = vadd.f32 %v4414_v13, %v4292_v10 }
 0x78b   : > { %v4632_v24 = vpop.f32.mrf.mxu3 }
 0x78c   : > { %v5099_v52 = vpop.eup %5098  ;;  %v4539_v11 = vpop.f32.mrf.mxu2  ;;  %v4633_v12 = vadd.f32 %v4632_v24, %v4536_v61 }
 0x78d   : > { %v4794_v15 = vmul.f32 %v5099_v52, %v4729_v22  ;;  %v4540_v9 = vadd.f32 %v4539_v11, %v4391_v62  ;;  %v4749_v30 = vpop.permute.xlu2 %4748  ;;  %v4301_v38 = vpop.f32.mrf.mxu0  ;;  %v4297_v11 = vadd.f32 %v4296_v47, %v8003_v26 }
 0x78e   : > { %5100 = vtanh.f32 %v4633_v12  ;;  %v4302_v18 = vadd.f32 %v4301_v38, %v8007_v2 }
 0x78f   : > { %v4809_v25 = vadd.f32 %v4808_v1, %v4794_v15  ;;  %v4426_v15 = vpop.f32.mrf.mxu1  ;;  %v4421_v40 = vadd.f32 %v4420_v20, %v4297_v11 }
 0x793   : > { %v4636_v16 = vpop.f32.mrf.mxu3 }
 0x794   : > { %v5101_v36 = vpop.eup %5100  ;;  %v4543_v43 = vpop.f32.mrf.mxu2  ;;  %v4637_v57 = vadd.f32 %v4636_v16, %v4540_v9 }
 0x795   : > { %v4795_v42 = vmul.f32 %v5101_v36, %v4734_v58  ;;  %v4544_v3 = vadd.f32 %v4543_v43, %v4397_v0  ;;  %v4306_v48 = vpop.f32.mrf.mxu0  ;;  %v4759_v58 = vpop.permute.xlu1 %4758 }
 0x796   : > { %5102 = vtanh.f32 %v4637_v57 }
 0x797   : > { %v4810_v51 = vadd.f32 %v4809_v25, %v4795_v42  ;;  %v4432_v56 = vpop.f32.mrf.mxu1 }
 0x79b   : > { %v4640_v21 = vpop.f32.mrf.mxu3 }
 0x79c   : > { %v5103_v53 = vpop.eup %5102  ;;  %v4547_v32 = vpop.f32.mrf.mxu2  ;;  %v4641_v5 = vadd.f32 %v4640_v21, %v4544_v3 }
 0x79d   : > { %v4796_v8 = vmul.f32 %v5103_v53, %v4739_v37  ;;  %v4548_v23 = vadd.f32 %v4547_v32, %v4403_v55  ;;  %v4764_v53 = vpop.permute.xlu2 %4763  ;;  %v4307_v37 = vadd.f32 %v4306_v48, %v8011_v41  ;;  %v4774_v20 = vpop.permute.xlu1 %4773 }
 0x79e   : > { %5104 = vtanh.f32 %v4641_v5  ;;  %v4311_v5 = vpop.f32.mrf.mxu0 }
 0x79f   : > { %v4811_v63 = vadd.f32 %v4810_v51, %v4796_v8  ;;  %v4427_v51 = vadd.f32 %v4426_v15, %v4302_v18  ;;  %v4433_v2 = vadd.f32 %v4432_v56, %v4307_v37 }
 0x7a3   : > { %v4644_v31 = vpop.f32.mrf.mxu3 }
 0x7a4   : > { %v5105_v60 = vpop.eup %5104  ;;  %v4551_v54 = vpop.f32.mrf.mxu2  ;;  %v4645_v33 = vadd.f32 %v4644_v31, %v4548_v23 }
 0x7a5   : > { %v4797_v49 = vmul.f32 %v5105_v60, %v4744_v29  ;;  %v4552_v35 = vadd.f32 %v4551_v54, %v4409_v28  ;;  %v4769_v31 = vpop.permute.xlu0 %4768  ;;  %v4312_v60 = vadd.f32 %v4311_v5, %v8015_v45  ;;  %v4779_v38 = vpop.permute.xlu2 %4778 }
 0x7a6   : > { %5106 = vtanh.f32 %v4645_v33  ;;  %v4316_v33 = vpop.f32.mrf.mxu0 }
 0x7a7   : > { %v4812_v27 = vadd.f32 %v4811_v63, %v4797_v49  ;;  %v4438_v63 = vpop.f32.mrf.mxu1 }
 0x7a8   : > { %v4439_v49 = vadd.f32 %v4438_v63, %v4312_v60 }
 0x7ab   : > { %v4648_v59 = vpop.f32.mrf.mxu3 }
 0x7ac   : > { %v5107_v4 = vpop.eup %5106  ;;  %v4555_v46 = vpop.f32.mrf.mxu2  ;;  %v4649_v17 = vadd.f32 %v4648_v59, %v4552_v35  ;;  %v4317_v59 = vadd.f32 %v4316_v33, %v8019_v19 }
 0x7ad   : > { %v4798_v61 = vmul.f32 %v5107_v4, %v4749_v30  ;;  %v4556_v24 = vadd.f32 %v4555_v46, %v4415_v34  ;;  %v4832_v56 = vpop.permute.xlu2 %4831 }
 0x7ae   : > { %5108 = vtanh.f32 %v4649_v17  ;;  %v4321_v17 = vpop.f32.mrf.mxu0 }
 0x7af   : > { %v4813_v1 = vadd.f32 %v4812_v27, %v4798_v61  ;;  %v4444_v27 = vpop.f32.mrf.mxu1 }
 0x7b0   : > { %v4445_v45 = vadd.f32 %v4444_v27, %v4317_v59 }
 0x7b3   : > { %v4652_v52 = vpop.f32.mrf.mxu3 }
 0x7b4   : > { %v5109_v22 = vpop.eup %5108  ;;  %v4559_v12 = vpop.f32.mrf.mxu2  ;;  %v4653_v14 = vadd.f32 %v4652_v52, %v4556_v24  ;;  %v4322_v24 = vadd.f32 %v4321_v17, %v8022_v50 }
 0x7b5   : > { %v4799_v25 = vmul.f32 %v5109_v22, %v4754_v6  ;;  %v4560_v9 = vadd.f32 %v4559_v12, %v4421_v40 }
 0x7b6   : > { %5110 = vtanh.f32 %v4653_v14 }
 0x7b7   : > { %v4814_v62 = vadd.f32 %v4813_v1, %v4799_v25  ;;  %v4450_v22 = vpop.f32.mrf.mxu1 }
 0x7b8   : > { %v4451_v19 = vadd.f32 %v4450_v22, %v4322_v24 }
 0x7bb   : > { %v4656_v16 = vpop.f32.mrf.mxu3 }
 0x7bc   : > { %v5111_v36 = vpop.eup %5110  ;;  %v4563_v43 = vpop.f32.mrf.mxu2  ;;  %v4657_v57 = vadd.f32 %v4656_v16, %v4560_v9 }
 0x7bd   : > { %v4800_v42 = vmul.f32 %v5111_v36, %v4759_v58  ;;  %v4564_v0 = vadd.f32 %v4563_v43, %v4427_v51  ;;  %v4789_v36 = vpop.permute.xlu1 %4788  ;;  %v4834_v51 = vperm.slane %v4832_v56, 0 }
 0x7be   : > { %5112 = vtanh.f32 %v4657_v57 }
 0x7bf   : > { %v4815_v26 = vadd.f32 %v4814_v62, %v4800_v42  ;;  %v4784_v62 = vpop.permute.xlu0 %4783 }
 0x7c3   : > { %v4660_v3 = vpop.f32.mrf.mxu3 }
 0x7c4   : > { %v5113_v21 = vpop.eup %5112  ;;  %v4567_v7 = vpop.f32.mrf.mxu2  ;;  %v4661_v32 = vadd.f32 %v4660_v3, %v4564_v0 }
 0x7c5   : > { %v4801_v44 = vmul.f32 %v5113_v21, %v4764_v53  ;;  %v4568_v55 = vadd.f32 %v4567_v7, %v4433_v2 }
 0x7c6   : > { %5114 = vtanh.f32 %v4661_v32 }
 0x7c7   : > { %v4816_v8 = vadd.f32 %v4815_v26, %v4801_v44 }
 0x7cb   : > { %v4664_v13 = vpop.f32.mrf.mxu3 }
 0x7cc   : > { %v5115_v23 = vpop.eup %5114  ;;  %v4571_v29 = vpop.f32.mrf.mxu2  ;;  %v4665_v39 = vadd.f32 %v4664_v13, %v4568_v55 }
 0x7cd   : > { %v4802_v54 = vmul.f32 %v5115_v23, %v4769_v31  ;;  %v4572_v47 = vadd.f32 %v4571_v29, %v4439_v49 }
 0x7ce   : > { %5116 = vtanh.f32 %v4665_v39 }
 0x7cf   : > { %v4817_v41 = vadd.f32 %v4816_v8, %v4802_v54 }
 0x7d3   : > { %v4668_v28 = vpop.f32.mrf.mxu3 }
 0x7d4   : > { %v5117_v35 = vpop.eup %5116  ;;  %v4669_v4 = vadd.f32 %v4668_v28, %v4572_v47  ;;  %v4575_v10 = vpop.f32.mrf.mxu2 }
 0x7d5   : > { %v4803_v30 = vmul.f32 %v5117_v35, %v4774_v20  ;;  %v4576_v61 = vadd.f32 %v4575_v10, %v4445_v45 }
 0x7d6   : > { %5118 = vtanh.f32 %v4669_v4 }
 0x7d7   : > { %v4818_v46 = vadd.f32 %v4817_v41, %v4803_v30 }
 0x7db   : > { %v4672_v1 = vpop.f32.mrf.mxu3 }
 0x7dc   : > { %v5119_v34 = vpop.eup %5118  ;;  %v4673_v52 = vadd.f32 %v4672_v1, %v4576_v61  ;;  %v4579_v12 = vpop.f32.mrf.mxu2 }
 0x7dd   : > { %v4804_v6 = vmul.f32 %v5119_v34, %v4779_v38  ;;  %v4580_v14 = vadd.f32 %v4579_v12, %v4451_v19 }
 0x7de   : > { %5120 = vtanh.f32 %v4673_v52 }
 0x7df   : > { %v4819_v11 = vadd.f32 %v4818_v46, %v4804_v6 }
 0x7e3   : > { %v4676_v15 = vpop.f32.mrf.mxu3 }
 0x7e4   : > { %v5121_v25 = vpop.eup %5120  ;;  %v4677_v40 = vadd.f32 %v4676_v15, %v4580_v14 }
 0x7e5   : > { %v4805_v9 = vmul.f32 %v5121_v25, %v4784_v62 }
 0x7e6   : > { %5122 = vtanh.f32 %v4677_v40 }
 0x7e7   : > { %v4820_v48 = vadd.f32 %v4819_v11, %v4805_v9 }
 0x7ec   : > { %v5123_v16 = vpop.eup %5122 }
 0x7ed   : > { %v4806_v58 = vmul.f32 %v5123_v16, %v4789_v36 }
 0x7ef   : > { %v4821_v50 = vadd.f32 %v4820_v48, %v4806_v58 }
 0x7f1   : > { %v4822_v18 = vrot.slane %v4821_v50, 4 }
 0x7f3   : > { %v4823_v43 = vadd.f32 %v4822_v18, %v4821_v50 }
 0x7f5   : > { %v4824_v57 = vrot.slane %v4823_v43, 2 }
 0x7f7   : > { %v4825_v42 = vadd.f32 %v4824_v57, %v4823_v43 }
 0x7f9   : > { %v4826_v26 = vrot.slane %v4825_v42, 1 }
 0x7fb   : > { %v4827_v0 = vadd.f32 %v4826_v26, %v4825_v42 }
 0x7fd   : > { %v4835_v3 = vadd.f32 %v4834_v51, %v4827_v0 }
 0x7ff   : > { %4836 = vst [vmem:[%s514_s23] sm:$0x1] %v4835_v3 }
 0x800 PF: > { %s27_s20 = sadd.s32 1, %s5130_s20  }
 0x801   : > { %p24_p4 = scmp.ge.s32.totalorder %s27_s20, 5  }
 0x803   :  { %26 = sbr.rel (!%p24_p4) target bundleno = 3 (0x3), region = 116 }

</bundles_post_ra>
